<compile_context>
chip_gen: v7x
topology: tpu7x:2x2x1
jax: 0.10.0
libtpu: 0.0.40
codegen_flags: <defaults>
</compile_context>

<pallas_src>
import jax
import jax.numpy as jnp
from jax.experimental import pallas as pl
from jax.experimental.pallas import tpu as pltpu


def _round_up(x, m):
    return (x + m - 1) // m * m


def _pick_block(n):
    # Prefer large batch blocks (bigger GEMM M, fewer grid steps), but keep >=2 grid
    # steps when the batch allows it so the "parallel" axis can use both v7x cores.
    half = _round_up(max(1, (n + 1) // 2), 8)
    return max(8, min(64, half))


# ---------------------------------------------------------------------------
# Fused kernel: whole LeNet forward for one block of NB images.
# Refs:
#   xp_ref  : (7, 7, NB, 16)  4x4 space-to-depth of the 28x28 input
#   g1_ref  : (4, 16, 96)     conv1 weights gathered per (r4,c4); cols = (qa,qb|op,oq|co)
#   b1_ref  : (1, 24)         conv1 bias tiled per (op,oq)
#   g2_ref  : (9, 24, 64)     conv2 weights gathered per (r2,c2); cols = (qa,qb|co2)
#   p1_ref  : (6, 6, NB, 24)  VMEM scratch: pool1, parity-packed (rp,cp,c) on lanes
#   p2_ref  : (NB, 256)       VMEM scratch: per-sample flattened pool2 features
#   out_ref : (NB, 10)        logits
# ---------------------------------------------------------------------------
def _lenet_kernel(xp_ref, g1_ref, b1_ref, g2_ref, b2_ref,
                  wfc1_ref, bfc1_ref, wfc2_ref, bfc2_ref, wfc3_ref, bfc3_ref,
                  out_ref, p1_ref, p2_ref):
    f32 = jnp.float32
    nb = xp_ref.shape[2]
    m1 = 6 * 6 * nb          # rows of the stage-1 GEMMs (pool1 block position x batch)
    m2 = 4 * 4 * nb          # rows of the stage-2 GEMMs (pool2 position x batch)

    # ---- stage 1: conv1 (5x5, 1->6) + maxpool2 + relu -------------------------
    # 4 dots, one per 4x4-block offset (r4, c4); K = 16 space-to-depth phases,
    # N = 96 = (qa,qb | op,oq | co).
    acc = jnp.zeros((m1, 96), f32)
    for r4 in range(2):
        for c4 in range(2):
            xs = xp_ref[r4:r4 + 6, c4:c4 + 6, :, :].reshape(m1, 16)
            acc = acc + jnp.dot(xs, g1_ref[r4 * 2 + c4],
                                preferred_element_type=f32)
    # max-pool = max over the four contiguous 24-lane quadrant groups, then bias+ReLU.
    pooled = jnp.maximum(acc[:, 0:24], acc[:, 24:48])
    pooled = jnp.maximum(pooled, acc[:, 48:72])
    pooled = jnp.maximum(pooled, acc[:, 72:96])
    pooled = jnp.maximum(pooled + b1_ref[...], 0.0)          # (m1, 24) = (P,Q,n | rp,cp,c)
    p1_ref[...] = pooled.reshape(6, 6, nb, 24)               # single wide store

    # ---- stage 2: conv2 (5x5, 6->16) + maxpool2 + relu -------------------------
    # 9 dots, one per 2x2-block offset (r2, c2); K = 24 = (rp,cp,ci), N = 64 = (qa,qb,co2).
    acc2 = jnp.zeros((m2, 64), f32)
    for r2 in range(3):
        for c2 in range(3):
            xs2 = p1_ref[r2:r2 + 4, c2:c2 + 4, :, :].reshape(m2, 24)
            acc2 = acc2 + jnp.dot(xs2, g2_ref[r2 * 3 + c2],
                                  preferred_element_type=f32)
    pooled2 = jnp.maximum(acc2[:, 0:16], acc2[:, 16:32])
    pooled2 = jnp.maximum(pooled2, acc2[:, 32:48])
    pooled2 = jnp.maximum(pooled2, acc2[:, 48:64])
    pooled2 = jnp.maximum(pooled2 + b2_ref[...], 0.0)        # (m2, 16), rows = (p2h,p2w,n)

    # ---- assemble (NB, 256) per-sample rows for the single fc1 GEMM ------------
    p2v = pooled2.reshape(16, nb, 16)                        # (pos, n, c)
    for pos in range(16):
        p2_ref[:, pos * 16:(pos + 1) * 16] = p2v[pos]        # feature col = pos*16 + c

    # ---- MLP head ---------------------------------------------------------------
    h1 = jnp.maximum(jnp.dot(p2_ref[...], wfc1_ref[...],
                             preferred_element_type=f32) + bfc1_ref[...], 0.0)
    h2 = jnp.maximum(jnp.dot(h1, wfc2_ref[...],
                             preferred_element_type=f32) + bfc2_ref[...], 0.0)
    out_ref[...] = (jnp.dot(h2, wfc3_ref[...],
                            preferred_element_type=f32) + bfc3_ref[...])


# ---------------------------------------------------------------------------
# Model-boundary layout transforms (cheap XLA ops on input / weights only).
# ---------------------------------------------------------------------------
def _prep_inputs(x_pad, params):
    n_pad = x_pad.shape[0]

    # 4x4 space-to-depth: (N,1,28,28) -> (7, 7, N, 16), phase p = 4*rm + cm.
    xp = x_pad[:, 0].reshape(n_pad, 7, 4, 7, 4)
    xp = xp.transpose(1, 3, 0, 2, 4).reshape(7, 7, n_pad, 16)

    two = jnp.arange(2)
    four = jnp.arange(4)
    three = jnp.arange(3)

    # conv1 gathered weights g1[(r4,c4), (rm,cm), (qa,qb|op,oq|co)]:
    # pool1 output row ph = 2P + op, quadrant row qa -> conv row 4P + 2op + qa, input
    # row 4(P+r4) + rm, so tap u = 4*r4 + rm - 2*op - qa (zero if outside [0,4]).
    w1 = params["conv1_w"][:, 0].transpose(1, 2, 0)            # (u, v, co)
    r4 = two.reshape(2, 1, 1, 1, 1, 1, 1, 1)
    c4 = two.reshape(1, 2, 1, 1, 1, 1, 1, 1)
    rm = four.reshape(1, 1, 4, 1, 1, 1, 1, 1)
    cm = four.reshape(1, 1, 1, 4, 1, 1, 1, 1)
    qa = two.reshape(1, 1, 1, 1, 2, 1, 1, 1)
    qb = two.reshape(1, 1, 1, 1, 1, 2, 1, 1)
    op = two.reshape(1, 1, 1, 1, 1, 1, 2, 1)
    oq = two.reshape(1, 1, 1, 1, 1, 1, 1, 2)
    u = 4 * r4 + rm - 2 * op - qa
    v = 4 * c4 + cm - 2 * oq - qb
    ok = (u >= 0) & (u <= 4) & (v >= 0) & (v <= 4)
    g1 = jnp.where(ok[..., None], w1[jnp.clip(u, 0, 4), jnp.clip(v, 0, 4)], 0.0)
    g1 = jnp.broadcast_to(g1, (2, 2, 4, 4, 2, 2, 2, 2, 6)).reshape(4, 16, 96)

    b1 = jnp.tile(params["conv1_b"].reshape(1, 6), (1, 4))     # (1, 24), per (op,oq)

    # conv2 gathered weights g2[(r2,c2), (rp,cp,ci), (qa,qb,co2)]:
    # pool1 row = 2(p2h+r2) + rp feeds conv2 row 2*p2h + qa at tap u = 2*r2 + rp - qa.
    w2 = params["conv2_w"].transpose(2, 3, 1, 0)               # (u, v, ci, co2)
    r2 = three.reshape(3, 1, 1, 1, 1, 1)
    c2 = three.reshape(1, 3, 1, 1, 1, 1)
    rp = two.reshape(1, 1, 2, 1, 1, 1)
    cp = two.reshape(1, 1, 1, 2, 1, 1)
    qa2 = two.reshape(1, 1, 1, 1, 2, 1)
    qb2 = two.reshape(1, 1, 1, 1, 1, 2)
    u2 = 2 * r2 + rp - qa2
    v2 = 2 * c2 + cp - qb2
    ok2 = (u2 >= 0) & (u2 <= 4) & (v2 >= 0) & (v2 <= 4)
    g2 = jnp.where(ok2[..., None, None],
                   w2[jnp.clip(u2, 0, 4), jnp.clip(v2, 0, 4)], 0.0)
    g2 = jnp.broadcast_to(g2, (3, 3, 2, 2, 2, 2, 6, 16))       # (r2,c2,rp,cp,qa,qb,ci,co2)
    g2 = g2.transpose(0, 1, 2, 3, 6, 4, 5, 7).reshape(9, 24, 64)

    # fc1 weights permuted to the kernel's (p2h, p2w, c) feature order
    # (PyTorch .view(-1, 256) flattens NCHW as c*16 + h*4 + w).
    wfc1 = params["fc1_w"].reshape(16, 4, 4, 120).transpose(1, 2, 0, 3).reshape(256, 120)

    return (xp, g1, b1, g2, params["conv2_b"].reshape(1, 16),
            wfc1, params["fc1_b"].reshape(1, 120),
            params["fc2_w"], params["fc2_b"].reshape(1, 84),
            params["fc3_w"], params["fc3_b"].reshape(1, 10))


def lenet_forward(x, params, *, block_n=None):
    """x: (N, 1, 28, 28) float32 NCHW (same convention as the PyTorch module)."""
    n = x.shape[0]
    nb = block_n if block_n is not None else _pick_block(n)
    assert nb % 8 == 0, "batch block must be a multiple of 8 (sublane alignment)"
    n_pad = _round_up(n, nb)
    if n_pad != n:
        x = jnp.pad(x, ((0, n_pad - n), (0, 0), (0, 0), (0, 0)))
    ins = _prep_inputs(x, params)
    grid = (n_pad // nb,)
    vmem_limit = (48 if nb <= 96 else 64) * 1024 * 1024

    def rep(shape):  # whole-array, VMEM-resident (weights / biases)
        return pl.BlockSpec(shape, lambda i: (0,) * len(shape))

    out = pl.pallas_call(
        _lenet_kernel,
        out_shape=jax.ShapeDtypeStruct((n_pad, 10), jnp.float32),
        grid=grid,
        in_specs=[
            pl.BlockSpec((7, 7, nb, 16), lambda i: (0, 0, i, 0)),   # input block
            rep((4, 16, 96)),    # gathered conv1 weights
            rep((1, 24)),        # conv1 bias (tiled per output parity)
            rep((9, 24, 64)),    # gathered conv2 weights
            rep((1, 16)),        # conv2 bias
            rep((256, 120)),     # fc1 weights (permuted to kernel feature order)
            rep((1, 120)),
            rep((120, 84)),
            rep((1, 84)),
            rep((84, 10)),
            rep((1, 10)),
        ],
        out_specs=pl.BlockSpec((nb, 10), lambda i: (i, 0)),
        scratch_shapes=[pltpu.VMEM((6, 6, nb, 24), jnp.float32),    # pool1, parity-packed
                        pltpu.VMEM((nb, 256), jnp.float32)],        # flattened pool2 rows
        compiler_params=pltpu.CompilerParams(
            dimension_semantics=("parallel",),
            vmem_limit_bytes=vmem_limit),
    )(*ins)
    return out[:n]


# ---------------------------------------------------------------------------
# Deterministic parameter init (PyTorch-style uniform(-1/sqrt(fan_in), 1/sqrt(fan_in)))
# ---------------------------------------------------------------------------
def init_params(key):
    ks = jax.random.split(key, 10)

    def u(k, shape, fan_in):
        bound = 1.0 / float(fan_in) ** 0.5
        return jax.random.uniform(k, shape, jnp.float32, -bound, bound)

    return {
        "conv1_w": u(ks[0], (6, 1, 5, 5), 25),
        "conv1_b": u(ks[1], (6,), 25),
        "conv2_w": u(ks[2], (16, 6, 5, 5), 150),
        "conv2_b": u(ks[3], (16,), 150),
        "fc1_w": u(ks[4], (256, 120), 256),   # stored (in, out); in-index = c*16 + h*4 + w
        "fc1_b": u(ks[5], (1, 120), 256),
        "fc2_w": u(ks[6], (120, 84), 120),
        "fc2_b": u(ks[7], (1, 84), 120),
        "fc3_w": u(ks[8], (84, 10), 84),
        "fc3_b": u(ks[9], (1, 10), 84),
    }


# Pure-JAX reference (correctness check only)
def lenet_reference(x, p):
    dn = ("NCHW", "OIHW", "NCHW")
    y = jax.lax.conv_general_dilated(x, p["conv1_w"], (1, 1), "VALID",
                                     dimension_numbers=dn) + p["conv1_b"][None, :, None, None]
    y = jax.lax.reduce_window(y, -jnp.inf, jax.lax.max, (1, 1, 2, 2), (1, 1, 2, 2), "VALID")
    y = jnp.maximum(y, 0.0)
    y = jax.lax.conv_general_dilated(y, p["conv2_w"], (1, 1), "VALID",
                                     dimension_numbers=dn) + p["conv2_b"][None, :, None, None]
    y = jax.lax.reduce_window(y, -jnp.inf, jax.lax.max, (1, 1, 2, 2), (1, 1, 2, 2), "VALID")
    y = jnp.maximum(y, 0.0)
    y = y.reshape(y.shape[0], -1)
    y = jnp.maximum(y @ p["fc1_w"] + p["fc1_b"], 0.0)
    y = jnp.maximum(y @ p["fc2_w"] + p["fc2_b"], 0.0)
    return y @ p["fc3_w"] + p["fc3_b"]


if __name__ == "__main__":
    key = jax.random.PRNGKey(0)
    kx, kp = jax.random.split(key)
    params = init_params(kp)
    fwd = jax.jit(lenet_forward)

    # small batch: single grid step
    x_small = jax.random.normal(kx, (2, 1, 28, 28), jnp.float32)   # LeNet needs 28x28 (fc1 = 16*4*4)
    out_small = jax.block_until_ready(fwd(x_small, params))
    assert out_small.shape == (2, 10), out_small.shape
    err_small = float(jnp.max(jnp.abs(out_small - lenet_reference(x_small, params))))
    assert err_small < 1e-3, f"small-batch mismatch vs reference: {err_small}"

    # larger, non-multiple-of-block batch: exercises multiple grid steps + padded rows
    x_big = jax.random.normal(jax.random.PRNGKey(1), (150, 1, 28, 28), jnp.float32)
    out_big = jax.block_until_ready(fwd(x_big, params))
    assert out_big.shape == (150, 10), out_big.shape
    err_big = float(jnp.max(jnp.abs(out_big - lenet_reference(x_big, params))))
    assert err_big < 1e-3, f"multi-block mismatch vs reference: {err_big}"

    print("KERNEL_OK")
</pallas_src>

<mosaic_0001>
module attributes {stable_mosaic.version = 11 : i64} {
  func.func @_lenet_kernel(%arg0: i32, %arg1: memref<7x7x8x16xf32, #tpu.memory_space<vmem>>, %arg2: memref<4x16x96xf32, #tpu.memory_space<vmem>>, %arg3: memref<1x24xf32, #tpu.memory_space<vmem>>, %arg4: memref<9x24x64xf32, #tpu.memory_space<vmem>>, %arg5: memref<1x16xf32, #tpu.memory_space<vmem>>, %arg6: memref<256x120xf32, #tpu.memory_space<vmem>>, %arg7: memref<1x120xf32, #tpu.memory_space<vmem>>, %arg8: memref<120x84xf32, #tpu.memory_space<vmem>>, %arg9: memref<1x84xf32, #tpu.memory_space<vmem>>, %arg10: memref<84x10xf32, #tpu.memory_space<vmem>>, %arg11: memref<1x10xf32, #tpu.memory_space<vmem>>, %arg12: memref<8x10xf32, #tpu.memory_space<vmem>>, %arg13: memref<6x6x8x24xf32, #tpu.memory_space<vmem>>, %arg14: memref<8x256xf32, #tpu.memory_space<vmem>>) attributes {dimension_semantics = [#tpu.dimension_semantics<parallel>], iteration_bounds = array<i64: 1>, scalar_prefetch = 0 : i64, scratch_operands = 2 : i64, tpu.core_type = #tpu.core_type<tc>, window_params = [{transform_indices = @transform_0, window_bounds = array<i64: 7, 7, 8, 16>}, {pipeline_mode = #tpu.pipeline_mode<synchronous>, transform_indices = @transform_1, window_bounds = array<i64: 4, 16, 96>}, {pipeline_mode = #tpu.pipeline_mode<synchronous>, transform_indices = @transform_2, window_bounds = array<i64: 1, 24>}, {pipeline_mode = #tpu.pipeline_mode<synchronous>, transform_indices = @transform_3, window_bounds = array<i64: 9, 24, 64>}, {pipeline_mode = #tpu.pipeline_mode<synchronous>, transform_indices = @transform_4, window_bounds = array<i64: 1, 16>}, {pipeline_mode = #tpu.pipeline_mode<synchronous>, transform_indices = @transform_5, window_bounds = array<i64: 256, 120>}, {pipeline_mode = #tpu.pipeline_mode<synchronous>, transform_indices = @transform_6, window_bounds = array<i64: 1, 120>}, {pipeline_mode = #tpu.pipeline_mode<synchronous>, transform_indices = @transform_7, window_bounds = array<i64: 120, 84>}, {pipeline_mode = #tpu.pipeline_mode<synchronous>, transform_indices = @transform_8, window_bounds = array<i64: 1, 84>}, {pipeline_mode = #tpu.pipeline_mode<synchronous>, transform_indices = @transform_9, window_bounds = array<i64: 84, 10>}, {pipeline_mode = #tpu.pipeline_mode<synchronous>, transform_indices = @transform_10, window_bounds = array<i64: 1, 10>}, {transform_indices = @transform_11, window_bounds = array<i64: 8, 10>}]} {
    %cst = arith.constant 0.000000e+00 : f32
    %0 = vector.broadcast %cst : f32 to vector<288x96xf32>
    %c0 = arith.constant 0 : index
    %c0_0 = arith.constant 0 : index
    %c0_1 = arith.constant 0 : index
    %c0_2 = arith.constant 0 : index
    %1 = vector.load %arg1[%c0, %c0_0, %c0_1, %c0_2] : memref<7x7x8x16xf32, #tpu.memory_space<vmem>>, vector<6x6x8x16xf32>
    %2 = vector.shape_cast %1 : vector<6x6x8x16xf32> to vector<288x16xf32>
    %c0_3 = arith.constant 0 : index
    %c0_4 = arith.constant 0 : index
    %c0_5 = arith.constant 0 : index
    %3 = vector.load %arg2[%c0_3, %c0_4, %c0_5] : memref<4x16x96xf32, #tpu.memory_space<vmem>>, vector<1x16x96xf32>
    %4 = vector.shape_cast %3 : vector<1x16x96xf32> to vector<16x96xf32>
    %cst_6 = arith.constant dense<0.000000e+00> : vector<288x96xf32>
    %5 = tpu.matmul %2, %4, %cst_6 {dimension_numbers = #tpu.dot_dimension_numbers<[1], [0], [0], [1], [0, 0, 1, 1], [], []>} : vector<288x16xf32>, vector<16x96xf32>, vector<288x96xf32> -> vector<288x96xf32>
    %6 = arith.addf %0, %5 : vector<288x96xf32>
    %c0_7 = arith.constant 0 : index
    %c1 = arith.constant 1 : index
    %c0_8 = arith.constant 0 : index
    %c0_9 = arith.constant 0 : index
    %7 = vector.load %arg1[%c0_7, %c1, %c0_8, %c0_9] : memref<7x7x8x16xf32, #tpu.memory_space<vmem>>, vector<6x6x8x16xf32>
    %8 = vector.shape_cast %7 : vector<6x6x8x16xf32> to vector<288x16xf32>
    %c1_10 = arith.constant 1 : index
    %c0_11 = arith.constant 0 : index
    %c0_12 = arith.constant 0 : index
    %9 = vector.load %arg2[%c1_10, %c0_11, %c0_12] : memref<4x16x96xf32, #tpu.memory_space<vmem>>, vector<1x16x96xf32>
    %10 = vector.shape_cast %9 : vector<1x16x96xf32> to vector<16x96xf32>
    %cst_13 = arith.constant dense<0.000000e+00> : vector<288x96xf32>
    %11 = tpu.matmul %8, %10, %cst_13 {dimension_numbers = #tpu.dot_dimension_numbers<[1], [0], [0], [1], [0, 0, 1, 1], [], []>} : vector<288x16xf32>, vector<16x96xf32>, vector<288x96xf32> -> vector<288x96xf32>
    %12 = arith.addf %6, %11 : vector<288x96xf32>
    %c1_14 = arith.constant 1 : index
    %c0_15 = arith.constant 0 : index
    %c0_16 = arith.constant 0 : index
    %c0_17 = arith.constant 0 : index
    %13 = vector.load %arg1[%c1_14, %c0_15, %c0_16, %c0_17] : memref<7x7x8x16xf32, #tpu.memory_space<vmem>>, vector<6x6x8x16xf32>
    %14 = vector.shape_cast %13 : vector<6x6x8x16xf32> to vector<288x16xf32>
    %c2 = arith.constant 2 : index
    %c0_18 = arith.constant 0 : index
    %c0_19 = arith.constant 0 : index
    %15 = vector.load %arg2[%c2, %c0_18, %c0_19] : memref<4x16x96xf32, #tpu.memory_space<vmem>>, vector<1x16x96xf32>
    %16 = vector.shape_cast %15 : vector<1x16x96xf32> to vector<16x96xf32>
    %cst_20 = arith.constant dense<0.000000e+00> : vector<288x96xf32>
    %17 = tpu.matmul %14, %16, %cst_20 {dimension_numbers = #tpu.dot_dimension_numbers<[1], [0], [0], [1], [0, 0, 1, 1], [], []>} : vector<288x16xf32>, vector<16x96xf32>, vector<288x96xf32> -> vector<288x96xf32>
    %18 = arith.addf %12, %17 : vector<288x96xf32>
    %c1_21 = arith.constant 1 : index
    %c1_22 = arith.constant 1 : index
    %c0_23 = arith.constant 0 : index
    %c0_24 = arith.constant 0 : index
    %19 = vector.load %arg1[%c1_21, %c1_22, %c0_23, %c0_24] : memref<7x7x8x16xf32, #tpu.memory_space<vmem>>, vector<6x6x8x16xf32>
    %20 = vector.shape_cast %19 : vector<6x6x8x16xf32> to vector<288x16xf32>
    %c3 = arith.constant 3 : index
    %c0_25 = arith.constant 0 : index
    %c0_26 = arith.constant 0 : index
    %21 = vector.load %arg2[%c3, %c0_25, %c0_26] : memref<4x16x96xf32, #tpu.memory_space<vmem>>, vector<1x16x96xf32>
    %22 = vector.shape_cast %21 : vector<1x16x96xf32> to vector<16x96xf32>
    %cst_27 = arith.constant dense<0.000000e+00> : vector<288x96xf32>
    %23 = tpu.matmul %20, %22, %cst_27 {dimension_numbers = #tpu.dot_dimension_numbers<[1], [0], [0], [1], [0, 0, 1, 1], [], []>} : vector<288x16xf32>, vector<16x96xf32>, vector<288x96xf32> -> vector<288x96xf32>
    %24 = arith.addf %18, %23 : vector<288x96xf32>
    %25 = vector.extract_strided_slice %24 {offsets = [0, 0], sizes = [288, 24], strides = [1, 1]} : vector<288x96xf32> to vector<288x24xf32>
    %26 = vector.extract_strided_slice %24 {offsets = [0, 24], sizes = [288, 24], strides = [1, 1]} : vector<288x96xf32> to vector<288x24xf32>
    %27 = arith.maximumf %25, %26 : vector<288x24xf32>
    %28 = vector.extract_strided_slice %24 {offsets = [0, 48], sizes = [288, 24], strides = [1, 1]} : vector<288x96xf32> to vector<288x24xf32>
    %29 = arith.maximumf %27, %28 : vector<288x24xf32>
    %30 = vector.extract_strided_slice %24 {offsets = [0, 72], sizes = [288, 24], strides = [1, 1]} : vector<288x96xf32> to vector<288x24xf32>
    %31 = arith.maximumf %29, %30 : vector<288x24xf32>
    %c0_28 = arith.constant 0 : index
    %c0_29 = arith.constant 0 : index
    %32 = vector.load %arg3[%c0_28, %c0_29] : memref<1x24xf32, #tpu.memory_space<vmem>>, vector<1x24xf32>
    %33 = vector.broadcast %32 : vector<1x24xf32> to vector<288x24xf32>
    %34 = arith.addf %31, %33 : vector<288x24xf32>
    %cst_30 = arith.constant 0.000000e+00 : f32
    %35 = vector.broadcast %cst_30 : f32 to vector<288x24xf32>
    %36 = arith.maximumf %34, %35 : vector<288x24xf32>
    %37 = vector.shape_cast %36 : vector<288x24xf32> to vector<6x6x8x24xf32>
    %c0_31 = arith.constant 0 : index
    %c0_32 = arith.constant 0 : index
    %c0_33 = arith.constant 0 : index
    %c0_34 = arith.constant 0 : index
    %38 = vector.load %arg13[%c0_31, %c0_32, %c0_33, %c0_34] : memref<6x6x8x24xf32, #tpu.memory_space<vmem>>, vector<6x6x8x24xf32>
    tpu.vector_store %arg13[%c0_31, %c0_32, %c0_33, %c0_34], %37 {strides = array<i32>} : memref<6x6x8x24xf32, #tpu.memory_space<vmem>>, vector<6x6x8x24xf32>,
    %cst_35 = arith.constant 0.000000e+00 : f32
    %39 = vector.broadcast %cst_35 : f32 to vector<128x64xf32>
    %c0_36 = arith.constant 0 : index
    %c0_37 = arith.constant 0 : index
    %c0_38 = arith.constant 0 : index
    %c0_39 = arith.constant 0 : index
    %40 = vector.load %arg13[%c0_36, %c0_37, %c0_38, %c0_39] : memref<6x6x8x24xf32, #tpu.memory_space<vmem>>, vector<4x4x8x24xf32>
    %41 = vector.shape_cast %40 : vector<4x4x8x24xf32> to vector<128x24xf32>
    %c0_40 = arith.constant 0 : index
    %c0_41 = arith.constant 0 : index
    %c0_42 = arith.constant 0 : index
    %42 = vector.load %arg4[%c0_40, %c0_41, %c0_42] : memref<9x24x64xf32, #tpu.memory_space<vmem>>, vector<1x24x64xf32>
    %43 = vector.shape_cast %42 : vector<1x24x64xf32> to vector<24x64xf32>
    %cst_43 = arith.constant dense<0.000000e+00> : vector<128x64xf32>
    %44 = tpu.matmul %41, %43, %cst_43 {dimension_numbers = #tpu.dot_dimension_numbers<[1], [0], [0], [1], [0, 0, 1, 1], [], []>} : vector<128x24xf32>, vector<24x64xf32>, vector<128x64xf32> -> vector<128x64xf32>
    %45 = arith.addf %39, %44 : vector<128x64xf32>
    %c0_44 = arith.constant 0 : index
    %c1_45 = arith.constant 1 : index
    %c0_46 = arith.constant 0 : index
    %c0_47 = arith.constant 0 : index
    %46 = vector.load %arg13[%c0_44, %c1_45, %c0_46, %c0_47] : memref<6x6x8x24xf32, #tpu.memory_space<vmem>>, vector<4x4x8x24xf32>
    %47 = vector.shape_cast %46 : vector<4x4x8x24xf32> to vector<128x24xf32>
    %c1_48 = arith.constant 1 : index
    %c0_49 = arith.constant 0 : index
    %c0_50 = arith.constant 0 : index
    %48 = vector.load %arg4[%c1_48, %c0_49, %c0_50] : memref<9x24x64xf32, #tpu.memory_space<vmem>>, vector<1x24x64xf32>
    %49 = vector.shape_cast %48 : vector<1x24x64xf32> to vector<24x64xf32>
    %cst_51 = arith.constant dense<0.000000e+00> : vector<128x64xf32>
    %50 = tpu.matmul %47, %49, %cst_51 {dimension_numbers = #tpu.dot_dimension_numbers<[1], [0], [0], [1], [0, 0, 1, 1], [], []>} : vector<128x24xf32>, vector<24x64xf32>, vector<128x64xf32> -> vector<128x64xf32>
    %51 = arith.addf %45, %50 : vector<128x64xf32>
    %c0_52 = arith.constant 0 : index
    %c2_53 = arith.constant 2 : index
    %c0_54 = arith.constant 0 : index
    %c0_55 = arith.constant 0 : index
    %52 = vector.load %arg13[%c0_52, %c2_53, %c0_54, %c0_55] : memref<6x6x8x24xf32, #tpu.memory_space<vmem>>, vector<4x4x8x24xf32>
    %53 = vector.shape_cast %52 : vector<4x4x8x24xf32> to vector<128x24xf32>
    %c2_56 = arith.constant 2 : index
    %c0_57 = arith.constant 0 : index
    %c0_58 = arith.constant 0 : index
    %54 = vector.load %arg4[%c2_56, %c0_57, %c0_58] : memref<9x24x64xf32, #tpu.memory_space<vmem>>, vector<1x24x64xf32>
    %55 = vector.shape_cast %54 : vector<1x24x64xf32> to vector<24x64xf32>
    %cst_59 = arith.constant dense<0.000000e+00> : vector<128x64xf32>
    %56 = tpu.matmul %53, %55, %cst_59 {dimension_numbers = #tpu.dot_dimension_numbers<[1], [0], [0], [1], [0, 0, 1, 1], [], []>} : vector<128x24xf32>, vector<24x64xf32>, vector<128x64xf32> -> vector<128x64xf32>
    %57 = arith.addf %51, %56 : vector<128x64xf32>
    %c1_60 = arith.constant 1 : index
    %c0_61 = arith.constant 0 : index
    %c0_62 = arith.constant 0 : index
    %c0_63 = arith.constant 0 : index
    %58 = vector.load %arg13[%c1_60, %c0_61, %c0_62, %c0_63] : memref<6x6x8x24xf32, #tpu.memory_space<vmem>>, vector<4x4x8x24xf32>
    %59 = vector.shape_cast %58 : vector<4x4x8x24xf32> to vector<128x24xf32>
    %c3_64 = arith.constant 3 : index
    %c0_65 = arith.constant 0 : index
    %c0_66 = arith.constant 0 : index
    %60 = vector.load %arg4[%c3_64, %c0_65, %c0_66] : memref<9x24x64xf32, #tpu.memory_space<vmem>>, vector<1x24x64xf32>
    %61 = vector.shape_cast %60 : vector<1x24x64xf32> to vector<24x64xf32>
    %cst_67 = arith.constant dense<0.000000e+00> : vector<128x64xf32>
    %62 = tpu.matmul %59, %61, %cst_67 {dimension_numbers = #tpu.dot_dimension_numbers<[1], [0], [0], [1], [0, 0, 1, 1], [], []>} : vector<128x24xf32>, vector<24x64xf32>, vector<128x64xf32> -> vector<128x64xf32>
    %63 = arith.addf %57, %62 : vector<128x64xf32>
    %c1_68 = arith.constant 1 : index
    %c1_69 = arith.constant 1 : index
    %c0_70 = arith.constant 0 : index
    %c0_71 = arith.constant 0 : index
    %64 = vector.load %arg13[%c1_68, %c1_69, %c0_70, %c0_71] : memref<6x6x8x24xf32, #tpu.memory_space<vmem>>, vector<4x4x8x24xf32>
    %65 = vector.shape_cast %64 : vector<4x4x8x24xf32> to vector<128x24xf32>
    %c4 = arith.constant 4 : index
    %c0_72 = arith.constant 0 : index
    %c0_73 = arith.constant 0 : index
    %66 = vector.load %arg4[%c4, %c0_72, %c0_73] : memref<9x24x64xf32, #tpu.memory_space<vmem>>, vector<1x24x64xf32>
    %67 = vector.shape_cast %66 : vector<1x24x64xf32> to vector<24x64xf32>
    %cst_74 = arith.constant dense<0.000000e+00> : vector<128x64xf32>
    %68 = tpu.matmul %65, %67, %cst_74 {dimension_numbers = #tpu.dot_dimension_numbers<[1], [0], [0], [1], [0, 0, 1, 1], [], []>} : vector<128x24xf32>, vector<24x64xf32>, vector<128x64xf32> -> vector<128x64xf32>
    %69 = arith.addf %63, %68 : vector<128x64xf32>
    %c1_75 = arith.constant 1 : index
    %c2_76 = arith.constant 2 : index
    %c0_77 = arith.constant 0 : index
    %c0_78 = arith.constant 0 : index
    %70 = vector.load %arg13[%c1_75, %c2_76, %c0_77, %c0_78] : memref<6x6x8x24xf32, #tpu.memory_space<vmem>>, vector<4x4x8x24xf32>
    %71 = vector.shape_cast %70 : vector<4x4x8x24xf32> to vector<128x24xf32>
    %c5 = arith.constant 5 : index
    %c0_79 = arith.constant 0 : index
    %c0_80 = arith.constant 0 : index
    %72 = vector.load %arg4[%c5, %c0_79, %c0_80] : memref<9x24x64xf32, #tpu.memory_space<vmem>>, vector<1x24x64xf32>
    %73 = vector.shape_cast %72 : vector<1x24x64xf32> to vector<24x64xf32>
    %cst_81 = arith.constant dense<0.000000e+00> : vector<128x64xf32>
    %74 = tpu.matmul %71, %73, %cst_81 {dimension_numbers = #tpu.dot_dimension_numbers<[1], [0], [0], [1], [0, 0, 1, 1], [], []>} : vector<128x24xf32>, vector<24x64xf32>, vector<128x64xf32> -> vector<128x64xf32>
    %75 = arith.addf %69, %74 : vector<128x64xf32>
    %c2_82 = arith.constant 2 : index
    %c0_83 = arith.constant 0 : index
    %c0_84 = arith.constant 0 : index
    %c0_85 = arith.constant 0 : index
    %76 = vector.load %arg13[%c2_82, %c0_83, %c0_84, %c0_85] : memref<6x6x8x24xf32, #tpu.memory_space<vmem>>, vector<4x4x8x24xf32>
    %77 = vector.shape_cast %76 : vector<4x4x8x24xf32> to vector<128x24xf32>
    %c6 = arith.constant 6 : index
    %c0_86 = arith.constant 0 : index
    %c0_87 = arith.constant 0 : index
    %78 = vector.load %arg4[%c6, %c0_86, %c0_87] : memref<9x24x64xf32, #tpu.memory_space<vmem>>, vector<1x24x64xf32>
    %79 = vector.shape_cast %78 : vector<1x24x64xf32> to vector<24x64xf32>
    %cst_88 = arith.constant dense<0.000000e+00> : vector<128x64xf32>
    %80 = tpu.matmul %77, %79, %cst_88 {dimension_numbers = #tpu.dot_dimension_numbers<[1], [0], [0], [1], [0, 0, 1, 1], [], []>} : vector<128x24xf32>, vector<24x64xf32>, vector<128x64xf32> -> vector<128x64xf32>
    %81 = arith.addf %75, %80 : vector<128x64xf32>
    %c2_89 = arith.constant 2 : index
    %c1_90 = arith.constant 1 : index
    %c0_91 = arith.constant 0 : index
    %c0_92 = arith.constant 0 : index
    %82 = vector.load %arg13[%c2_89, %c1_90, %c0_91, %c0_92] : memref<6x6x8x24xf32, #tpu.memory_space<vmem>>, vector<4x4x8x24xf32>
    %83 = vector.shape_cast %82 : vector<4x4x8x24xf32> to vector<128x24xf32>
    %c7 = arith.constant 7 : index
    %c0_93 = arith.constant 0 : index
    %c0_94 = arith.constant 0 : index
    %84 = vector.load %arg4[%c7, %c0_93, %c0_94] : memref<9x24x64xf32, #tpu.memory_space<vmem>>, vector<1x24x64xf32>
    %85 = vector.shape_cast %84 : vector<1x24x64xf32> to vector<24x64xf32>
    %cst_95 = arith.constant dense<0.000000e+00> : vector<128x64xf32>
    %86 = tpu.matmul %83, %85, %cst_95 {dimension_numbers = #tpu.dot_dimension_numbers<[1], [0], [0], [1], [0, 0, 1, 1], [], []>} : vector<128x24xf32>, vector<24x64xf32>, vector<128x64xf32> -> vector<128x64xf32>
    %87 = arith.addf %81, %86 : vector<128x64xf32>
    %c2_96 = arith.constant 2 : index
    %c2_97 = arith.constant 2 : index
    %c0_98 = arith.constant 0 : index
    %c0_99 = arith.constant 0 : index
    %88 = vector.load %arg13[%c2_96, %c2_97, %c0_98, %c0_99] : memref<6x6x8x24xf32, #tpu.memory_space<vmem>>, vector<4x4x8x24xf32>
    %89 = vector.shape_cast %88 : vector<4x4x8x24xf32> to vector<128x24xf32>
    %c8 = arith.constant 8 : index
    %c0_100 = arith.constant 0 : index
    %c0_101 = arith.constant 0 : index
    %90 = vector.load %arg4[%c8, %c0_100, %c0_101] : memref<9x24x64xf32, #tpu.memory_space<vmem>>, vector<1x24x64xf32>
    %91 = vector.shape_cast %90 : vector<1x24x64xf32> to vector<24x64xf32>
    %cst_102 = arith.constant dense<0.000000e+00> : vector<128x64xf32>
    %92 = tpu.matmul %89, %91, %cst_102 {dimension_numbers = #tpu.dot_dimension_numbers<[1], [0], [0], [1], [0, 0, 1, 1], [], []>} : vector<128x24xf32>, vector<24x64xf32>, vector<128x64xf32> -> vector<128x64xf32>
    %93 = arith.addf %87, %92 : vector<128x64xf32>
    %94 = vector.extract_strided_slice %93 {offsets = [0, 0], sizes = [128, 16], strides = [1, 1]} : vector<128x64xf32> to vector<128x16xf32>
    %95 = vector.extract_strided_slice %93 {offsets = [0, 16], sizes = [128, 16], strides = [1, 1]} : vector<128x64xf32> to vector<128x16xf32>
    %96 = arith.maximumf %94, %95 : vector<128x16xf32>
    %97 = vector.extract_strided_slice %93 {offsets = [0, 32], sizes = [128, 16], strides = [1, 1]} : vector<128x64xf32> to vector<128x16xf32>
    %98 = arith.maximumf %96, %97 : vector<128x16xf32>
    %99 = vector.extract_strided_slice %93 {offsets = [0, 48], sizes = [128, 16], strides = [1, 1]} : vector<128x64xf32> to vector<128x16xf32>
    %100 = arith.maximumf %98, %99 : vector<128x16xf32>
    %c0_103 = arith.constant 0 : index
    %c0_104 = arith.constant 0 : index
    %101 = vector.load %arg5[%c0_103, %c0_104] : memref<1x16xf32, #tpu.memory_space<vmem>>, vector<1x16xf32>
    %102 = vector.broadcast %101 : vector<1x16xf32> to vector<128x16xf32>
    %103 = arith.addf %100, %102 : vector<128x16xf32>
    %cst_105 = arith.constant 0.000000e+00 : f32
    %104 = vector.broadcast %cst_105 : f32 to vector<128x16xf32>
    %105 = arith.maximumf %103, %104 : vector<128x16xf32>
    %106 = vector.shape_cast %105 : vector<128x16xf32> to vector<16x8x16xf32>
    %107 = vector.extract_strided_slice %106 {offsets = [0, 0, 0], sizes = [1, 8, 16], strides = [1, 1, 1]} : vector<16x8x16xf32> to vector<1x8x16xf32>
    %108 = vector.shape_cast %107 : vector<1x8x16xf32> to vector<8x16xf32>
    %c0_106 = arith.constant 0 : index
    %c0_107 = arith.constant 0 : index
    %109 = vector.load %arg14[%c0_106, %c0_107] : memref<8x256xf32, #tpu.memory_space<vmem>>, vector<8x16xf32>
    tpu.vector_store %arg14[%c0_106, %c0_107], %108 {strides = array<i32>} : memref<8x256xf32, #tpu.memory_space<vmem>>, vector<8x16xf32>,
    %110 = vector.extract_strided_slice %106 {offsets = [1, 0, 0], sizes = [1, 8, 16], strides = [1, 1, 1]} : vector<16x8x16xf32> to vector<1x8x16xf32>
    %111 = vector.shape_cast %110 : vector<1x8x16xf32> to vector<8x16xf32>
    %c0_108 = arith.constant 0 : index
    %c16 = arith.constant 16 : index
    %112 = vector.load %arg14[%c0_108, %c16] : memref<8x256xf32, #tpu.memory_space<vmem>>, vector<8x16xf32>
    tpu.vector_store %arg14[%c0_108, %c16], %111 {strides = array<i32>} : memref<8x256xf32, #tpu.memory_space<vmem>>, vector<8x16xf32>,
    %113 = vector.extract_strided_slice %106 {offsets = [2, 0, 0], sizes = [1, 8, 16], strides = [1, 1, 1]} : vector<16x8x16xf32> to vector<1x8x16xf32>
    %114 = vector.shape_cast %113 : vector<1x8x16xf32> to vector<8x16xf32>
    %c0_109 = arith.constant 0 : index
    %c32 = arith.constant 32 : index
    %115 = vector.load %arg14[%c0_109, %c32] : memref<8x256xf32, #tpu.memory_space<vmem>>, vector<8x16xf32>
    tpu.vector_store %arg14[%c0_109, %c32], %114 {strides = array<i32>} : memref<8x256xf32, #tpu.memory_space<vmem>>, vector<8x16xf32>,
    %116 = vector.extract_strided_slice %106 {offsets = [3, 0, 0], sizes = [1, 8, 16], strides = [1, 1, 1]} : vector<16x8x16xf32> to vector<1x8x16xf32>
    %117 = vector.shape_cast %116 : vector<1x8x16xf32> to vector<8x16xf32>
    %c0_110 = arith.constant 0 : index
    %c48 = arith.constant 48 : index
    %118 = vector.load %arg14[%c0_110, %c48] : memref<8x256xf32, #tpu.memory_space<vmem>>, vector<8x16xf32>
    tpu.vector_store %arg14[%c0_110, %c48], %117 {strides = array<i32>} : memref<8x256xf32, #tpu.memory_space<vmem>>, vector<8x16xf32>,
    %119 = vector.extract_strided_slice %106 {offsets = [4, 0, 0], sizes = [1, 8, 16], strides = [1, 1, 1]} : vector<16x8x16xf32> to vector<1x8x16xf32>
    %120 = vector.shape_cast %119 : vector<1x8x16xf32> to vector<8x16xf32>
    %c0_111 = arith.constant 0 : index
    %c64 = arith.constant 64 : index
    %121 = vector.load %arg14[%c0_111, %c64] : memref<8x256xf32, #tpu.memory_space<vmem>>, vector<8x16xf32>
    tpu.vector_store %arg14[%c0_111, %c64], %120 {strides = array<i32>} : memref<8x256xf32, #tpu.memory_space<vmem>>, vector<8x16xf32>,
    %122 = vector.extract_strided_slice %106 {offsets = [5, 0, 0], sizes = [1, 8, 16], strides = [1, 1, 1]} : vector<16x8x16xf32> to vector<1x8x16xf32>
    %123 = vector.shape_cast %122 : vector<1x8x16xf32> to vector<8x16xf32>
    %c0_112 = arith.constant 0 : index
    %c80 = arith.constant 80 : index
    %124 = vector.load %arg14[%c0_112, %c80] : memref<8x256xf32, #tpu.memory_space<vmem>>, vector<8x16xf32>
    tpu.vector_store %arg14[%c0_112, %c80], %123 {strides = array<i32>} : memref<8x256xf32, #tpu.memory_space<vmem>>, vector<8x16xf32>,
    %125 = vector.extract_strided_slice %106 {offsets = [6, 0, 0], sizes = [1, 8, 16], strides = [1, 1, 1]} : vector<16x8x16xf32> to vector<1x8x16xf32>
    %126 = vector.shape_cast %125 : vector<1x8x16xf32> to vector<8x16xf32>
    %c0_113 = arith.constant 0 : index
    %c96 = arith.constant 96 : index
    %127 = vector.load %arg14[%c0_113, %c96] : memref<8x256xf32, #tpu.memory_space<vmem>>, vector<8x16xf32>
    tpu.vector_store %arg14[%c0_113, %c96], %126 {strides = array<i32>} : memref<8x256xf32, #tpu.memory_space<vmem>>, vector<8x16xf32>,
    %128 = vector.extract_strided_slice %106 {offsets = [7, 0, 0], sizes = [1, 8, 16], strides = [1, 1, 1]} : vector<16x8x16xf32> to vector<1x8x16xf32>
    %129 = vector.shape_cast %128 : vector<1x8x16xf32> to vector<8x16xf32>
    %c0_114 = arith.constant 0 : index
    %c112 = arith.constant 112 : index
    %130 = vector.load %arg14[%c0_114, %c112] : memref<8x256xf32, #tpu.memory_space<vmem>>, vector<8x16xf32>
    tpu.vector_store %arg14[%c0_114, %c112], %129 {strides = array<i32>} : memref<8x256xf32, #tpu.memory_space<vmem>>, vector<8x16xf32>,
    %131 = vector.extract_strided_slice %106 {offsets = [8, 0, 0], sizes = [1, 8, 16], strides = [1, 1, 1]} : vector<16x8x16xf32> to vector<1x8x16xf32>
    %132 = vector.shape_cast %131 : vector<1x8x16xf32> to vector<8x16xf32>
    %c0_115 = arith.constant 0 : index
    %c128 = arith.constant 128 : index
    %133 = vector.load %arg14[%c0_115, %c128] : memref<8x256xf32, #tpu.memory_space<vmem>>, vector<8x16xf32>
    tpu.vector_store %arg14[%c0_115, %c128], %132 {strides = array<i32>} : memref<8x256xf32, #tpu.memory_space<vmem>>, vector<8x16xf32>,
    %134 = vector.extract_strided_slice %106 {offsets = [9, 0, 0], sizes = [1, 8, 16], strides = [1, 1, 1]} : vector<16x8x16xf32> to vector<1x8x16xf32>
    %135 = vector.shape_cast %134 : vector<1x8x16xf32> to vector<8x16xf32>
    %c0_116 = arith.constant 0 : index
    %c144 = arith.constant 144 : index
    %136 = vector.load %arg14[%c0_116, %c144] : memref<8x256xf32, #tpu.memory_space<vmem>>, vector<8x16xf32>
    tpu.vector_store %arg14[%c0_116, %c144], %135 {strides = array<i32>} : memref<8x256xf32, #tpu.memory_space<vmem>>, vector<8x16xf32>,
    %137 = vector.extract_strided_slice %106 {offsets = [10, 0, 0], sizes = [1, 8, 16], strides = [1, 1, 1]} : vector<16x8x16xf32> to vector<1x8x16xf32>
    %138 = vector.shape_cast %137 : vector<1x8x16xf32> to vector<8x16xf32>
    %c0_117 = arith.constant 0 : index
    %c160 = arith.constant 160 : index
    %139 = vector.load %arg14[%c0_117, %c160] : memref<8x256xf32, #tpu.memory_space<vmem>>, vector<8x16xf32>
    tpu.vector_store %arg14[%c0_117, %c160], %138 {strides = array<i32>} : memref<8x256xf32, #tpu.memory_space<vmem>>, vector<8x16xf32>,
    %140 = vector.extract_strided_slice %106 {offsets = [11, 0, 0], sizes = [1, 8, 16], strides = [1, 1, 1]} : vector<16x8x16xf32> to vector<1x8x16xf32>
    %141 = vector.shape_cast %140 : vector<1x8x16xf32> to vector<8x16xf32>
    %c0_118 = arith.constant 0 : index
    %c176 = arith.constant 176 : index
    %142 = vector.load %arg14[%c0_118, %c176] : memref<8x256xf32, #tpu.memory_space<vmem>>, vector<8x16xf32>
    tpu.vector_store %arg14[%c0_118, %c176], %141 {strides = array<i32>} : memref<8x256xf32, #tpu.memory_space<vmem>>, vector<8x16xf32>,
    %143 = vector.extract_strided_slice %106 {offsets = [12, 0, 0], sizes = [1, 8, 16], strides = [1, 1, 1]} : vector<16x8x16xf32> to vector<1x8x16xf32>
    %144 = vector.shape_cast %143 : vector<1x8x16xf32> to vector<8x16xf32>
    %c0_119 = arith.constant 0 : index
    %c192 = arith.constant 192 : index
    %145 = vector.load %arg14[%c0_119, %c192] : memref<8x256xf32, #tpu.memory_space<vmem>>, vector<8x16xf32>
    tpu.vector_store %arg14[%c0_119, %c192], %144 {strides = array<i32>} : memref<8x256xf32, #tpu.memory_space<vmem>>, vector<8x16xf32>,
    %146 = vector.extract_strided_slice %106 {offsets = [13, 0, 0], sizes = [1, 8, 16], strides = [1, 1, 1]} : vector<16x8x16xf32> to vector<1x8x16xf32>
    %147 = vector.shape_cast %146 : vector<1x8x16xf32> to vector<8x16xf32>
    %c0_120 = arith.constant 0 : index
    %c208 = arith.constant 208 : index
    %148 = vector.load %arg14[%c0_120, %c208] : memref<8x256xf32, #tpu.memory_space<vmem>>, vector<8x16xf32>
    tpu.vector_store %arg14[%c0_120, %c208], %147 {strides = array<i32>} : memref<8x256xf32, #tpu.memory_space<vmem>>, vector<8x16xf32>,
    %149 = vector.extract_strided_slice %106 {offsets = [14, 0, 0], sizes = [1, 8, 16], strides = [1, 1, 1]} : vector<16x8x16xf32> to vector<1x8x16xf32>
    %150 = vector.shape_cast %149 : vector<1x8x16xf32> to vector<8x16xf32>
    %c0_121 = arith.constant 0 : index
    %c224 = arith.constant 224 : index
    %151 = vector.load %arg14[%c0_121, %c224] : memref<8x256xf32, #tpu.memory_space<vmem>>, vector<8x16xf32>
    tpu.vector_store %arg14[%c0_121, %c224], %150 {strides = array<i32>} : memref<8x256xf32, #tpu.memory_space<vmem>>, vector<8x16xf32>,
    %152 = vector.extract_strided_slice %106 {offsets = [15, 0, 0], sizes = [1, 8, 16], strides = [1, 1, 1]} : vector<16x8x16xf32> to vector<1x8x16xf32>
    %153 = vector.shape_cast %152 : vector<1x8x16xf32> to vector<8x16xf32>
    %c0_122 = arith.constant 0 : index
    %c240 = arith.constant 240 : index
    %154 = vector.load %arg14[%c0_122, %c240] : memref<8x256xf32, #tpu.memory_space<vmem>>, vector<8x16xf32>
    tpu.vector_store %arg14[%c0_122, %c240], %153 {strides = array<i32>} : memref<8x256xf32, #tpu.memory_space<vmem>>, vector<8x16xf32>,
    %c0_123 = arith.constant 0 : index
    %c0_124 = arith.constant 0 : index
    %155 = vector.load %arg14[%c0_123, %c0_124] : memref<8x256xf32, #tpu.memory_space<vmem>>, vector<8x256xf32>
    %c0_125 = arith.constant 0 : index
    %c0_126 = arith.constant 0 : index
    %156 = vector.load %arg6[%c0_125, %c0_126] : memref<256x120xf32, #tpu.memory_space<vmem>>, vector<256x120xf32>
    %cst_127 = arith.constant dense<0.000000e+00> : vector<8x120xf32>
    %157 = tpu.matmul %155, %156, %cst_127 {dimension_numbers = #tpu.dot_dimension_numbers<[1], [0], [0], [1], [0, 0, 1, 1], [], []>} : vector<8x256xf32>, vector<256x120xf32>, vector<8x120xf32> -> vector<8x120xf32>
    %c0_128 = arith.constant 0 : index
    %c0_129 = arith.constant 0 : index
    %158 = vector.load %arg7[%c0_128, %c0_129] : memref<1x120xf32, #tpu.memory_space<vmem>>, vector<1x120xf32>
    %159 = vector.broadcast %158 : vector<1x120xf32> to vector<8x120xf32>
    %160 = arith.addf %157, %159 : vector<8x120xf32>
    %cst_130 = arith.constant 0.000000e+00 : f32
    %161 = vector.broadcast %cst_130 : f32 to vector<8x120xf32>
    %162 = arith.maximumf %160, %161 : vector<8x120xf32>
    %c0_131 = arith.constant 0 : index
    %c0_132 = arith.constant 0 : index
    %163 = vector.load %arg8[%c0_131, %c0_132] : memref<120x84xf32, #tpu.memory_space<vmem>>, vector<120x84xf32>
    %cst_133 = arith.constant dense<0.000000e+00> : vector<8x84xf32>
    %164 = tpu.matmul %162, %163, %cst_133 {dimension_numbers = #tpu.dot_dimension_numbers<[1], [0], [0], [1], [0, 0, 1, 1], [], []>} : vector<8x120xf32>, vector<120x84xf32>, vector<8x84xf32> -> vector<8x84xf32>
    %c0_134 = arith.constant 0 : index
    %c0_135 = arith.constant 0 : index
    %165 = vector.load %arg9[%c0_134, %c0_135] : memref<1x84xf32, #tpu.memory_space<vmem>>, vector<1x84xf32>
    %166 = vector.broadcast %165 : vector<1x84xf32> to vector<8x84xf32>
    %167 = arith.addf %164, %166 : vector<8x84xf32>
    %cst_136 = arith.constant 0.000000e+00 : f32
    %168 = vector.broadcast %cst_136 : f32 to vector<8x84xf32>
    %169 = arith.maximumf %167, %168 : vector<8x84xf32>
    %c0_137 = arith.constant 0 : index
    %c0_138 = arith.constant 0 : index
    %170 = vector.load %arg10[%c0_137, %c0_138] : memref<84x10xf32, #tpu.memory_space<vmem>>, vector<84x10xf32>
    %cst_139 = arith.constant dense<0.000000e+00> : vector<8x10xf32>
    %171 = tpu.matmul %169, %170, %cst_139 {dimension_numbers = #tpu.dot_dimension_numbers<[1], [0], [0], [1], [0, 0, 1, 1], [], []>} : vector<8x84xf32>, vector<84x10xf32>, vector<8x10xf32> -> vector<8x10xf32>
    %c0_140 = arith.constant 0 : index
    %c0_141 = arith.constant 0 : index
    %172 = vector.load %arg11[%c0_140, %c0_141] : memref<1x10xf32, #tpu.memory_space<vmem>>, vector<1x10xf32>
    %173 = vector.broadcast %172 : vector<1x10xf32> to vector<8x10xf32>
    %174 = arith.addf %171, %173 : vector<8x10xf32>
    %c0_142 = arith.constant 0 : index
    %c0_143 = arith.constant 0 : index
    %175 = vector.load %arg12[%c0_142, %c0_143] : memref<8x10xf32, #tpu.memory_space<vmem>>, vector<8x10xf32>
    tpu.vector_store %arg12[%c0_142, %c0_143], %174 {strides = array<i32>} : memref<8x10xf32, #tpu.memory_space<vmem>>, vector<8x10xf32>,
    return
  }
  func.func @transform_0(%arg0: i32) -> (i32, i32, i32, i32) {
    %c0_i32 = arith.constant 0 : i32
    %c0_i32_0 = arith.constant 0 : i32
    %c0_i32_1 = arith.constant 0 : i32
    %c0_i32_2 = arith.constant 0 : i32
    return %c0_i32, %c0_i32_0, %arg0, %c0_i32_1 : i32, i32, i32, i32
  }
  func.func @transform_1(%arg0: i32) -> (i32, i32, i32) {
    %c0_i32 = arith.constant 0 : i32
    %c0_i32_0 = arith.constant 0 : i32
    %c0_i32_1 = arith.constant 0 : i32
    %c0_i32_2 = arith.constant 0 : i32
    return %c0_i32, %c0_i32_0, %c0_i32_1 : i32, i32, i32
  }
  func.func @transform_2(%arg0: i32) -> (i32, i32) {
    %c0_i32 = arith.constant 0 : i32
    %c0_i32_0 = arith.constant 0 : i32
    %c0_i32_1 = arith.constant 0 : i32
    return %c0_i32, %c0_i32_0 : i32, i32
  }
  func.func @transform_3(%arg0: i32) -> (i32, i32, i32) {
    %c0_i32 = arith.constant 0 : i32
    %c0_i32_0 = arith.constant 0 : i32
    %c0_i32_1 = arith.constant 0 : i32
    %c0_i32_2 = arith.constant 0 : i32
    return %c0_i32, %c0_i32_0, %c0_i32_1 : i32, i32, i32
  }
  func.func @transform_4(%arg0: i32) -> (i32, i32) {
    %c0_i32 = arith.constant 0 : i32
    %c0_i32_0 = arith.constant 0 : i32
    %c0_i32_1 = arith.constant 0 : i32
    return %c0_i32, %c0_i32_0 : i32, i32
  }
  func.func @transform_5(%arg0: i32) -> (i32, i32) {
    %c0_i32 = arith.constant 0 : i32
    %c0_i32_0 = arith.constant 0 : i32
    %c0_i32_1 = arith.constant 0 : i32
    return %c0_i32, %c0_i32_0 : i32, i32
  }
  func.func @transform_6(%arg0: i32) -> (i32, i32) {
    %c0_i32 = arith.constant 0 : i32
    %c0_i32_0 = arith.constant 0 : i32
    %c0_i32_1 = arith.constant 0 : i32
    return %c0_i32, %c0_i32_0 : i32, i32
  }
  func.func @transform_7(%arg0: i32) -> (i32, i32) {
    %c0_i32 = arith.constant 0 : i32
    %c0_i32_0 = arith.constant 0 : i32
    %c0_i32_1 = arith.constant 0 : i32
    return %c0_i32, %c0_i32_0 : i32, i32
  }
  func.func @transform_8(%arg0: i32) -> (i32, i32) {
    %c0_i32 = arith.constant 0 : i32
    %c0_i32_0 = arith.constant 0 : i32
    %c0_i32_1 = arith.constant 0 : i32
    return %c0_i32, %c0_i32_0 : i32, i32
  }
  func.func @transform_9(%arg0: i32) -> (i32, i32) {
    %c0_i32 = arith.constant 0 : i32
    %c0_i32_0 = arith.constant 0 : i32
    %c0_i32_1 = arith.constant 0 : i32
    return %c0_i32, %c0_i32_0 : i32, i32
  }
  func.func @transform_10(%arg0: i32) -> (i32, i32) {
    %c0_i32 = arith.constant 0 : i32
    %c0_i32_0 = arith.constant 0 : i32
    %c0_i32_1 = arith.constant 0 : i32
    return %c0_i32, %c0_i32_0 : i32, i32
  }
  func.func @transform_11(%arg0: i32) -> (i32, i32) {
    %c0_i32 = arith.constant 0 : i32
    %c0_i32_0 = arith.constant 0 : i32
    return %arg0, %c0_i32 : i32, i32
  }
}

</mosaic_0001>

<bundles_post_ra>
// kernel: squeeze.2
= control target key start
LH: loop header
LB: loop body
LE: loop exit
PB: predicated region body
PF: predicated region fallthrough
CT: control target
= control target key end

     0   :  { %vm3_vm0 = vcmask 64512   ;;  %s3533_s0 = inlined_call_operand.vmem [shape: f32[8,1,28,28], index: 0, kind: input, shape index: {}]   ;;  %s3534_s1 = inlined_call_operand.vmem [shape: f32[8,7,4,7,4], index: 1, kind: output, shape index: {}]  }
   0x1   :  { %v2_v0 = vld [vmem:[%s3533_s0] sm:$0xff]   ;;  %v2097_v1 = vld [vmem:[%s3533_s0 + $0x8] sm:$0xff]   ;;  %v2098_v2 = vld [vmem:[%s3533_s0 + $0x10] sm:$0xff]  }
   0x2   :  { %4 = vst.msk [vmem:[#allocation0] sm:$0xf] %vm3_vm0, %v2_v0   ;;  %6 = vst.msk [vmem:[#allocation0 + $0x4] sm:$0xf0] %vm3_vm0, %v2_v0   ;;  %v2099_v3 = vld [vmem:[%s3533_s0 + $0x18] sm:$0xf]  }
   0x3   :  { %11 = vst.msk [vmem:[#allocation0 + $0x10] sm:$0xf] %vm3_vm0, %v2097_v1   ;;  %13 = vst.msk [vmem:[#allocation0 + $0x14] sm:$0xf0] %vm3_vm0, %v2097_v1   ;;  %v2100_v4 = vld [vmem:[%s3533_s0 + $0x20] sm:$0xff]   ;;  %v2101_v5 = vld [vmem:[%s3533_s0 + $0x28] sm:$0xff]  }
   0x4   :  { %18 = vst.msk [vmem:[#allocation0 + $0x20] sm:$0xf] %vm3_vm0, %v2098_v2   ;;  %20 = vst.msk [vmem:[#allocation0 + $0x24] sm:$0xf0] %vm3_vm0, %v2098_v2   ;;  %v2102_v6 = vld [vmem:[%s3533_s0 + $0x30] sm:$0xff]   ;;  %v2104_v8 = vld [vmem:[%s3533_s0 + $0x40] sm:$0xff]  }
   0x5   :  { %25 = vst.msk [vmem:[#allocation0 + $0x30] sm:$0xf] %vm3_vm0, %v2099_v3   ;;  %30 = vst.msk [vmem:[#allocation0 + $0x38] sm:$0xf] %vm3_vm0, %v2100_v4   ;;  %v2103_v7 = vld [vmem:[%s3533_s0 + $0x38] sm:$0xf]  }
   0x6   :  { %32 = vst.msk [vmem:[#allocation0 + $0x3c] sm:$0xf0] %vm3_vm0, %v2100_v4   ;;  %37 = vst.msk [vmem:[#allocation0 + $0x48] sm:$0xf] %vm3_vm0, %v2101_v5   ;;  %v2105_v9 = vld [vmem:[%s3533_s0 + $0x48] sm:$0xff]   ;;  %v2106_v10 = vld [vmem:[%s3533_s0 + $0x50] sm:$0xff]  }
   0x7   :  { %39 = vst.msk [vmem:[#allocation0 + $0x4c] sm:$0xf0] %vm3_vm0, %v2101_v5   ;;  %44 = vst.msk [vmem:[#allocation0 + $0x58] sm:$0xf] %vm3_vm0, %v2102_v6   ;;  %v2107_v11 = vld [vmem:[%s3533_s0 + $0x58] sm:$0xf]  }
   0x8   :  { %46 = vst.msk [vmem:[#allocation0 + $0x5c] sm:$0xf0] %vm3_vm0, %v2102_v6   ;;  %51 = vst.msk [vmem:[#allocation0 + $0x68] sm:$0xf] %vm3_vm0, %v2103_v7   ;;  %v2108_v12 = vld [vmem:[%s3533_s0 + $0x60] sm:$0xff]   ;;  %v2109_v13 = vld [vmem:[%s3533_s0 + $0x68] sm:$0xff]  }
   0x9   :  { %56 = vst.msk [vmem:[#allocation0 + $0x70] sm:$0xf] %vm3_vm0, %v2104_v8   ;;  %58 = vst.msk [vmem:[#allocation0 + $0x74] sm:$0xf0] %vm3_vm0, %v2104_v8   ;;  %v2110_v14 = vld [vmem:[%s3533_s0 + $0x70] sm:$0xff]   ;;  %v2112_v16 = vld [vmem:[%s3533_s0 + $0x80] sm:$0xff]  }
   0xa   :  { %63 = vst.msk [vmem:[#allocation0 + $0x80] sm:$0xf] %vm3_vm0, %v2105_v9   ;;  %65 = vst.msk [vmem:[#allocation0 + $0x84] sm:$0xf0] %vm3_vm0, %v2105_v9   ;;  %v2111_v15 = vld [vmem:[%s3533_s0 + $0x78] sm:$0xf]  }
   0xb   :  { %70 = vst.msk [vmem:[#allocation0 + $0x90] sm:$0xf] %vm3_vm0, %v2106_v10   ;;  %72 = vst.msk [vmem:[#allocation0 + $0x94] sm:$0xf0] %vm3_vm0, %v2106_v10   ;;  %v2113_v17 = vld [vmem:[%s3533_s0 + $0x88] sm:$0xff]   ;;  %v2114_v18 = vld [vmem:[%s3533_s0 + $0x90] sm:$0xff]  }
   0xc   :  { %77 = vst.msk [vmem:[#allocation0 + $0xa0] sm:$0xf] %vm3_vm0, %v2107_v11   ;;  %82 = vst.msk [vmem:[#allocation0 + $0xa8] sm:$0xf] %vm3_vm0, %v2108_v12   ;;  %v2115_v19 = vld [vmem:[%s3533_s0 + $0x98] sm:$0xf]  }
   0xd   :  { %84 = vst.msk [vmem:[#allocation0 + $0xac] sm:$0xf0] %vm3_vm0, %v2108_v12   ;;  %89 = vst.msk [vmem:[#allocation0 + $0xb8] sm:$0xf] %vm3_vm0, %v2109_v13   ;;  %v2116_v20 = vld [vmem:[%s3533_s0 + $0xa0] sm:$0xff]   ;;  %v2117_v21 = vld [vmem:[%s3533_s0 + $0xa8] sm:$0xff]  }
   0xe   :  { %91 = vst.msk [vmem:[#allocation0 + $0xbc] sm:$0xf0] %vm3_vm0, %v2109_v13   ;;  %96 = vst.msk [vmem:[#allocation0 + $0xc8] sm:$0xf] %vm3_vm0, %v2110_v14   ;;  %v2118_v22 = vld [vmem:[%s3533_s0 + $0xb0] sm:$0xff]   ;;  %v2120_v24 = vld [vmem:[%s3533_s0 + $0xc0] sm:$0xff]  }
   0xf   :  { %98 = vst.msk [vmem:[#allocation0 + $0xcc] sm:$0xf0] %vm3_vm0, %v2110_v14   ;;  %103 = vst.msk [vmem:[#allocation0 + $0xd8] sm:$0xf] %vm3_vm0, %v2111_v15   ;;  %v2119_v23 = vld [vmem:[%s3533_s0 + $0xb8] sm:$0xf]  }
  0x10   :  { %108 = vst.msk [vmem:[#allocation0 + $0xe0] sm:$0xf] %vm3_vm0, %v2112_v16   ;;  %110 = vst.msk [vmem:[#allocation0 + $0xe4] sm:$0xf0] %vm3_vm0, %v2112_v16   ;;  %v2121_v25 = vld [vmem:[%s3533_s0 + $0xc8] sm:$0xff]   ;;  %v2122_v26 = vld [vmem:[%s3533_s0 + $0xd0] sm:$0xff]  }
  0x11   :  { %115 = vst.msk [vmem:[#allocation0 + $0xf0] sm:$0xf] %vm3_vm0, %v2113_v17   ;;  %117 = vst.msk [vmem:[#allocation0 + $0xf4] sm:$0xf0] %vm3_vm0, %v2113_v17   ;;  %v2123_v27 = vld [vmem:[%s3533_s0 + $0xd8] sm:$0xf]  }
  0x12   :  { %122 = vst.msk [vmem:[#allocation0 + $0x100] sm:$0xf] %vm3_vm0, %v2114_v18   ;;  %124 = vst.msk [vmem:[#allocation0 + $0x104] sm:$0xf0] %vm3_vm0, %v2114_v18   ;;  %v2124_v28 = vld [vmem:[%s3533_s0 + $0xe0] sm:$0xff]   ;;  %v2125_v29 = vld [vmem:[%s3533_s0 + $0xe8] sm:$0xff]  }
  0x13   :  { %129 = vst.msk [vmem:[#allocation0 + $0x110] sm:$0xf] %vm3_vm0, %v2115_v19   ;;  %134 = vst.msk [vmem:[#allocation0 + $0x118] sm:$0xf] %vm3_vm0, %v2116_v20   ;;  %v2126_v30 = vld [vmem:[%s3533_s0 + $0xf0] sm:$0xff]   ;;  %v2128_v32 = vld [vmem:[%s3533_s0 + $0x100] sm:$0xff]  }
  0x14   :  { %136 = vst.msk [vmem:[#allocation0 + $0x11c] sm:$0xf0] %vm3_vm0, %v2116_v20   ;;  %141 = vst.msk [vmem:[#allocation0 + $0x128] sm:$0xf] %vm3_vm0, %v2117_v21   ;;  %v2127_v31 = vld [vmem:[%s3533_s0 + $0xf8] sm:$0xf]  }
  0x15   :  { %143 = vst.msk [vmem:[#allocation0 + $0x12c] sm:$0xf0] %vm3_vm0, %v2117_v21   ;;  %148 = vst.msk [vmem:[#allocation0 + $0x138] sm:$0xf] %vm3_vm0, %v2118_v22   ;;  %v2129_v33 = vld [vmem:[%s3533_s0 + $0x108] sm:$0xff]   ;;  %v2130_v34 = vld [vmem:[%s3533_s0 + $0x110] sm:$0xff]  }
  0x16   :  { %150 = vst.msk [vmem:[#allocation0 + $0x13c] sm:$0xf0] %vm3_vm0, %v2118_v22   ;;  %155 = vst.msk [vmem:[#allocation0 + $0x148] sm:$0xf] %vm3_vm0, %v2119_v23   ;;  %v2131_v35 = vld [vmem:[%s3533_s0 + $0x118] sm:$0xf]  }
  0x17   :  { %160 = vst.msk [vmem:[#allocation0 + $0x150] sm:$0xf] %vm3_vm0, %v2120_v24   ;;  %162 = vst.msk [vmem:[#allocation0 + $0x154] sm:$0xf0] %vm3_vm0, %v2120_v24   ;;  %v2132_v36 = vld [vmem:[%s3533_s0 + $0x120] sm:$0xff]   ;;  %v2133_v37 = vld [vmem:[%s3533_s0 + $0x128] sm:$0xff]  }
  0x18   :  { %167 = vst.msk [vmem:[#allocation0 + $0x160] sm:$0xf] %vm3_vm0, %v2121_v25   ;;  %169 = vst.msk [vmem:[#allocation0 + $0x164] sm:$0xf0] %vm3_vm0, %v2121_v25   ;;  %v2134_v38 = vld [vmem:[%s3533_s0 + $0x130] sm:$0xff]   ;;  %v2136_v40 = vld [vmem:[%s3533_s0 + $0x140] sm:$0xff]  }
  0x19   :  { %174 = vst.msk [vmem:[#allocation0 + $0x170] sm:$0xf] %vm3_vm0, %v2122_v26   ;;  %176 = vst.msk [vmem:[#allocation0 + $0x174] sm:$0xf0] %vm3_vm0, %v2122_v26   ;;  %v2135_v39 = vld [vmem:[%s3533_s0 + $0x138] sm:$0xf]  }
  0x1a   :  { %181 = vst.msk [vmem:[#allocation0 + $0x180] sm:$0xf] %vm3_vm0, %v2123_v27   ;;  %186 = vst.msk [vmem:[#allocation0 + $0x188] sm:$0xf] %vm3_vm0, %v2124_v28   ;;  %v2137_v41 = vld [vmem:[%s3533_s0 + $0x148] sm:$0xff]   ;;  %v2138_v42 = vld [vmem:[%s3533_s0 + $0x150] sm:$0xff]  }
  0x1b   :  { %188 = vst.msk [vmem:[#allocation0 + $0x18c] sm:$0xf0] %vm3_vm0, %v2124_v28   ;;  %193 = vst.msk [vmem:[#allocation0 + $0x198] sm:$0xf] %vm3_vm0, %v2125_v29   ;;  %v2139_v43 = vld [vmem:[%s3533_s0 + $0x158] sm:$0xf]  }
  0x1c   :  { %195 = vst.msk [vmem:[#allocation0 + $0x19c] sm:$0xf0] %vm3_vm0, %v2125_v29   ;;  %200 = vst.msk [vmem:[#allocation0 + $0x1a8] sm:$0xf] %vm3_vm0, %v2126_v30   ;;  %v2140_v44 = vld [vmem:[%s3533_s0 + $0x160] sm:$0xff]   ;;  %v2141_v45 = vld [vmem:[%s3533_s0 + $0x168] sm:$0xff]  }
  0x1d   :  { %202 = vst.msk [vmem:[#allocation0 + $0x1ac] sm:$0xf0] %vm3_vm0, %v2126_v30   ;;  %207 = vst.msk [vmem:[#allocation0 + $0x1b8] sm:$0xf] %vm3_vm0, %v2127_v31   ;;  %v2142_v46 = vld [vmem:[%s3533_s0 + $0x170] sm:$0xff]   ;;  %v2144_v48 = vld [vmem:[%s3533_s0 + $0x180] sm:$0xff]  }
  0x1e   :  { %212 = vst.msk [vmem:[#allocation0 + $0x1c0] sm:$0xf] %vm3_vm0, %v2128_v32   ;;  %214 = vst.msk [vmem:[#allocation0 + $0x1c4] sm:$0xf0] %vm3_vm0, %v2128_v32   ;;  %v2143_v47 = vld [vmem:[%s3533_s0 + $0x178] sm:$0xf]  }
  0x1f   :  { %219 = vst.msk [vmem:[#allocation0 + $0x1d0] sm:$0xf] %vm3_vm0, %v2129_v33   ;;  %221 = vst.msk [vmem:[#allocation0 + $0x1d4] sm:$0xf0] %vm3_vm0, %v2129_v33   ;;  %v2145_v49 = vld [vmem:[%s3533_s0 + $0x188] sm:$0xff]   ;;  %v2146_v50 = vld [vmem:[%s3533_s0 + $0x190] sm:$0xff]  }
  0x20   :  { %226 = vst.msk [vmem:[#allocation0 + $0x1e0] sm:$0xf] %vm3_vm0, %v2130_v34   ;;  %228 = vst.msk [vmem:[#allocation0 + $0x1e4] sm:$0xf0] %vm3_vm0, %v2130_v34   ;;  %v2147_v51 = vld [vmem:[%s3533_s0 + $0x198] sm:$0xf]  }
  0x21   :  { %233 = vst.msk [vmem:[#allocation0 + $0x1f0] sm:$0xf] %vm3_vm0, %v2131_v35   ;;  %238 = vst.msk [vmem:[#allocation0 + $0x1f8] sm:$0xf] %vm3_vm0, %v2132_v36   ;;  %v2148_v52 = vld [vmem:[%s3533_s0 + $0x1a0] sm:$0xff]   ;;  %v2149_v53 = vld [vmem:[%s3533_s0 + $0x1a8] sm:$0xff]  }
  0x22   :  { %240 = vst.msk [vmem:[#allocation0 + $0x1fc] sm:$0xf0] %vm3_vm0, %v2132_v36   ;;  %245 = vst.msk [vmem:[#allocation0 + $0x208] sm:$0xf] %vm3_vm0, %v2133_v37   ;;  %v2150_v54 = vld [vmem:[%s3533_s0 + $0x1b0] sm:$0xff]   ;;  %v2152_v56 = vld [vmem:[%s3533_s0 + $0x1c0] sm:$0xff]  }
  0x23   :  { %247 = vst.msk [vmem:[#allocation0 + $0x20c] sm:$0xf0] %vm3_vm0, %v2133_v37   ;;  %252 = vst.msk [vmem:[#allocation0 + $0x218] sm:$0xf] %vm3_vm0, %v2134_v38   ;;  %v2151_v55 = vld [vmem:[%s3533_s0 + $0x1b8] sm:$0xf]  }
  0x24   :  { %254 = vst.msk [vmem:[#allocation0 + $0x21c] sm:$0xf0] %vm3_vm0, %v2134_v38   ;;  %259 = vst.msk [vmem:[#allocation0 + $0x228] sm:$0xf] %vm3_vm0, %v2135_v39   ;;  %v2153_v57 = vld [vmem:[%s3533_s0 + $0x1c8] sm:$0xff]   ;;  %v2154_v58 = vld [vmem:[%s3533_s0 + $0x1d0] sm:$0xff]  }
  0x25   :  { %264 = vst.msk [vmem:[#allocation0 + $0x230] sm:$0xf] %vm3_vm0, %v2136_v40   ;;  %266 = vst.msk [vmem:[#allocation0 + $0x234] sm:$0xf0] %vm3_vm0, %v2136_v40   ;;  %v2155_v59 = vld [vmem:[%s3533_s0 + $0x1d8] sm:$0xf]  }
  0x26   :  { %271 = vst.msk [vmem:[#allocation0 + $0x240] sm:$0xf] %vm3_vm0, %v2137_v41   ;;  %273 = vst.msk [vmem:[#allocation0 + $0x244] sm:$0xf0] %vm3_vm0, %v2137_v41   ;;  %v2156_v60 = vld [vmem:[%s3533_s0 + $0x1e0] sm:$0xff]   ;;  %v2157_v61 = vld [vmem:[%s3533_s0 + $0x1e8] sm:$0xff]  }
  0x27   :  { %278 = vst.msk [vmem:[#allocation0 + $0x250] sm:$0xf] %vm3_vm0, %v2138_v42   ;;  %280 = vst.msk [vmem:[#allocation0 + $0x254] sm:$0xf0] %vm3_vm0, %v2138_v42   ;;  %v2158_v62 = vld [vmem:[%s3533_s0 + $0x1f0] sm:$0xff]   ;;  %v2160_v0 = vld [vmem:[%s3533_s0 + $0x200] sm:$0xff]  }
  0x28   :  { %285 = vst.msk [vmem:[#allocation0 + $0x260] sm:$0xf] %vm3_vm0, %v2139_v43   ;;  %290 = vst.msk [vmem:[#allocation0 + $0x268] sm:$0xf] %vm3_vm0, %v2140_v44   ;;  %v2159_v63 = vld [vmem:[%s3533_s0 + $0x1f8] sm:$0xf]  }
  0x29   :  { %292 = vst.msk [vmem:[#allocation0 + $0x26c] sm:$0xf0] %vm3_vm0, %v2140_v44   ;;  %297 = vst.msk [vmem:[#allocation0 + $0x278] sm:$0xf] %vm3_vm0, %v2141_v45   ;;  %v2161_v1 = vld [vmem:[%s3533_s0 + $0x208] sm:$0xff]   ;;  %v2162_v2 = vld [vmem:[%s3533_s0 + $0x210] sm:$0xff]  }
  0x2a   :  { %299 = vst.msk [vmem:[#allocation0 + $0x27c] sm:$0xf0] %vm3_vm0, %v2141_v45   ;;  %304 = vst.msk [vmem:[#allocation0 + $0x288] sm:$0xf] %vm3_vm0, %v2142_v46   ;;  %v2163_v3 = vld [vmem:[%s3533_s0 + $0x218] sm:$0xf]  }
  0x2b   :  { %306 = vst.msk [vmem:[#allocation0 + $0x28c] sm:$0xf0] %vm3_vm0, %v2142_v46   ;;  %311 = vst.msk [vmem:[#allocation0 + $0x298] sm:$0xf] %vm3_vm0, %v2143_v47   ;;  %v2164_v4 = vld [vmem:[%s3533_s0 + $0x220] sm:$0xff]   ;;  %v2165_v5 = vld [vmem:[%s3533_s0 + $0x228] sm:$0xff]  }
  0x2c   :  { %316 = vst.msk [vmem:[#allocation0 + $0x2a0] sm:$0xf] %vm3_vm0, %v2144_v48   ;;  %318 = vst.msk [vmem:[#allocation0 + $0x2a4] sm:$0xf0] %vm3_vm0, %v2144_v48   ;;  %v2166_v6 = vld [vmem:[%s3533_s0 + $0x230] sm:$0xff]   ;;  %v2168_v8 = vld [vmem:[%s3533_s0 + $0x240] sm:$0xff]  }
  0x2d   :  { %323 = vst.msk [vmem:[#allocation0 + $0x2b0] sm:$0xf] %vm3_vm0, %v2145_v49   ;;  %325 = vst.msk [vmem:[#allocation0 + $0x2b4] sm:$0xf0] %vm3_vm0, %v2145_v49   ;;  %v2167_v7 = vld [vmem:[%s3533_s0 + $0x238] sm:$0xf]  }
  0x2e   :  { %330 = vst.msk [vmem:[#allocation0 + $0x2c0] sm:$0xf] %vm3_vm0, %v2146_v50   ;;  %332 = vst.msk [vmem:[#allocation0 + $0x2c4] sm:$0xf0] %vm3_vm0, %v2146_v50   ;;  %v2169_v9 = vld [vmem:[%s3533_s0 + $0x248] sm:$0xff]   ;;  %v2170_v10 = vld [vmem:[%s3533_s0 + $0x250] sm:$0xff]  }
  0x2f   :  { %337 = vst.msk [vmem:[#allocation0 + $0x2d0] sm:$0xf] %vm3_vm0, %v2147_v51   ;;  %342 = vst.msk [vmem:[#allocation0 + $0x2d8] sm:$0xf] %vm3_vm0, %v2148_v52   ;;  %v2171_v11 = vld [vmem:[%s3533_s0 + $0x258] sm:$0xf]  }
  0x30   :  { %344 = vst.msk [vmem:[#allocation0 + $0x2dc] sm:$0xf0] %vm3_vm0, %v2148_v52   ;;  %349 = vst.msk [vmem:[#allocation0 + $0x2e8] sm:$0xf] %vm3_vm0, %v2149_v53   ;;  %v2172_v12 = vld [vmem:[%s3533_s0 + $0x260] sm:$0xff]   ;;  %v2173_v13 = vld [vmem:[%s3533_s0 + $0x268] sm:$0xff]  }
  0x31   :  { %351 = vst.msk [vmem:[#allocation0 + $0x2ec] sm:$0xf0] %vm3_vm0, %v2149_v53   ;;  %356 = vst.msk [vmem:[#allocation0 + $0x2f8] sm:$0xf] %vm3_vm0, %v2150_v54   ;;  %v2174_v14 = vld [vmem:[%s3533_s0 + $0x270] sm:$0xff]   ;;  %v2176_v16 = vld [vmem:[%s3533_s0 + $0x280] sm:$0xff]  }
  0x32   :  { %358 = vst.msk [vmem:[#allocation0 + $0x2fc] sm:$0xf0] %vm3_vm0, %v2150_v54   ;;  %363 = vst.msk [vmem:[#allocation0 + $0x308] sm:$0xf] %vm3_vm0, %v2151_v55   ;;  %v2175_v15 = vld [vmem:[%s3533_s0 + $0x278] sm:$0xf]  }
  0x33   :  { %368 = vst.msk [vmem:[#allocation0 + $0x310] sm:$0xf] %vm3_vm0, %v2152_v56   ;;  %370 = vst.msk [vmem:[#allocation0 + $0x314] sm:$0xf0] %vm3_vm0, %v2152_v56   ;;  %v2177_v17 = vld [vmem:[%s3533_s0 + $0x288] sm:$0xff]   ;;  %v2178_v18 = vld [vmem:[%s3533_s0 + $0x290] sm:$0xff]  }
  0x34   :  { %375 = vst.msk [vmem:[#allocation0 + $0x320] sm:$0xf] %vm3_vm0, %v2153_v57   ;;  %377 = vst.msk [vmem:[#allocation0 + $0x324] sm:$0xf0] %vm3_vm0, %v2153_v57   ;;  %v2179_v19 = vld [vmem:[%s3533_s0 + $0x298] sm:$0xf]  }
  0x35   :  { %382 = vst.msk [vmem:[#allocation0 + $0x330] sm:$0xf] %vm3_vm0, %v2154_v58   ;;  %384 = vst.msk [vmem:[#allocation0 + $0x334] sm:$0xf0] %vm3_vm0, %v2154_v58   ;;  %v2180_v20 = vld [vmem:[%s3533_s0 + $0x2a0] sm:$0xff]   ;;  %v2181_v21 = vld [vmem:[%s3533_s0 + $0x2a8] sm:$0xff]  }
  0x36   :  { %389 = vst.msk [vmem:[#allocation0 + $0x340] sm:$0xf] %vm3_vm0, %v2155_v59   ;;  %394 = vst.msk [vmem:[#allocation0 + $0x348] sm:$0xf] %vm3_vm0, %v2156_v60   ;;  %v2182_v22 = vld [vmem:[%s3533_s0 + $0x2b0] sm:$0xff]   ;;  %v2184_v24 = vld [vmem:[%s3533_s0 + $0x2c0] sm:$0xff]  }
  0x37   :  { %396 = vst.msk [vmem:[#allocation0 + $0x34c] sm:$0xf0] %vm3_vm0, %v2156_v60   ;;  %401 = vst.msk [vmem:[#allocation0 + $0x358] sm:$0xf] %vm3_vm0, %v2157_v61   ;;  %v2183_v23 = vld [vmem:[%s3533_s0 + $0x2b8] sm:$0xf]  }
  0x38   :  { %403 = vst.msk [vmem:[#allocation0 + $0x35c] sm:$0xf0] %vm3_vm0, %v2157_v61   ;;  %408 = vst.msk [vmem:[#allocation0 + $0x368] sm:$0xf] %vm3_vm0, %v2158_v62   ;;  %v2185_v25 = vld [vmem:[%s3533_s0 + $0x2c8] sm:$0xff]   ;;  %v2186_v26 = vld [vmem:[%s3533_s0 + $0x2d0] sm:$0xff]  }
  0x39   :  { %410 = vst.msk [vmem:[#allocation0 + $0x36c] sm:$0xf0] %vm3_vm0, %v2158_v62   ;;  %415 = vst.msk [vmem:[#allocation0 + $0x378] sm:$0xf] %vm3_vm0, %v2159_v63   ;;  %v2187_v27 = vld [vmem:[%s3533_s0 + $0x2d8] sm:$0xf]  }
  0x3a   :  { %420 = vst.msk [vmem:[#allocation0 + $0x380] sm:$0xf] %vm3_vm0, %v2160_v0   ;;  %422 = vst.msk [vmem:[#allocation0 + $0x384] sm:$0xf0] %vm3_vm0, %v2160_v0   ;;  %v2188_v28 = vld [vmem:[%s3533_s0 + $0x2e0] sm:$0xff]   ;;  %v2189_v29 = vld [vmem:[%s3533_s0 + $0x2e8] sm:$0xff]  }
  0x3b   :  { %427 = vst.msk [vmem:[#allocation0 + $0x390] sm:$0xf] %vm3_vm0, %v2161_v1   ;;  %429 = vst.msk [vmem:[#allocation0 + $0x394] sm:$0xf0] %vm3_vm0, %v2161_v1   ;;  %v2190_v30 = vld [vmem:[%s3533_s0 + $0x2f0] sm:$0xff]   ;;  %v2192_v32 = vld [vmem:[%s3533_s0 + $0x300] sm:$0xff]  }
  0x3c   :  { %434 = vst.msk [vmem:[#allocation0 + $0x3a0] sm:$0xf] %vm3_vm0, %v2162_v2   ;;  %436 = vst.msk [vmem:[#allocation0 + $0x3a4] sm:$0xf0] %vm3_vm0, %v2162_v2   ;;  %v2191_v31 = vld [vmem:[%s3533_s0 + $0x2f8] sm:$0xf]  }
  0x3d   :  { %441 = vst.msk [vmem:[#allocation0 + $0x3b0] sm:$0xf] %vm3_vm0, %v2163_v3   ;;  %446 = vst.msk [vmem:[#allocation0 + $0x3b8] sm:$0xf] %vm3_vm0, %v2164_v4   ;;  %v2193_v33 = vld [vmem:[%s3533_s0 + $0x308] sm:$0xff]   ;;  %v2194_v34 = vld [vmem:[%s3533_s0 + $0x310] sm:$0xff]  }
  0x3e   :  { %448 = vst.msk [vmem:[#allocation0 + $0x3bc] sm:$0xf0] %vm3_vm0, %v2164_v4   ;;  %453 = vst.msk [vmem:[#allocation0 + $0x3c8] sm:$0xf] %vm3_vm0, %v2165_v5   ;;  %v2195_v35 = vld [vmem:[%s3533_s0 + $0x318] sm:$0xf]  }
  0x3f   :  { %455 = vst.msk [vmem:[#allocation0 + $0x3cc] sm:$0xf0] %vm3_vm0, %v2165_v5   ;;  %460 = vst.msk [vmem:[#allocation0 + $0x3d8] sm:$0xf] %vm3_vm0, %v2166_v6   ;;  %v2196_v36 = vld [vmem:[%s3533_s0 + $0x320] sm:$0xff]   ;;  %v2197_v37 = vld [vmem:[%s3533_s0 + $0x328] sm:$0xff]  }
  0x40   :  { %462 = vst.msk [vmem:[#allocation0 + $0x3dc] sm:$0xf0] %vm3_vm0, %v2166_v6   ;;  %467 = vst.msk [vmem:[#allocation0 + $0x3e8] sm:$0xf] %vm3_vm0, %v2167_v7   ;;  %v2198_v38 = vld [vmem:[%s3533_s0 + $0x330] sm:$0xff]   ;;  %v2200_v40 = vld [vmem:[%s3533_s0 + $0x340] sm:$0xff]  }
  0x41   :  { %472 = vst.msk [vmem:[#allocation0 + $0x3f0] sm:$0xf] %vm3_vm0, %v2168_v8   ;;  %474 = vst.msk [vmem:[#allocation0 + $0x3f4] sm:$0xf0] %vm3_vm0, %v2168_v8   ;;  %v2199_v39 = vld [vmem:[%s3533_s0 + $0x338] sm:$0xf]  }
  0x42   :  { %479 = vst.msk [vmem:[#allocation0 + $0x400] sm:$0xf] %vm3_vm0, %v2169_v9   ;;  %481 = vst.msk [vmem:[#allocation0 + $0x404] sm:$0xf0] %vm3_vm0, %v2169_v9   ;;  %v2201_v41 = vld [vmem:[%s3533_s0 + $0x348] sm:$0xff]   ;;  %v2202_v42 = vld [vmem:[%s3533_s0 + $0x350] sm:$0xff]  }
  0x43   :  { %486 = vst.msk [vmem:[#allocation0 + $0x410] sm:$0xf] %vm3_vm0, %v2170_v10   ;;  %488 = vst.msk [vmem:[#allocation0 + $0x414] sm:$0xf0] %vm3_vm0, %v2170_v10   ;;  %v2203_v43 = vld [vmem:[%s3533_s0 + $0x358] sm:$0xf]  }
  0x44   :  { %493 = vst.msk [vmem:[#allocation0 + $0x420] sm:$0xf] %vm3_vm0, %v2171_v11   ;;  %498 = vst.msk [vmem:[#allocation0 + $0x428] sm:$0xf] %vm3_vm0, %v2172_v12   ;;  %v2204_v44 = vld [vmem:[%s3533_s0 + $0x360] sm:$0xff]   ;;  %v2205_v45 = vld [vmem:[%s3533_s0 + $0x368] sm:$0xff]  }
  0x45   :  { %500 = vst.msk [vmem:[#allocation0 + $0x42c] sm:$0xf0] %vm3_vm0, %v2172_v12   ;;  %505 = vst.msk [vmem:[#allocation0 + $0x438] sm:$0xf] %vm3_vm0, %v2173_v13   ;;  %v2206_v46 = vld [vmem:[%s3533_s0 + $0x370] sm:$0xff]  }
  0x46   :  { %507 = vst.msk [vmem:[#allocation0 + $0x43c] sm:$0xf0] %vm3_vm0, %v2173_v13   ;;  %512 = vst.msk [vmem:[#allocation0 + $0x448] sm:$0xf] %vm3_vm0, %v2174_v14   ;;  %v2207_v47 = vld [vmem:[%s3533_s0 + $0x378] sm:$0xf]  }
  0x47   :  { %514 = vst.msk [vmem:[#allocation0 + $0x44c] sm:$0xf0] %vm3_vm0, %v2174_v14   ;;  %519 = vst.msk [vmem:[#allocation0 + $0x458] sm:$0xf] %vm3_vm0, %v2175_v15   ;;  %v731_v48 = vld [vmem:[#allocation0] sm:$0xf] }
  0x48   :  { %524 = vst.msk [vmem:[#allocation0 + $0x460] sm:$0xf] %vm3_vm0, %v2176_v16   ;;  %526 = vst.msk [vmem:[#allocation0 + $0x464] sm:$0xf0] %vm3_vm0, %v2176_v16   ;;  %v735_v49 = vld [vmem:[#allocation0 + $0x8] sm:$0xf] }
  0x49   :  { %531 = vst.msk [vmem:[#allocation0 + $0x470] sm:$0xf] %vm3_vm0, %v2177_v17   ;;  %533 = vst.msk [vmem:[#allocation0 + $0x474] sm:$0xf0] %vm3_vm0, %v2177_v17   ;;  %v740_v50 = vld [vmem:[#allocation0 + $0x10] sm:$0xf] }
  0x4a   :  { %538 = vst.msk [vmem:[#allocation0 + $0x480] sm:$0xf] %vm3_vm0, %v2178_v18   ;;  %540 = vst.msk [vmem:[#allocation0 + $0x484] sm:$0xf0] %vm3_vm0, %v2178_v18   ;;  %v746_v51 = vld [vmem:[#allocation0 + $0x18] sm:$0xf] }
  0x4b   :  { %545 = vst.msk [vmem:[#allocation0 + $0x490] sm:$0xf] %vm3_vm0, %v2179_v19   ;;  %550 = vst.msk [vmem:[#allocation0 + $0x498] sm:$0xf] %vm3_vm0, %v2180_v20   ;;  %v752_v52 = vld [vmem:[#allocation0 + $0x20] sm:$0xf] }
  0x4c   :  { %552 = vst.msk [vmem:[#allocation0 + $0x49c] sm:$0xf0] %vm3_vm0, %v2180_v20   ;;  %557 = vst.msk [vmem:[#allocation0 + $0x4a8] sm:$0xf] %vm3_vm0, %v2181_v21   ;;  %v758_v53 = vld [vmem:[#allocation0 + $0x28] sm:$0xf] }
  0x4d   :  { %559 = vst.msk [vmem:[#allocation0 + $0x4ac] sm:$0xf0] %vm3_vm0, %v2181_v21   ;;  %564 = vst.msk [vmem:[#allocation0 + $0x4b8] sm:$0xf] %vm3_vm0, %v2182_v22   ;;  %v764_v54 = vld [vmem:[#allocation0 + $0x30] sm:$0xf] }
  0x4e   :  { %566 = vst.msk [vmem:[#allocation0 + $0x4bc] sm:$0xf0] %vm3_vm0, %v2182_v22   ;;  %571 = vst.msk [vmem:[#allocation0 + $0x4c8] sm:$0xf] %vm3_vm0, %v2183_v23   ;;  %v770_v55 = vld [vmem:[#allocation0 + $0x38] sm:$0xf] }
  0x4f   :  { %576 = vst.msk [vmem:[#allocation0 + $0x4d0] sm:$0xf] %vm3_vm0, %v2184_v24   ;;  %578 = vst.msk [vmem:[#allocation0 + $0x4d4] sm:$0xf0] %vm3_vm0, %v2184_v24   ;;  %v776_v56 = vld [vmem:[#allocation0 + $0x40] sm:$0xf] }
  0x50   :  { %583 = vst.msk [vmem:[#allocation0 + $0x4e0] sm:$0xf] %vm3_vm0, %v2185_v25   ;;  %585 = vst.msk [vmem:[#allocation0 + $0x4e4] sm:$0xf0] %vm3_vm0, %v2185_v25   ;;  %v782_v57 = vld [vmem:[#allocation0 + $0x48] sm:$0xf] }
  0x51   :  { %590 = vst.msk [vmem:[#allocation0 + $0x4f0] sm:$0xf] %vm3_vm0, %v2186_v26   ;;  %592 = vst.msk [vmem:[#allocation0 + $0x4f4] sm:$0xf0] %vm3_vm0, %v2186_v26   ;;  %v788_v58 = vld [vmem:[#allocation0 + $0x50] sm:$0xf] }
  0x52   :  { %597 = vst.msk [vmem:[#allocation0 + $0x500] sm:$0xf] %vm3_vm0, %v2187_v27   ;;  %602 = vst.msk [vmem:[#allocation0 + $0x508] sm:$0xf] %vm3_vm0, %v2188_v28   ;;  %v794_v59 = vld [vmem:[#allocation0 + $0x58] sm:$0xf] }
  0x53   :  { %604 = vst.msk [vmem:[#allocation0 + $0x50c] sm:$0xf0] %vm3_vm0, %v2188_v28   ;;  %609 = vst.msk [vmem:[#allocation0 + $0x518] sm:$0xf] %vm3_vm0, %v2189_v29   ;;  %v800_v60 = vld [vmem:[#allocation0 + $0x60] sm:$0xf] }
  0x54   :  { %611 = vst.msk [vmem:[#allocation0 + $0x51c] sm:$0xf0] %vm3_vm0, %v2189_v29   ;;  %616 = vst.msk [vmem:[#allocation0 + $0x528] sm:$0xf] %vm3_vm0, %v2190_v30   ;;  %v806_v61 = vld [vmem:[#allocation0 + $0x68] sm:$0xf] }
  0x55   :  { %618 = vst.msk [vmem:[#allocation0 + $0x52c] sm:$0xf0] %vm3_vm0, %v2190_v30   ;;  %623 = vst.msk [vmem:[#allocation0 + $0x538] sm:$0xf] %vm3_vm0, %v2191_v31   ;;  %v812_v62 = vld [vmem:[#allocation0 + $0x70] sm:$0xf] }
  0x56   :  { %628 = vst.msk [vmem:[#allocation0 + $0x540] sm:$0xf] %vm3_vm0, %v2192_v32   ;;  %630 = vst.msk [vmem:[#allocation0 + $0x544] sm:$0xf0] %vm3_vm0, %v2192_v32   ;;  %v818_v63 = vld [vmem:[#allocation0 + $0x78] sm:$0xf] }
  0x57   :  { %635 = vst.msk [vmem:[#allocation0 + $0x550] sm:$0xf] %vm3_vm0, %v2193_v33   ;;  %637 = vst.msk [vmem:[#allocation0 + $0x554] sm:$0xf0] %vm3_vm0, %v2193_v33   ;;  %v824_v0 = vld [vmem:[#allocation0 + $0x80] sm:$0xf] }
  0x58   :  { %642 = vst.msk [vmem:[#allocation0 + $0x560] sm:$0xf] %vm3_vm0, %v2194_v34   ;;  %644 = vst.msk [vmem:[#allocation0 + $0x564] sm:$0xf0] %vm3_vm0, %v2194_v34   ;;  %v830_v1 = vld [vmem:[#allocation0 + $0x88] sm:$0xf] }
  0x59   :  { %649 = vst.msk [vmem:[#allocation0 + $0x570] sm:$0xf] %vm3_vm0, %v2195_v35   ;;  %654 = vst.msk [vmem:[#allocation0 + $0x578] sm:$0xf] %vm3_vm0, %v2196_v36   ;;  %v836_v2 = vld [vmem:[#allocation0 + $0x90] sm:$0xf] }
  0x5a   :  { %656 = vst.msk [vmem:[#allocation0 + $0x57c] sm:$0xf0] %vm3_vm0, %v2196_v36   ;;  %661 = vst.msk [vmem:[#allocation0 + $0x588] sm:$0xf] %vm3_vm0, %v2197_v37   ;;  %v842_v3 = vld [vmem:[#allocation0 + $0x98] sm:$0xf] }
  0x5b   :  { %663 = vst.msk [vmem:[#allocation0 + $0x58c] sm:$0xf0] %vm3_vm0, %v2197_v37   ;;  %668 = vst.msk [vmem:[#allocation0 + $0x598] sm:$0xf] %vm3_vm0, %v2198_v38   ;;  %v848_v4 = vld [vmem:[#allocation0 + $0xa0] sm:$0xf] }
  0x5c   :  { %670 = vst.msk [vmem:[#allocation0 + $0x59c] sm:$0xf0] %vm3_vm0, %v2198_v38   ;;  %675 = vst.msk [vmem:[#allocation0 + $0x5a8] sm:$0xf] %vm3_vm0, %v2199_v39   ;;  %v854_v5 = vld [vmem:[#allocation0 + $0xa8] sm:$0xf] }
  0x5d   :  { %680 = vst.msk [vmem:[#allocation0 + $0x5b0] sm:$0xf] %vm3_vm0, %v2200_v40   ;;  %682 = vst.msk [vmem:[#allocation0 + $0x5b4] sm:$0xf0] %vm3_vm0, %v2200_v40   ;;  %v860_v6 = vld [vmem:[#allocation0 + $0xb0] sm:$0xf] }
  0x5e   :  { %687 = vst.msk [vmem:[#allocation0 + $0x5c0] sm:$0xf] %vm3_vm0, %v2201_v41   ;;  %689 = vst.msk [vmem:[#allocation0 + $0x5c4] sm:$0xf0] %vm3_vm0, %v2201_v41   ;;  %v866_v7 = vld [vmem:[#allocation0 + $0xb8] sm:$0xf] }
  0x5f   :  { %694 = vst.msk [vmem:[#allocation0 + $0x5d0] sm:$0xf] %vm3_vm0, %v2202_v42   ;;  %696 = vst.msk [vmem:[#allocation0 + $0x5d4] sm:$0xf0] %vm3_vm0, %v2202_v42   ;;  %v872_v8 = vld [vmem:[#allocation0 + $0xc0] sm:$0xf] }
  0x60   :  { %701 = vst.msk [vmem:[#allocation0 + $0x5e0] sm:$0xf] %vm3_vm0, %v2203_v43   ;;  %706 = vst.msk [vmem:[#allocation0 + $0x5e8] sm:$0xf] %vm3_vm0, %v2204_v44   ;;  %v878_v9 = vld [vmem:[#allocation0 + $0xc8] sm:$0xf] }
  0x61   :  { %708 = vst.msk [vmem:[#allocation0 + $0x5ec] sm:$0xf0] %vm3_vm0, %v2204_v44   ;;  %713 = vst.msk [vmem:[#allocation0 + $0x5f8] sm:$0xf] %vm3_vm0, %v2205_v45   ;;  %v884_v10 = vld [vmem:[#allocation0 + $0xd0] sm:$0xf] }
  0x62   :  { %715 = vst.msk [vmem:[#allocation0 + $0x5fc] sm:$0xf0] %vm3_vm0, %v2205_v45   ;;  %720 = vst.msk [vmem:[#allocation0 + $0x608] sm:$0xf] %vm3_vm0, %v2206_v46   ;;  %v890_v11 = vld [vmem:[#allocation0 + $0xd8] sm:$0xf] }
  0x63   :  { %722 = vst.msk [vmem:[#allocation0 + $0x60c] sm:$0xf0] %vm3_vm0, %v2206_v46   ;;  %727 = vst.msk [vmem:[#allocation0 + $0x618] sm:$0xf] %vm3_vm0, %v2207_v47   ;;  %v896_v12 = vld [vmem:[#allocation0 + $0xe0] sm:$0xf] }
  0x64   :  { %733 = vst [vmem:[%s3534_s1] sm:$0xf] %v731_v48  ;;  %2208 = vst [vmem:[%s3534_s1 + $0x4] sm:$0xf] %v735_v49  ;;  %v902_v13 = vld [vmem:[#allocation0 + $0xe8] sm:$0xf] }
  0x65   :  { %2209 = vst [vmem:[%s3534_s1 + $0x8] sm:$0xf] %v740_v50  ;;  %2210 = vst [vmem:[%s3534_s1 + $0xc] sm:$0xf] %v746_v51  ;;  %v908_v14 = vld [vmem:[#allocation0 + $0xf0] sm:$0xf] }
  0x66   :  { %2211 = vst [vmem:[%s3534_s1 + $0x10] sm:$0xf] %v752_v52  ;;  %2212 = vst [vmem:[%s3534_s1 + $0x14] sm:$0xf] %v758_v53  ;;  %v914_v15 = vld [vmem:[#allocation0 + $0xf8] sm:$0xf] }
  0x67   :  { %2213 = vst [vmem:[%s3534_s1 + $0x18] sm:$0xf] %v764_v54  ;;  %2214 = vst [vmem:[%s3534_s1 + $0x1c] sm:$0xf] %v770_v55  ;;  %v920_v16 = vld [vmem:[#allocation0 + $0x100] sm:$0xf] }
  0x68   :  { %2215 = vst [vmem:[%s3534_s1 + $0x20] sm:$0xf] %v776_v56  ;;  %2216 = vst [vmem:[%s3534_s1 + $0x24] sm:$0xf] %v782_v57  ;;  %v926_v17 = vld [vmem:[#allocation0 + $0x108] sm:$0xf] }
  0x69   :  { %2217 = vst [vmem:[%s3534_s1 + $0x28] sm:$0xf] %v788_v58  ;;  %2218 = vst [vmem:[%s3534_s1 + $0x2c] sm:$0xf] %v794_v59  ;;  %v932_v18 = vld [vmem:[#allocation0 + $0x110] sm:$0xf] }
  0x6a   :  { %2219 = vst [vmem:[%s3534_s1 + $0x30] sm:$0xf] %v800_v60  ;;  %2220 = vst [vmem:[%s3534_s1 + $0x34] sm:$0xf] %v806_v61  ;;  %v938_v19 = vld [vmem:[#allocation0 + $0x118] sm:$0xf] }
  0x6b   :  { %2221 = vst [vmem:[%s3534_s1 + $0x38] sm:$0xf] %v812_v62  ;;  %2222 = vst [vmem:[%s3534_s1 + $0x3c] sm:$0xf] %v818_v63  ;;  %v944_v20 = vld [vmem:[#allocation0 + $0x120] sm:$0xf] }
  0x6c   :  { %2223 = vst [vmem:[%s3534_s1 + $0x40] sm:$0xf] %v824_v0  ;;  %2224 = vst [vmem:[%s3534_s1 + $0x44] sm:$0xf] %v830_v1  ;;  %v950_v21 = vld [vmem:[#allocation0 + $0x128] sm:$0xf] }
  0x6d   :  { %2225 = vst [vmem:[%s3534_s1 + $0x48] sm:$0xf] %v836_v2  ;;  %2226 = vst [vmem:[%s3534_s1 + $0x4c] sm:$0xf] %v842_v3  ;;  %v956_v22 = vld [vmem:[#allocation0 + $0x130] sm:$0xf] }
  0x6e   :  { %2227 = vst [vmem:[%s3534_s1 + $0x50] sm:$0xf] %v848_v4  ;;  %2228 = vst [vmem:[%s3534_s1 + $0x54] sm:$0xf] %v854_v5  ;;  %v962_v23 = vld [vmem:[#allocation0 + $0x138] sm:$0xf] }
  0x6f   :  { %2229 = vst [vmem:[%s3534_s1 + $0x58] sm:$0xf] %v860_v6  ;;  %2230 = vst [vmem:[%s3534_s1 + $0x5c] sm:$0xf] %v866_v7  ;;  %v968_v24 = vld [vmem:[#allocation0 + $0x140] sm:$0xf] }
  0x70   :  { %2231 = vst [vmem:[%s3534_s1 + $0x60] sm:$0xf] %v872_v8  ;;  %2232 = vst [vmem:[%s3534_s1 + $0x64] sm:$0xf] %v878_v9  ;;  %v974_v25 = vld [vmem:[#allocation0 + $0x148] sm:$0xf] }
  0x71   :  { %2233 = vst [vmem:[%s3534_s1 + $0x68] sm:$0xf] %v884_v10  ;;  %2234 = vst [vmem:[%s3534_s1 + $0x6c] sm:$0xf] %v890_v11  ;;  %v980_v26 = vld [vmem:[#allocation0 + $0x150] sm:$0xf] }
  0x72   :  { %2235 = vst [vmem:[%s3534_s1 + $0x70] sm:$0xf] %v896_v12  ;;  %2236 = vst [vmem:[%s3534_s1 + $0x74] sm:$0xf] %v902_v13  ;;  %v986_v27 = vld [vmem:[#allocation0 + $0x158] sm:$0xf] }
  0x73   :  { %2237 = vst [vmem:[%s3534_s1 + $0x78] sm:$0xf] %v908_v14  ;;  %2238 = vst [vmem:[%s3534_s1 + $0x7c] sm:$0xf] %v914_v15  ;;  %v992_v28 = vld [vmem:[#allocation0 + $0x160] sm:$0xf] }
  0x74   :  { %2239 = vst [vmem:[%s3534_s1 + $0x80] sm:$0xf] %v920_v16  ;;  %2240 = vst [vmem:[%s3534_s1 + $0x84] sm:$0xf] %v926_v17  ;;  %v998_v29 = vld [vmem:[#allocation0 + $0x168] sm:$0xf] }
  0x75   :  { %2241 = vst [vmem:[%s3534_s1 + $0x88] sm:$0xf] %v932_v18  ;;  %2242 = vst [vmem:[%s3534_s1 + $0x8c] sm:$0xf] %v938_v19  ;;  %v1004_v30 = vld [vmem:[#allocation0 + $0x170] sm:$0xf] }
  0x76   :  { %2243 = vst [vmem:[%s3534_s1 + $0x90] sm:$0xf] %v944_v20  ;;  %2244 = vst [vmem:[%s3534_s1 + $0x94] sm:$0xf] %v950_v21  ;;  %v1010_v31 = vld [vmem:[#allocation0 + $0x178] sm:$0xf] }
  0x77   :  { %2245 = vst [vmem:[%s3534_s1 + $0x98] sm:$0xf] %v956_v22  ;;  %2246 = vst [vmem:[%s3534_s1 + $0x9c] sm:$0xf] %v962_v23  ;;  %v1016_v32 = vld [vmem:[#allocation0 + $0x180] sm:$0xf] }
  0x78   :  { %2247 = vst [vmem:[%s3534_s1 + $0xa0] sm:$0xf] %v968_v24  ;;  %2248 = vst [vmem:[%s3534_s1 + $0xa4] sm:$0xf] %v974_v25  ;;  %v1022_v33 = vld [vmem:[#allocation0 + $0x188] sm:$0xf] }
  0x79   :  { %2249 = vst [vmem:[%s3534_s1 + $0xa8] sm:$0xf] %v980_v26  ;;  %2250 = vst [vmem:[%s3534_s1 + $0xac] sm:$0xf] %v986_v27  ;;  %v1028_v34 = vld [vmem:[#allocation0 + $0x190] sm:$0xf] }
  0x7a   :  { %2251 = vst [vmem:[%s3534_s1 + $0xb0] sm:$0xf] %v992_v28  ;;  %2252 = vst [vmem:[%s3534_s1 + $0xb4] sm:$0xf] %v998_v29  ;;  %v1034_v35 = vld [vmem:[#allocation0 + $0x198] sm:$0xf] }
  0x7b   :  { %2253 = vst [vmem:[%s3534_s1 + $0xb8] sm:$0xf] %v1004_v30  ;;  %2254 = vst [vmem:[%s3534_s1 + $0xbc] sm:$0xf] %v1010_v31  ;;  %v1040_v36 = vld [vmem:[#allocation0 + $0x1a0] sm:$0xf] }
  0x7c   :  { %2255 = vst [vmem:[%s3534_s1 + $0xc0] sm:$0xf] %v1016_v32  ;;  %2256 = vst [vmem:[%s3534_s1 + $0xc4] sm:$0xf] %v1022_v33  ;;  %v1046_v37 = vld [vmem:[#allocation0 + $0x1a8] sm:$0xf] }
  0x7d   :  { %2257 = vst [vmem:[%s3534_s1 + $0xc8] sm:$0xf] %v1028_v34  ;;  %2258 = vst [vmem:[%s3534_s1 + $0xcc] sm:$0xf] %v1034_v35  ;;  %v1052_v38 = vld [vmem:[#allocation0 + $0x1b0] sm:$0xf] }
  0x7e   :  { %2259 = vst [vmem:[%s3534_s1 + $0xd0] sm:$0xf] %v1040_v36  ;;  %v1058_v39 = vld [vmem:[#allocation0 + $0x1b8] sm:$0xf]  ;;  %2260 = vst [vmem:[%s3534_s1 + $0xd4] sm:$0xf] %v1046_v37 }
  0x7f   :  { %2261 = vst [vmem:[%s3534_s1 + $0xd8] sm:$0xf] %v1052_v38  ;;  %2262 = vst [vmem:[%s3534_s1 + $0xdc] sm:$0xf] %v1058_v39  ;;  %v1064_v40 = vld [vmem:[#allocation0 + $0x1c0] sm:$0xf] }
  0x80   :  { %v1070_v41 = vld [vmem:[#allocation0 + $0x1c8] sm:$0xf]  ;;  %v1076_v42 = vld [vmem:[#allocation0 + $0x1d0] sm:$0xf]  ;;  %2263 = vst [vmem:[%s3534_s1 + $0xe0] sm:$0xf] %v1064_v40 }
  0x81   :  { %2264 = vst [vmem:[%s3534_s1 + $0xe4] sm:$0xf] %v1070_v41  ;;  %2265 = vst [vmem:[%s3534_s1 + $0xe8] sm:$0xf] %v1076_v42  ;;  %v1082_v43 = vld [vmem:[#allocation0 + $0x1d8] sm:$0xf] }
  0x82   :  { %v1088_v44 = vld [vmem:[#allocation0 + $0x1e0] sm:$0xf]  ;;  %v1094_v45 = vld [vmem:[#allocation0 + $0x1e8] sm:$0xf]  ;;  %2266 = vst [vmem:[%s3534_s1 + $0xec] sm:$0xf] %v1082_v43 }
  0x83   :  { %2267 = vst [vmem:[%s3534_s1 + $0xf0] sm:$0xf] %v1088_v44  ;;  %2268 = vst [vmem:[%s3534_s1 + $0xf4] sm:$0xf] %v1094_v45  ;;  %v1100_v46 = vld [vmem:[#allocation0 + $0x1f0] sm:$0xf] }
  0x84   :  { %v1106_v47 = vld [vmem:[#allocation0 + $0x1f8] sm:$0xf]  ;;  %v1112_v48 = vld [vmem:[#allocation0 + $0x200] sm:$0xf]  ;;  %2269 = vst [vmem:[%s3534_s1 + $0xf8] sm:$0xf] %v1100_v46 }
  0x85   :  { %2270 = vst [vmem:[%s3534_s1 + $0xfc] sm:$0xf] %v1106_v47  ;;  %2271 = vst [vmem:[%s3534_s1 + $0x100] sm:$0xf] %v1112_v48  ;;  %v1118_v49 = vld [vmem:[#allocation0 + $0x208] sm:$0xf] }
  0x86   :  { %v1124_v50 = vld [vmem:[#allocation0 + $0x210] sm:$0xf]  ;;  %v1130_v51 = vld [vmem:[#allocation0 + $0x218] sm:$0xf]  ;;  %2272 = vst [vmem:[%s3534_s1 + $0x104] sm:$0xf] %v1118_v49 }
  0x87   :  { %2273 = vst [vmem:[%s3534_s1 + $0x108] sm:$0xf] %v1124_v50  ;;  %2274 = vst [vmem:[%s3534_s1 + $0x10c] sm:$0xf] %v1130_v51  ;;  %v1136_v52 = vld [vmem:[#allocation0 + $0x220] sm:$0xf] }
  0x88   :  { %v1142_v53 = vld [vmem:[#allocation0 + $0x228] sm:$0xf]  ;;  %v1148_v54 = vld [vmem:[#allocation0 + $0x230] sm:$0xf]  ;;  %2275 = vst [vmem:[%s3534_s1 + $0x110] sm:$0xf] %v1136_v52 }
  0x89   :  { %2276 = vst [vmem:[%s3534_s1 + $0x114] sm:$0xf] %v1142_v53  ;;  %2277 = vst [vmem:[%s3534_s1 + $0x118] sm:$0xf] %v1148_v54  ;;  %v1154_v55 = vld [vmem:[#allocation0 + $0x238] sm:$0xf] }
  0x8a   :  { %v1160_v56 = vld [vmem:[#allocation0 + $0x240] sm:$0xf]  ;;  %v1166_v57 = vld [vmem:[#allocation0 + $0x248] sm:$0xf]  ;;  %2278 = vst [vmem:[%s3534_s1 + $0x11c] sm:$0xf] %v1154_v55 }
  0x8b   :  { %2279 = vst [vmem:[%s3534_s1 + $0x120] sm:$0xf] %v1160_v56  ;;  %2280 = vst [vmem:[%s3534_s1 + $0x124] sm:$0xf] %v1166_v57  ;;  %v1172_v58 = vld [vmem:[#allocation0 + $0x250] sm:$0xf] }
  0x8c   :  { %v1178_v59 = vld [vmem:[#allocation0 + $0x258] sm:$0xf]  ;;  %v1184_v60 = vld [vmem:[#allocation0 + $0x260] sm:$0xf]  ;;  %2281 = vst [vmem:[%s3534_s1 + $0x128] sm:$0xf] %v1172_v58 }
  0x8d   :  { %2282 = vst [vmem:[%s3534_s1 + $0x12c] sm:$0xf] %v1178_v59  ;;  %2283 = vst [vmem:[%s3534_s1 + $0x130] sm:$0xf] %v1184_v60  ;;  %v1190_v61 = vld [vmem:[#allocation0 + $0x268] sm:$0xf] }
  0x8e   :  { %v1196_v62 = vld [vmem:[#allocation0 + $0x270] sm:$0xf]  ;;  %v1202_v63 = vld [vmem:[#allocation0 + $0x278] sm:$0xf]  ;;  %2284 = vst [vmem:[%s3534_s1 + $0x134] sm:$0xf] %v1190_v61 }
  0x8f   :  { %2285 = vst [vmem:[%s3534_s1 + $0x138] sm:$0xf] %v1196_v62  ;;  %2286 = vst [vmem:[%s3534_s1 + $0x13c] sm:$0xf] %v1202_v63  ;;  %v1208_v0 = vld [vmem:[#allocation0 + $0x280] sm:$0xf] }
  0x90   :  { %v1214_v1 = vld [vmem:[#allocation0 + $0x288] sm:$0xf]  ;;  %v1220_v2 = vld [vmem:[#allocation0 + $0x290] sm:$0xf]  ;;  %2287 = vst [vmem:[%s3534_s1 + $0x140] sm:$0xf] %v1208_v0 }
  0x91   :  { %2288 = vst [vmem:[%s3534_s1 + $0x144] sm:$0xf] %v1214_v1  ;;  %2289 = vst [vmem:[%s3534_s1 + $0x148] sm:$0xf] %v1220_v2  ;;  %v1226_v3 = vld [vmem:[#allocation0 + $0x298] sm:$0xf] }
  0x92   :  { %v1232_v4 = vld [vmem:[#allocation0 + $0x2a0] sm:$0xf]  ;;  %v1238_v5 = vld [vmem:[#allocation0 + $0x2a8] sm:$0xf]  ;;  %2290 = vst [vmem:[%s3534_s1 + $0x14c] sm:$0xf] %v1226_v3 }
  0x93   :  { %2291 = vst [vmem:[%s3534_s1 + $0x150] sm:$0xf] %v1232_v4  ;;  %2292 = vst [vmem:[%s3534_s1 + $0x154] sm:$0xf] %v1238_v5  ;;  %v1244_v6 = vld [vmem:[#allocation0 + $0x2b0] sm:$0xf] }
  0x94   :  { %v1250_v7 = vld [vmem:[#allocation0 + $0x2b8] sm:$0xf]  ;;  %v1256_v8 = vld [vmem:[#allocation0 + $0x2c0] sm:$0xf]  ;;  %2293 = vst [vmem:[%s3534_s1 + $0x158] sm:$0xf] %v1244_v6 }
  0x95   :  { %2294 = vst [vmem:[%s3534_s1 + $0x15c] sm:$0xf] %v1250_v7  ;;  %2295 = vst [vmem:[%s3534_s1 + $0x160] sm:$0xf] %v1256_v8  ;;  %v1262_v9 = vld [vmem:[#allocation0 + $0x2c8] sm:$0xf] }
  0x96   :  { %v1268_v10 = vld [vmem:[#allocation0 + $0x2d0] sm:$0xf]  ;;  %v1274_v11 = vld [vmem:[#allocation0 + $0x2d8] sm:$0xf]  ;;  %2296 = vst [vmem:[%s3534_s1 + $0x164] sm:$0xf] %v1262_v9 }
  0x97   :  { %2297 = vst [vmem:[%s3534_s1 + $0x168] sm:$0xf] %v1268_v10  ;;  %2298 = vst [vmem:[%s3534_s1 + $0x16c] sm:$0xf] %v1274_v11  ;;  %v1280_v12 = vld [vmem:[#allocation0 + $0x2e0] sm:$0xf] }
  0x98   :  { %v1286_v13 = vld [vmem:[#allocation0 + $0x2e8] sm:$0xf]  ;;  %v1292_v14 = vld [vmem:[#allocation0 + $0x2f0] sm:$0xf]  ;;  %2299 = vst [vmem:[%s3534_s1 + $0x170] sm:$0xf] %v1280_v12 }
  0x99   :  { %2300 = vst [vmem:[%s3534_s1 + $0x174] sm:$0xf] %v1286_v13  ;;  %2301 = vst [vmem:[%s3534_s1 + $0x178] sm:$0xf] %v1292_v14  ;;  %v1298_v15 = vld [vmem:[#allocation0 + $0x2f8] sm:$0xf] }
  0x9a   :  { %v1304_v16 = vld [vmem:[#allocation0 + $0x300] sm:$0xf]  ;;  %v1310_v17 = vld [vmem:[#allocation0 + $0x308] sm:$0xf]  ;;  %2302 = vst [vmem:[%s3534_s1 + $0x17c] sm:$0xf] %v1298_v15 }
  0x9b   :  { %2303 = vst [vmem:[%s3534_s1 + $0x180] sm:$0xf] %v1304_v16  ;;  %2304 = vst [vmem:[%s3534_s1 + $0x184] sm:$0xf] %v1310_v17  ;;  %v1316_v18 = vld [vmem:[#allocation0 + $0x310] sm:$0xf] }
  0x9c   :  { %v1322_v19 = vld [vmem:[#allocation0 + $0x318] sm:$0xf]  ;;  %v1328_v20 = vld [vmem:[#allocation0 + $0x320] sm:$0xf]  ;;  %2305 = vst [vmem:[%s3534_s1 + $0x188] sm:$0xf] %v1316_v18 }
  0x9d   :  { %2306 = vst [vmem:[%s3534_s1 + $0x18c] sm:$0xf] %v1322_v19  ;;  %2307 = vst [vmem:[%s3534_s1 + $0x190] sm:$0xf] %v1328_v20  ;;  %v1334_v21 = vld [vmem:[#allocation0 + $0x328] sm:$0xf] }
  0x9e   :  { %v1340_v22 = vld [vmem:[#allocation0 + $0x330] sm:$0xf]  ;;  %v1346_v23 = vld [vmem:[#allocation0 + $0x338] sm:$0xf]  ;;  %2308 = vst [vmem:[%s3534_s1 + $0x194] sm:$0xf] %v1334_v21 }
  0x9f   :  { %2309 = vst [vmem:[%s3534_s1 + $0x198] sm:$0xf] %v1340_v22  ;;  %2310 = vst [vmem:[%s3534_s1 + $0x19c] sm:$0xf] %v1346_v23  ;;  %v1352_v24 = vld [vmem:[#allocation0 + $0x340] sm:$0xf] }
  0xa0   :  { %v1358_v25 = vld [vmem:[#allocation0 + $0x348] sm:$0xf]  ;;  %v1364_v26 = vld [vmem:[#allocation0 + $0x350] sm:$0xf]  ;;  %2311 = vst [vmem:[%s3534_s1 + $0x1a0] sm:$0xf] %v1352_v24 }
  0xa1   :  { %2312 = vst [vmem:[%s3534_s1 + $0x1a4] sm:$0xf] %v1358_v25  ;;  %2313 = vst [vmem:[%s3534_s1 + $0x1a8] sm:$0xf] %v1364_v26  ;;  %v1370_v27 = vld [vmem:[#allocation0 + $0x358] sm:$0xf] }
  0xa2   :  { %v1376_v28 = vld [vmem:[#allocation0 + $0x360] sm:$0xf]  ;;  %v1382_v29 = vld [vmem:[#allocation0 + $0x368] sm:$0xf]  ;;  %2314 = vst [vmem:[%s3534_s1 + $0x1ac] sm:$0xf] %v1370_v27 }
  0xa3   :  { %2315 = vst [vmem:[%s3534_s1 + $0x1b0] sm:$0xf] %v1376_v28  ;;  %2316 = vst [vmem:[%s3534_s1 + $0x1b4] sm:$0xf] %v1382_v29  ;;  %v1388_v30 = vld [vmem:[#allocation0 + $0x370] sm:$0xf] }
  0xa4   :  { %v1394_v31 = vld [vmem:[#allocation0 + $0x378] sm:$0xf]  ;;  %v1400_v32 = vld [vmem:[#allocation0 + $0x380] sm:$0xf]  ;;  %2317 = vst [vmem:[%s3534_s1 + $0x1b8] sm:$0xf] %v1388_v30 }
  0xa5   :  { %2318 = vst [vmem:[%s3534_s1 + $0x1bc] sm:$0xf] %v1394_v31  ;;  %2319 = vst [vmem:[%s3534_s1 + $0x1c0] sm:$0xf] %v1400_v32  ;;  %v1406_v33 = vld [vmem:[#allocation0 + $0x388] sm:$0xf] }
  0xa6   :  { %v1412_v34 = vld [vmem:[#allocation0 + $0x390] sm:$0xf]  ;;  %v1418_v35 = vld [vmem:[#allocation0 + $0x398] sm:$0xf]  ;;  %2320 = vst [vmem:[%s3534_s1 + $0x1c4] sm:$0xf] %v1406_v33 }
  0xa7   :  { %2321 = vst [vmem:[%s3534_s1 + $0x1c8] sm:$0xf] %v1412_v34  ;;  %2322 = vst [vmem:[%s3534_s1 + $0x1cc] sm:$0xf] %v1418_v35  ;;  %v1424_v36 = vld [vmem:[#allocation0 + $0x3a0] sm:$0xf] }
  0xa8   :  { %v1430_v37 = vld [vmem:[#allocation0 + $0x3a8] sm:$0xf]  ;;  %v1436_v38 = vld [vmem:[#allocation0 + $0x3b0] sm:$0xf]  ;;  %2323 = vst [vmem:[%s3534_s1 + $0x1d0] sm:$0xf] %v1424_v36 }
  0xa9   :  { %2324 = vst [vmem:[%s3534_s1 + $0x1d4] sm:$0xf] %v1430_v37  ;;  %2325 = vst [vmem:[%s3534_s1 + $0x1d8] sm:$0xf] %v1436_v38  ;;  %v1442_v39 = vld [vmem:[#allocation0 + $0x3b8] sm:$0xf] }
  0xaa   :  { %v1448_v40 = vld [vmem:[#allocation0 + $0x3c0] sm:$0xf]  ;;  %v1454_v41 = vld [vmem:[#allocation0 + $0x3c8] sm:$0xf]  ;;  %2326 = vst [vmem:[%s3534_s1 + $0x1dc] sm:$0xf] %v1442_v39 }
  0xab   :  { %2327 = vst [vmem:[%s3534_s1 + $0x1e0] sm:$0xf] %v1448_v40  ;;  %2328 = vst [vmem:[%s3534_s1 + $0x1e4] sm:$0xf] %v1454_v41  ;;  %v1460_v42 = vld [vmem:[#allocation0 + $0x3d0] sm:$0xf] }
  0xac   :  { %v1466_v43 = vld [vmem:[#allocation0 + $0x3d8] sm:$0xf]  ;;  %v1472_v44 = vld [vmem:[#allocation0 + $0x3e0] sm:$0xf]  ;;  %2329 = vst [vmem:[%s3534_s1 + $0x1e8] sm:$0xf] %v1460_v42 }
  0xad   :  { %2330 = vst [vmem:[%s3534_s1 + $0x1ec] sm:$0xf] %v1466_v43  ;;  %2331 = vst [vmem:[%s3534_s1 + $0x1f0] sm:$0xf] %v1472_v44  ;;  %v1478_v45 = vld [vmem:[#allocation0 + $0x3e8] sm:$0xf] }
  0xae   :  { %v1484_v46 = vld [vmem:[#allocation0 + $0x3f0] sm:$0xf]  ;;  %v1490_v47 = vld [vmem:[#allocation0 + $0x3f8] sm:$0xf]  ;;  %2332 = vst [vmem:[%s3534_s1 + $0x1f4] sm:$0xf] %v1478_v45 }
  0xaf   :  { %2333 = vst [vmem:[%s3534_s1 + $0x1f8] sm:$0xf] %v1484_v46  ;;  %2334 = vst [vmem:[%s3534_s1 + $0x1fc] sm:$0xf] %v1490_v47  ;;  %v1496_v48 = vld [vmem:[#allocation0 + $0x400] sm:$0xf] }
  0xb0   :  { %v1502_v49 = vld [vmem:[#allocation0 + $0x408] sm:$0xf]  ;;  %v1508_v50 = vld [vmem:[#allocation0 + $0x410] sm:$0xf]  ;;  %2335 = vst [vmem:[%s3534_s1 + $0x200] sm:$0xf] %v1496_v48 }
  0xb1   :  { %2336 = vst [vmem:[%s3534_s1 + $0x204] sm:$0xf] %v1502_v49  ;;  %2337 = vst [vmem:[%s3534_s1 + $0x208] sm:$0xf] %v1508_v50  ;;  %v1514_v51 = vld [vmem:[#allocation0 + $0x418] sm:$0xf] }
  0xb2   :  { %v1520_v52 = vld [vmem:[#allocation0 + $0x420] sm:$0xf]  ;;  %v1526_v53 = vld [vmem:[#allocation0 + $0x428] sm:$0xf]  ;;  %2338 = vst [vmem:[%s3534_s1 + $0x20c] sm:$0xf] %v1514_v51 }
  0xb3   :  { %2339 = vst [vmem:[%s3534_s1 + $0x210] sm:$0xf] %v1520_v52  ;;  %2340 = vst [vmem:[%s3534_s1 + $0x214] sm:$0xf] %v1526_v53  ;;  %v1532_v54 = vld [vmem:[#allocation0 + $0x430] sm:$0xf] }
  0xb4   :  { %v1538_v55 = vld [vmem:[#allocation0 + $0x438] sm:$0xf]  ;;  %v1544_v56 = vld [vmem:[#allocation0 + $0x440] sm:$0xf]  ;;  %2341 = vst [vmem:[%s3534_s1 + $0x218] sm:$0xf] %v1532_v54 }
  0xb5   :  { %2342 = vst [vmem:[%s3534_s1 + $0x21c] sm:$0xf] %v1538_v55  ;;  %2343 = vst [vmem:[%s3534_s1 + $0x220] sm:$0xf] %v1544_v56  ;;  %v1550_v57 = vld [vmem:[#allocation0 + $0x448] sm:$0xf] }
  0xb6   :  { %v1556_v58 = vld [vmem:[#allocation0 + $0x450] sm:$0xf]  ;;  %v1562_v59 = vld [vmem:[#allocation0 + $0x458] sm:$0xf]  ;;  %2344 = vst [vmem:[%s3534_s1 + $0x224] sm:$0xf] %v1550_v57 }
  0xb7   :  { %2345 = vst [vmem:[%s3534_s1 + $0x228] sm:$0xf] %v1556_v58  ;;  %2346 = vst [vmem:[%s3534_s1 + $0x22c] sm:$0xf] %v1562_v59  ;;  %v1568_v60 = vld [vmem:[#allocation0 + $0x460] sm:$0xf] }
  0xb8   :  { %v1574_v61 = vld [vmem:[#allocation0 + $0x468] sm:$0xf]  ;;  %v1580_v62 = vld [vmem:[#allocation0 + $0x470] sm:$0xf]  ;;  %2347 = vst [vmem:[%s3534_s1 + $0x230] sm:$0xf] %v1568_v60 }
  0xb9   :  { %2348 = vst [vmem:[%s3534_s1 + $0x234] sm:$0xf] %v1574_v61  ;;  %2349 = vst [vmem:[%s3534_s1 + $0x238] sm:$0xf] %v1580_v62  ;;  %v1586_v63 = vld [vmem:[#allocation0 + $0x478] sm:$0xf] }
  0xba   :  { %v1592_v0 = vld [vmem:[#allocation0 + $0x480] sm:$0xf]  ;;  %v1598_v1 = vld [vmem:[#allocation0 + $0x488] sm:$0xf]  ;;  %2350 = vst [vmem:[%s3534_s1 + $0x23c] sm:$0xf] %v1586_v63 }
  0xbb   :  { %2351 = vst [vmem:[%s3534_s1 + $0x240] sm:$0xf] %v1592_v0  ;;  %2352 = vst [vmem:[%s3534_s1 + $0x244] sm:$0xf] %v1598_v1  ;;  %v1604_v2 = vld [vmem:[#allocation0 + $0x490] sm:$0xf] }
  0xbc   :  { %v1610_v3 = vld [vmem:[#allocation0 + $0x498] sm:$0xf]  ;;  %v1616_v4 = vld [vmem:[#allocation0 + $0x4a0] sm:$0xf]  ;;  %2353 = vst [vmem:[%s3534_s1 + $0x248] sm:$0xf] %v1604_v2 }
  0xbd   :  { %2354 = vst [vmem:[%s3534_s1 + $0x24c] sm:$0xf] %v1610_v3  ;;  %2355 = vst [vmem:[%s3534_s1 + $0x250] sm:$0xf] %v1616_v4  ;;  %v1622_v5 = vld [vmem:[#allocation0 + $0x4a8] sm:$0xf] }
  0xbe   :  { %v1628_v6 = vld [vmem:[#allocation0 + $0x4b0] sm:$0xf]  ;;  %v1634_v7 = vld [vmem:[#allocation0 + $0x4b8] sm:$0xf]  ;;  %2356 = vst [vmem:[%s3534_s1 + $0x254] sm:$0xf] %v1622_v5 }
  0xbf   :  { %2357 = vst [vmem:[%s3534_s1 + $0x258] sm:$0xf] %v1628_v6  ;;  %2358 = vst [vmem:[%s3534_s1 + $0x25c] sm:$0xf] %v1634_v7  ;;  %v1640_v8 = vld [vmem:[#allocation0 + $0x4c0] sm:$0xf] }
  0xc0   :  { %v1646_v9 = vld [vmem:[#allocation0 + $0x4c8] sm:$0xf]  ;;  %v1652_v10 = vld [vmem:[#allocation0 + $0x4d0] sm:$0xf]  ;;  %2359 = vst [vmem:[%s3534_s1 + $0x260] sm:$0xf] %v1640_v8 }
  0xc1   :  { %2360 = vst [vmem:[%s3534_s1 + $0x264] sm:$0xf] %v1646_v9  ;;  %2361 = vst [vmem:[%s3534_s1 + $0x268] sm:$0xf] %v1652_v10  ;;  %v1658_v11 = vld [vmem:[#allocation0 + $0x4d8] sm:$0xf] }
  0xc2   :  { %v1664_v12 = vld [vmem:[#allocation0 + $0x4e0] sm:$0xf]  ;;  %v1670_v13 = vld [vmem:[#allocation0 + $0x4e8] sm:$0xf]  ;;  %2362 = vst [vmem:[%s3534_s1 + $0x26c] sm:$0xf] %v1658_v11 }
  0xc3   :  { %2363 = vst [vmem:[%s3534_s1 + $0x270] sm:$0xf] %v1664_v12  ;;  %2364 = vst [vmem:[%s3534_s1 + $0x274] sm:$0xf] %v1670_v13  ;;  %v1676_v14 = vld [vmem:[#allocation0 + $0x4f0] sm:$0xf] }
  0xc4   :  { %v1682_v15 = vld [vmem:[#allocation0 + $0x4f8] sm:$0xf]  ;;  %v1688_v16 = vld [vmem:[#allocation0 + $0x500] sm:$0xf]  ;;  %2365 = vst [vmem:[%s3534_s1 + $0x278] sm:$0xf] %v1676_v14 }
  0xc5   :  { %2366 = vst [vmem:[%s3534_s1 + $0x27c] sm:$0xf] %v1682_v15  ;;  %2367 = vst [vmem:[%s3534_s1 + $0x280] sm:$0xf] %v1688_v16  ;;  %v1694_v17 = vld [vmem:[#allocation0 + $0x508] sm:$0xf] }
  0xc6   :  { %v1700_v18 = vld [vmem:[#allocation0 + $0x510] sm:$0xf]  ;;  %v1706_v19 = vld [vmem:[#allocation0 + $0x518] sm:$0xf]  ;;  %2368 = vst [vmem:[%s3534_s1 + $0x284] sm:$0xf] %v1694_v17 }
  0xc7   :  { %2369 = vst [vmem:[%s3534_s1 + $0x288] sm:$0xf] %v1700_v18  ;;  %2370 = vst [vmem:[%s3534_s1 + $0x28c] sm:$0xf] %v1706_v19  ;;  %v1712_v20 = vld [vmem:[#allocation0 + $0x520] sm:$0xf] }
  0xc8   :  { %v1718_v21 = vld [vmem:[#allocation0 + $0x528] sm:$0xf]  ;;  %v1724_v22 = vld [vmem:[#allocation0 + $0x530] sm:$0xf]  ;;  %2371 = vst [vmem:[%s3534_s1 + $0x290] sm:$0xf] %v1712_v20 }
  0xc9   :  { %2372 = vst [vmem:[%s3534_s1 + $0x294] sm:$0xf] %v1718_v21  ;;  %2373 = vst [vmem:[%s3534_s1 + $0x298] sm:$0xf] %v1724_v22  ;;  %v1730_v23 = vld [vmem:[#allocation0 + $0x538] sm:$0xf] }
  0xca   :  { %v1736_v24 = vld [vmem:[#allocation0 + $0x540] sm:$0xf]  ;;  %v1742_v25 = vld [vmem:[#allocation0 + $0x548] sm:$0xf]  ;;  %2374 = vst [vmem:[%s3534_s1 + $0x29c] sm:$0xf] %v1730_v23 }
  0xcb   :  { %2375 = vst [vmem:[%s3534_s1 + $0x2a0] sm:$0xf] %v1736_v24  ;;  %2376 = vst [vmem:[%s3534_s1 + $0x2a4] sm:$0xf] %v1742_v25  ;;  %v1748_v26 = vld [vmem:[#allocation0 + $0x550] sm:$0xf] }
  0xcc   :  { %v1754_v27 = vld [vmem:[#allocation0 + $0x558] sm:$0xf]  ;;  %v1760_v28 = vld [vmem:[#allocation0 + $0x560] sm:$0xf]  ;;  %2377 = vst [vmem:[%s3534_s1 + $0x2a8] sm:$0xf] %v1748_v26 }
  0xcd   :  { %2378 = vst [vmem:[%s3534_s1 + $0x2ac] sm:$0xf] %v1754_v27  ;;  %2379 = vst [vmem:[%s3534_s1 + $0x2b0] sm:$0xf] %v1760_v28  ;;  %v1766_v29 = vld [vmem:[#allocation0 + $0x568] sm:$0xf] }
  0xce   :  { %v1772_v30 = vld [vmem:[#allocation0 + $0x570] sm:$0xf]  ;;  %v1778_v31 = vld [vmem:[#allocation0 + $0x578] sm:$0xf]  ;;  %2380 = vst [vmem:[%s3534_s1 + $0x2b4] sm:$0xf] %v1766_v29 }
  0xcf   :  { %2381 = vst [vmem:[%s3534_s1 + $0x2b8] sm:$0xf] %v1772_v30  ;;  %2382 = vst [vmem:[%s3534_s1 + $0x2bc] sm:$0xf] %v1778_v31  ;;  %v1784_v32 = vld [vmem:[#allocation0 + $0x580] sm:$0xf] }
  0xd0   :  { %v1790_v33 = vld [vmem:[#allocation0 + $0x588] sm:$0xf]  ;;  %v1796_v34 = vld [vmem:[#allocation0 + $0x590] sm:$0xf]  ;;  %2383 = vst [vmem:[%s3534_s1 + $0x2c0] sm:$0xf] %v1784_v32 }
  0xd1   :  { %2384 = vst [vmem:[%s3534_s1 + $0x2c4] sm:$0xf] %v1790_v33  ;;  %2385 = vst [vmem:[%s3534_s1 + $0x2c8] sm:$0xf] %v1796_v34  ;;  %v1802_v35 = vld [vmem:[#allocation0 + $0x598] sm:$0xf] }
  0xd2   :  { %v1808_v36 = vld [vmem:[#allocation0 + $0x5a0] sm:$0xf]  ;;  %v1814_v37 = vld [vmem:[#allocation0 + $0x5a8] sm:$0xf]  ;;  %2386 = vst [vmem:[%s3534_s1 + $0x2cc] sm:$0xf] %v1802_v35 }
  0xd3   :  { %2387 = vst [vmem:[%s3534_s1 + $0x2d0] sm:$0xf] %v1808_v36  ;;  %2388 = vst [vmem:[%s3534_s1 + $0x2d4] sm:$0xf] %v1814_v37  ;;  %v1820_v38 = vld [vmem:[#allocation0 + $0x5b0] sm:$0xf] }
  0xd4   :  { %v1826_v39 = vld [vmem:[#allocation0 + $0x5b8] sm:$0xf]  ;;  %v1832_v40 = vld [vmem:[#allocation0 + $0x5c0] sm:$0xf]  ;;  %2389 = vst [vmem:[%s3534_s1 + $0x2d8] sm:$0xf] %v1820_v38 }
  0xd5   :  { %2390 = vst [vmem:[%s3534_s1 + $0x2dc] sm:$0xf] %v1826_v39  ;;  %2391 = vst [vmem:[%s3534_s1 + $0x2e0] sm:$0xf] %v1832_v40  ;;  %v1838_v41 = vld [vmem:[#allocation0 + $0x5c8] sm:$0xf] }
  0xd6   :  { %v1844_v42 = vld [vmem:[#allocation0 + $0x5d0] sm:$0xf]  ;;  %v1850_v43 = vld [vmem:[#allocation0 + $0x5d8] sm:$0xf]  ;;  %2392 = vst [vmem:[%s3534_s1 + $0x2e4] sm:$0xf] %v1838_v41 }
  0xd7   :  { %2393 = vst [vmem:[%s3534_s1 + $0x2e8] sm:$0xf] %v1844_v42  ;;  %2394 = vst [vmem:[%s3534_s1 + $0x2ec] sm:$0xf] %v1850_v43  ;;  %v1856_v44 = vld [vmem:[#allocation0 + $0x5e0] sm:$0xf] }
  0xd8   :  { %v1862_v45 = vld [vmem:[#allocation0 + $0x5e8] sm:$0xf]  ;;  %v1868_v46 = vld [vmem:[#allocation0 + $0x5f0] sm:$0xf]  ;;  %2395 = vst [vmem:[%s3534_s1 + $0x2f0] sm:$0xf] %v1856_v44 }
  0xd9   :  { %2396 = vst [vmem:[%s3534_s1 + $0x2f4] sm:$0xf] %v1862_v45  ;;  %2397 = vst [vmem:[%s3534_s1 + $0x2f8] sm:$0xf] %v1868_v46  ;;  %v1874_v47 = vld [vmem:[#allocation0 + $0x5f8] sm:$0xf] }
  0xda   :  { %v1880_v48 = vld [vmem:[#allocation0 + $0x600] sm:$0xf]  ;;  %v1886_v49 = vld [vmem:[#allocation0 + $0x608] sm:$0xf]  ;;  %2398 = vst [vmem:[%s3534_s1 + $0x2fc] sm:$0xf] %v1874_v47 }
  0xdb   :  { %2399 = vst [vmem:[%s3534_s1 + $0x300] sm:$0xf] %v1880_v48  ;;  %2400 = vst [vmem:[%s3534_s1 + $0x304] sm:$0xf] %v1886_v49  ;;  %v1892_v50 = vld [vmem:[#allocation0 + $0x610] sm:$0xf] }
  0xdc   :  { %v1898_v51 = vld [vmem:[#allocation0 + $0x618] sm:$0xf]  ;;  %2401 = vst [vmem:[%s3534_s1 + $0x308] sm:$0xf] %v1892_v50 }
  0xdd   :  { %2402 = vst [vmem:[%s3534_s1 + $0x30c] sm:$0xf] %v1898_v51 }

// kernel: lenet_forward.1
= control target key start
LH: loop header
LB: loop body
LE: loop exit
PB: predicated region body
PF: predicated region fallthrough
CT: control target
= control target key end

     0   :  { %vm116_vm0 = vcmask 130048   ;;  %s6688_s15 = smov 80   ;;  %s6689_s16 = smov 104   ;;  %vm2228_vm1 = vcmask 195584   ;;  %vm4553_vm2 = vcmask 261248   ;;  %vm4559_vm3 = vcmask 392448   ;;  %s8507_s1 = inlined_call_operand.vmem [shape: f32[4,16,96], index: 1, kind: input, shape index: {}]   ;;  %s8508_s0 = inlined_call_operand.vmem [shape: f32[7,7,8,16], index: 0, kind: input, shape index: {}]   ;;  %s8509_s3 = inlined_call_operand.vmem [shape: f32[9,24,64], index: 3, kind: input, shape index: {}]   ;;  %s8510_s2 = inlined_call_operand.vmem [shape: f32[1,24], index: 2, kind: input, shape index: {}]   ;;  %s8511_s4 = inlined_call_operand.vmem [shape: f32[1,16], index: 4, kind: input, shape index: {}]   ;;  %s8512_s5 = inlined_call_operand.vmem [shape: f32[256,120], index: 5, kind: input, shape index: {}]   ;;  %s8513_s7 = inlined_call_operand.vmem [shape: f32[120,84], index: 7, kind: input, shape index: {}]   ;;  %s8514_s9 = inlined_call_operand.vmem [shape: f32[84,10], index: 9, kind: input, shape index: {}]   ;;  %s8515_s6 = inlined_call_operand.vmem [shape: f32[1,120], index: 6, kind: input, shape index: {}]   ;;  %s8516_s8 = inlined_call_operand.vmem [shape: f32[1,84], index: 8, kind: input, shape index: {}]   ;;  %s8517_s10 = inlined_call_operand.vmem [shape: f32[1,10], index: 10, kind: input, shape index: {}]   ;;  %s8518_s11 = inlined_call_operand.vmem [shape: f32[8,10], index: 11, kind: output, shape index: {}]  }
   0x1   :  { %v4974_v0 = vld [vmem:[%s8507_s1 + $0x10] sm:$0xff]  ;;  %v4975_v1 = vld [vmem:[%s8507_s1 + $0x18] sm:$0xff]  ;;  %v6769_v2 = vld [vmem:[%s8508_s0 + $0x8] sm:$0xff]  ;;  %s6692_s29 = smov 112   ;;  %s6693_s13 = smov 16   ;;  %vm4565_vm4 = vcmask 523648  }
   0x2   :  { %v6318_v3 = vpack.c.bf16 %v4975_v1, %v4974_v0  ;;  %5762 = vmatprep.mubr.msk.f32.mxu0 %vm116_vm0, %v6769_v2  ;;  %v74_v4 = vld [vmem:[%s8507_s1] sm:$0xff]  ;;  %v75_v5 = vld [vmem:[%s8507_s1 + $0x8] sm:$0xff]  ;;  %v6782_v7 = vld [vmem:[%s8508_s0 + $0x10] sm:$0xff]  ;;  %s6694_s21 = smov 48   ;;  %s6696_s19 = smov 64   ;;  %vm4571_vm5 = vcmask 654848  }
   0x3   :  { %v6322_v6 = vpack.c.bf16 %v75_v5, %v74_v4  ;;  %v6787_v8 = vld [vmem:[%s8508_s0 + $0x18] sm:$0xff]  ;;  %v6796_v9 = vld [vmem:[%s8508_s0 + $0x20] sm:$0xff]  ;;  %v6801_v10 = vld [vmem:[%s8508_s0 + $0x28] sm:$0xff]  ;;  %vm4577_vm6 = vcmask 786048   ;;  %vm4583_vm7 = vcmask 917248   ;;  %vm4589_vm8 = vcmask 1048448  }
   0x4   :  { %6319 = vmatprep.subr.bf16.mxu0 %v6318_v3  ;;  %6438 = vmatprep.subr.bf16.mxu1 %v6318_v3  ;;  %v4943_v11 = vld [vmem:[%s8508_s0 + $0x30] sm:$0xff]  ;;  %v5084_v12 = vld [vmem:[%s8507_s1 + $0x20] sm:$0xff]  ;;  %v5085_v13 = vld [vmem:[%s8507_s1 + $0x28] sm:$0xff]  ;;  %vm6699_vm9 = vmmov 0   ;;  %vm4761_vm10 = vcmask 982016   ;;  %vm4858_vm11 = vcmask 1043456  }
   0x5   :  { %6321 = vmatpush3.bf16.msra.mxu0 %v6318_v3  ;;  %6439 = vmatpush3.bf16.msra.mxu1 %v6318_v3  ;;  %v6819_v14 = vld [vmem:[%s8508_s0 + $0x40] sm:$0xff]  ;;  %v6821_v15 = vpack.c.bf16 %v5085_v13, %v5084_v12  ;;  %v6828_v16 = vld [vmem:[%s8508_s0 + $0x130] sm:$0xff]  ;;  %v6835_v17 = vld [vmem:[%s8508_s0 + $0x48] sm:$0xff]  ;;  %vm4854_vm12 = vcmask 687104   ;;  %vm4932_vm13 = vcmask 80896  }
   0x6   :  { %6323 = vmatprep.subr.bf16.mxu0 %v6322_v6  ;;  %v6840_v18 = vld [vmem:[%s8508_s0 + $0x138] sm:$0xff]  ;;  %5810 = vmatprep.mubr.msk.f32.mxu1 %vm116_vm0, %v6828_v16  ;;  %v6847_v19 = vld [vmem:[%s8508_s0 + $0x50] sm:$0xff]  ;;  %v6852_v20 = vld [vmem:[%s8508_s0 + $0x140] sm:$0xff] }
   0x7   :  { %v6865_v21 = vld [vmem:[%s8508_s0 + $0x58] sm:$0xff]  ;;  %v6870_v22 = vld [vmem:[%s8508_s0 + $0x60] sm:$0xff]  ;;  %v6879_v23 = vld [vmem:[%s8508_s0 + $0x68] sm:$0xff] }
   0x8   :  { %5763 = vmatmul.mubr.msk.f32.vlgmr.msra.gmra.mrb[0].mxu0 %vm116_vm0, %v6782_v7  ;;  %5811 = vmatmul.mubr.msk.f32.vlgmr.msra.gmra.mrb[0].mxu1 %vm116_vm0, %v6840_v18  ;;  %v6884_v24 = vld [vmem:[%s8508_s0 + $0x78] sm:$0xff]  ;;  %v6893_v25 = vld [vmem:[%s8508_s0 + $0x80] sm:$0xff]  ;;  %v6898_v26 = vld [vmem:[%s8508_s0 + $0x88] sm:$0xff] }
   0x9   :  { %6325 = vmatpush3.bf16.msra.mxu0 %v6322_v6  ;;  %5765 = vmatprep.mubr.msk.f32.mxu0 %vm116_vm0, %v6787_v8  ;;  %v6907_v27 = vld [vmem:[%s8508_s0 + $0x90] sm:$0xff]  ;;  %v6912_v28 = vld [vmem:[%s8508_s0 + $0x98] sm:$0xff]  ;;  %v6921_v29 = vld [vmem:[%s8508_s0 + $0xa0] sm:$0xff] }
   0xa   :  { %6327 = vmatprep.subr.bf16.mxu0 %v6821_v15  ;;  %5813 = vmatprep.mubr.msk.f32.mxu1 %vm116_vm0, %v6852_v20  ;;  %v6926_v30 = vld [vmem:[%s8508_s0 + $0xb0] sm:$0xff]  ;;  %v6935_v31 = vld [vmem:[%s8508_s0 + $0xb8] sm:$0xff]  ;;  %v6940_v32 = vld [vmem:[%s8508_s0 + $0xc0] sm:$0xff] }
   0xb   :  { %v6949_v33 = vld [vmem:[%s8508_s0 + $0xc8] sm:$0xff]  ;;  %v6954_v34 = vld [vmem:[%s8508_s0 + $0xd0] sm:$0xff]  ;;  %v6963_v35 = vld [vmem:[%s8508_s0 + $0xd8] sm:$0xff] }
   0xc   :  { %5766 = vmatmul.mubr.msk.f32.gmra.mrb[2].mxu0 %vm116_vm0, %v6796_v9  ;;  %v6968_v36 = vld [vmem:[%s8508_s0 + $0xe8] sm:$0xff]  ;;  %v6977_v37 = vld [vmem:[%s8508_s0 + $0xf0] sm:$0xff]  ;;  %v6982_v38 = vld [vmem:[%s8508_s0 + $0xf8] sm:$0xff] }
   0xd   :  { %5768 = vmatprep.mubr.msk.f32.mxu0 %vm116_vm0, %v6801_v10  ;;  %v6991_v39 = vld [vmem:[%s8508_s0 + $0x100] sm:$0xff]  ;;  %v6996_v40 = vld [vmem:[%s8508_s0 + $0x108] sm:$0xff]  ;;  %v7005_v41 = vld [vmem:[%s8508_s0 + $0x110] sm:$0xff] }
   0xe   :  { %v7010_v42 = vld [vmem:[%s8508_s0 + $0x120] sm:$0xff]  ;;  %v7019_v43 = vld [vmem:[%s8508_s0 + $0x128] sm:$0xff]  ;;  %v5158_v45 = vld [vmem:[%s8507_s1 + $0x30] sm:$0xff] }
   0xf   :  { %v38_v44 = vld [vmem:[%s8508_s0] sm:$0xff]  ;;  %v5159_v46 = vld [vmem:[%s8507_s1 + $0x38] sm:$0xff]  ;;  %v50_v49 = vld [vmem:[%s8508_s0 + $0x70] sm:$0xff]  ;;  %s6695_s1 = smov 32  }
  0x10   :  { %5769 = vmatmul.mubr.msk.f32.gmra.mrb[4].mxu0 %vm116_vm0, %v4943_v11  ;;  %v6330_v47 = vpack.c.bf16 %v5159_v46, %v5158_v45  ;;  %v44_v48 = vld [vmem:[%s8508_s0 + $0x38] sm:$0xff]  ;;  %v56_v50 = vld [vmem:[%s8508_s0 + $0xa8] sm:$0xff]  ;;  %v62_v51 = vld [vmem:[%s8508_s0 + $0xe0] sm:$0xff] }
  0x11   :  { %5771 = vmatprep.mubr.msk.f32.mxu0 %vm116_vm0, %v6819_v14  ;;  %v68_v52 = vld [vmem:[%s8508_s0 + $0x118] sm:$0xff]  ;;  %v7118_v53 = vld [vmem:[%s8508_s0 + $0x148] sm:$0xff]  ;;  %v5078_v54 = vld [vmem:[%s8508_s0 + $0x150] sm:$0xff] }
  0x12   :  { %5814 = vmatmul.mubr.msk.f32.gmra.mrb[2].mxu1 %vm116_vm0, %v7118_v53  ;;  %v5079_v55 = vld [vmem:[%s8508_s0 + $0x158] sm:$0xff]  ;;  %v5080_v56 = vld [vmem:[%s8508_s0 + $0x160] sm:$0xff]  ;;  %v5081_v57 = vld [vmem:[%s8508_s0 + $0x168] sm:$0xff] }
  0x13   :  { %v5082_v58 = vld [vmem:[%s8508_s0 + $0x170] sm:$0xff]  ;;  %v5083_v59 = vld [vmem:[%s8508_s0 + $0x178] sm:$0xff]  ;;  %v5157_v60 = vld [vmem:[%s8508_s0 + $0x180] sm:$0xff]  ;;  %s6690_s0 = smov 56  }
  0x14   :  { %5772 = vmatmul.mubr.msk.f32.gmra.mrb[6].mxu0 %vm116_vm0, %v6835_v17  ;;  %v2281_v45 = vld [vmem:[%s8509_s3] sm:$0xff]  ;;  %v2282_v46 = vld [vmem:[%s8509_s3 + $0x8] sm:$0xff] }
  0x15   :  { %5774 = vmatprep.mubr.msk.f32.mxu0 %vm116_vm0, %v6847_v19 }
  0x18   :  { %5775 = vmatmul.mubr.msk.f32.gmra.mrb[8].mxu0 %vm116_vm0, %v6865_v21 }
  0x19   :  { %5777 = vmatprep.mubr.msk.f32.mxu0 %vm116_vm0, %v6870_v22 }
  0x1c   :  { %5778 = vmatmul.mubr.msk.f32.gmra.mrb[10].mxu0 %vm116_vm0, %v6879_v23 }
  0x1d   :  { %5780 = vmatprep.mubr.msk.f32.mxu0 %vm116_vm0, %v6884_v24 }
  0x20   :  { %5781 = vmatmul.mubr.msk.f32.gmra.mrb[12].mxu0 %vm116_vm0, %v6893_v25 }
  0x21   :  { %5783 = vmatprep.mubr.msk.f32.mxu0 %vm116_vm0, %v6898_v26 }
  0x24   :  { %5784 = vmatmul.mubr.msk.f32.gmra.mrb[14].mxu0 %vm116_vm0, %v6907_v27 }
  0x25   :  { %5786 = vmatprep.mubr.msk.f32.mxu0 %vm116_vm0, %v6912_v28 }
  0x28   :  { %5787 = vmatmul.mubr.msk.f32.gmra.mrb[16].mxu0 %vm116_vm0, %v6921_v29 }
  0x29   :  { %5789 = vmatprep.mubr.msk.f32.mxu0 %vm116_vm0, %v6926_v30 }
  0x2c   :  { %5790 = vmatmul.mubr.msk.f32.gmra.mrb[18].mxu0 %vm116_vm0, %v6935_v31 }
  0x2d   :  { %5792 = vmatprep.mubr.msk.f32.mxu0 %vm116_vm0, %v6940_v32 }
  0x30   :  { %5793 = vmatmul.mubr.msk.f32.gmra.mrb[20].mxu0 %vm116_vm0, %v6949_v33 }
  0x31   :  { %5795 = vmatprep.mubr.msk.f32.mxu0 %vm116_vm0, %v6954_v34 }
  0x34   :  { %5796 = vmatmul.mubr.msk.f32.gmra.mrb[22].mxu0 %vm116_vm0, %v6963_v35 }
  0x35   :  { %5798 = vmatprep.mubr.msk.f32.mxu0 %vm116_vm0, %v6968_v36 }
  0x38   :  { %5799 = vmatmul.mubr.msk.f32.gmra.mrb[24].mxu0 %vm116_vm0, %v6977_v37 }
  0x39   :  { %5801 = vmatprep.mubr.msk.f32.mxu0 %vm116_vm0, %v6982_v38 }
  0x3c   :  { %5802 = vmatmul.mubr.msk.f32.gmra.mrb[26].mxu0 %vm116_vm0, %v6991_v39 }
  0x3d   :  { %5804 = vmatprep.mubr.msk.f32.mxu0 %vm116_vm0, %v6996_v40 }
  0x40   :  { %5805 = vmatmul.mubr.msk.f32.gmra.mrb[28].mxu0 %vm116_vm0, %v7005_v41 }
  0x41   :  { %5807 = vmatprep.mubr.msk.f32.mxu0 %vm116_vm0, %v7010_v42 }
  0x44   :  { %5808 = vmatmul.mubr.msk.f32.gmra.mrb[30].mxu0 %vm116_vm0, %v7019_v43 }
  0x45   :  { %5820 = vmatprep.mubr.msk.f32.mxu0 %vm116_vm0, %v38_v44 }
  0x48   :  { %5821 = vmatmul.mubr.msk.f32.vlgmr.msra.gmra.mrb[0].mxu0 %vm116_vm0, %v6769_v2 }
  0x49   :  { %6329 = vmatpush3.bf16.msra.mxu0 %v6821_v15  ;;  %5823 = vmatprep.mubr.msk.f32.mxu0 %vm116_vm0, %v6782_v7 }
  0x4a   :  { %6331 = vmatprep.subr.bf16.mxu0 %v6330_v47 }
  0x4c   :  { %5824 = vmatmul.mubr.msk.f32.gmra.mrb[2].mxu0 %vm116_vm0, %v6787_v8 }
  0x4d   :  { %5826 = vmatprep.mubr.msk.f32.mxu0 %vm116_vm0, %v6796_v9  ;;  %v5197_v9 = vld [vmem:[%s8509_s3 + $0x18] sm:$0xff] }
  0x50   :  { %5827 = vmatmul.mubr.msk.f32.gmra.mrb[4].mxu0 %vm116_vm0, %v6801_v10  ;;  %v5198_v10 = vld [vmem:[%s8509_s3 + $0x20] sm:$0xff] }
  0x51   :  { %5829 = vmatprep.mubr.msk.f32.mxu0 %vm116_vm0, %v44_v48  ;;  %v6334_v11 = vpack.c.bf16 %v5198_v10, %v5197_v9 }
  0x53   :  { %6335 = vmatprep.subr.bf16.mxu1 %v6334_v11 }
  0x54   :  { %5830 = vmatmul.mubr.msk.f32.gmra.mrb[6].mxu0 %vm116_vm0, %v6819_v14  ;;  %6337 = vmatpush3.bf16.msra.mxu1 %v6334_v11 }
  0x55   :  { %5832 = vmatprep.mubr.msk.f32.mxu0 %vm116_vm0, %v6835_v17 }
  0x58   :  { %5833 = vmatmul.mubr.msk.f32.gmra.mrb[8].mxu0 %vm116_vm0, %v6847_v19 }
  0x59   :  { %5835 = vmatprep.mubr.msk.f32.mxu0 %vm116_vm0, %v6865_v21 }
  0x5c   :  { %5836 = vmatmul.mubr.msk.f32.gmra.mrb[10].mxu0 %vm116_vm0, %v6870_v22 }
  0x5d   :  { %5838 = vmatprep.mubr.msk.f32.mxu0 %vm116_vm0, %v50_v49 }
  0x60   :  { %5839 = vmatmul.mubr.msk.f32.gmra.mrb[12].mxu0 %vm116_vm0, %v6884_v24 }
  0x61   :  { %5841 = vmatprep.mubr.msk.f32.mxu0 %vm116_vm0, %v6893_v25 }
  0x64   :  { %5842 = vmatmul.mubr.msk.f32.gmra.mrb[14].mxu0 %vm116_vm0, %v6898_v26 }
  0x65   :  { %5844 = vmatprep.mubr.msk.f32.mxu0 %vm116_vm0, %v6907_v27 }
  0x68   :  { %5845 = vmatmul.mubr.msk.f32.gmra.mrb[16].mxu0 %vm116_vm0, %v6912_v28 }
  0x69   :  { %5847 = vmatprep.mubr.msk.f32.mxu0 %vm116_vm0, %v56_v50 }
  0x6c   :  { %5848 = vmatmul.mubr.msk.f32.gmra.mrb[18].mxu0 %vm116_vm0, %v6926_v30 }
  0x6d   :  { %5850 = vmatprep.mubr.msk.f32.mxu0 %vm116_vm0, %v6935_v31 }
  0x70   :  { %5851 = vmatmul.mubr.msk.f32.gmra.mrb[20].mxu0 %vm116_vm0, %v6940_v32 }
  0x71   :  { %5853 = vmatprep.mubr.msk.f32.mxu0 %vm116_vm0, %v6949_v33 }
  0x74   :  { %5854 = vmatmul.mubr.msk.f32.gmra.mrb[22].mxu0 %vm116_vm0, %v6954_v34 }
  0x75   :  { %5856 = vmatprep.mubr.msk.f32.mxu0 %vm116_vm0, %v62_v51 }
  0x78   :  { %5857 = vmatmul.mubr.msk.f32.gmra.mrb[24].mxu0 %vm116_vm0, %v6968_v36 }
  0x79   :  { %5859 = vmatprep.mubr.msk.f32.mxu0 %vm116_vm0, %v6977_v37 }
  0x7c   :  { %5860 = vmatmul.mubr.msk.f32.gmra.mrb[26].mxu0 %vm116_vm0, %v6982_v38 }
  0x7d   :  { %5862 = vmatprep.mubr.msk.f32.mxu0 %vm116_vm0, %v6991_v39 }
  0x80   :  { %5863 = vmatmul.mubr.msk.f32.gmra.mrb[28].mxu0 %vm116_vm0, %v6996_v40 }
  0x81   :  { %5865 = vmatprep.mubr.msk.f32.mxu0 %vm116_vm0, %v68_v52 }
  0x84   :  { %5866 = vmatmul.mubr.msk.f32.gmra.mrb[30].mxu0 %vm116_vm0, %v7010_v42 }
  0x85   :  { %5868 = vmatprep.mubr.msk.f32.mxu0 %vm116_vm0, %v7019_v43 }
  0x88   :  { %5869 = vmatmul.mubr.msk.f32.gmra.mrb[32].mxu0 %vm116_vm0, %v6828_v16 }
  0x89   :  { %5871 = vmatprep.mubr.msk.f32.mxu0 %vm116_vm0, %v6840_v18 }
  0x8c   :  { %5872 = vmatmul.mubr.msk.f32.gmra.mrb[34].mxu0 %vm116_vm0, %v6852_v20 }
  0x8d   :  { %5878 = vmatprep.mubr.msk.f32.mxu0 %vm116_vm0, %v44_v48 }
  0x90   :  { %5879 = vmatmul.mubr.msk.f32.vlgmr.msra.gmra.mrb[0].mxu0 %vm116_vm0, %v6819_v14 }
  0x91   :  { %6333 = vmatpush3.bf16.msra.mxu0 %v6330_v47  ;;  %5881 = vmatprep.mubr.msk.f32.mxu0 %vm116_vm0, %v6835_v17  ;;  %v7444_v47 = vpack.c.bf16 %v2282_v46, %v2281_v45 }
  0x94   :  { %5882 = vmatmul.mubr.msk.f32.gmra.mrb[2].mxu0 %vm116_vm0, %v6847_v19 }
  0x95   :  { %5884 = vmatprep.mubr.msk.f32.mxu0 %vm116_vm0, %v6865_v21 }
  0x98   :  { %5885 = vmatmul.mubr.msk.f32.gmra.mrb[4].mxu0 %vm116_vm0, %v6870_v22 }
  0x99   :  { %5887 = vmatprep.mubr.msk.f32.mxu0 %vm116_vm0, %v50_v49 }
  0x9c   :  { %5888 = vmatmul.mubr.msk.f32.gmra.mrb[6].mxu0 %vm116_vm0, %v6884_v24 }
  0x9d   :  { %5890 = vmatprep.mubr.msk.f32.mxu0 %vm116_vm0, %v6893_v25 }
  0xa0   :  { %5891 = vmatmul.mubr.msk.f32.gmra.mrb[8].mxu0 %vm116_vm0, %v6898_v26 }
  0xa1   :  { %5893 = vmatprep.mubr.msk.f32.mxu0 %vm116_vm0, %v6907_v27 }
  0xa4   :  { %5894 = vmatmul.mubr.msk.f32.gmra.mrb[10].mxu0 %vm116_vm0, %v6912_v28 }
  0xa5   :  { %5896 = vmatprep.mubr.msk.f32.mxu0 %vm116_vm0, %v56_v50 }
  0xa8   :  { %5897 = vmatmul.mubr.msk.f32.gmra.mrb[12].mxu0 %vm116_vm0, %v6926_v30 }
  0xa9   :  { %5899 = vmatprep.mubr.msk.f32.mxu0 %vm116_vm0, %v6935_v31 }
  0xac   :  { %5900 = vmatmul.mubr.msk.f32.gmra.mrb[14].mxu0 %vm116_vm0, %v6940_v32 }
  0xad   :  { %5902 = vmatprep.mubr.msk.f32.mxu0 %vm116_vm0, %v6949_v33 }
  0xb0   :  { %5903 = vmatmul.mubr.msk.f32.gmra.mrb[16].mxu0 %vm116_vm0, %v6954_v34 }
  0xb1   :  { %5905 = vmatprep.mubr.msk.f32.mxu0 %vm116_vm0, %v62_v51 }
  0xb4   :  { %5906 = vmatmul.mubr.msk.f32.gmra.mrb[18].mxu0 %vm116_vm0, %v6968_v36 }
  0xb5   :  { %5908 = vmatprep.mubr.msk.f32.mxu0 %vm116_vm0, %v6977_v37 }
  0xb8   :  { %5909 = vmatmul.mubr.msk.f32.gmra.mrb[20].mxu0 %vm116_vm0, %v6982_v38 }
  0xb9   :  { %5911 = vmatprep.mubr.msk.f32.mxu0 %vm116_vm0, %v6991_v39 }
  0xbc   :  { %5912 = vmatmul.mubr.msk.f32.gmra.mrb[22].mxu0 %vm116_vm0, %v6996_v40 }
  0xbd   :  { %5914 = vmatprep.mubr.msk.f32.mxu0 %vm116_vm0, %v68_v52  ;;  %v7495_v52 = vld [vmem:[%s8510_s2] ss:$0 sm:$0xff] }
  0xc0   :  { %5915 = vmatmul.mubr.msk.f32.gmra.mrb[24].mxu0 %vm116_vm0, %v7010_v42 }
  0xc1   :  { %5917 = vmatprep.mubr.msk.f32.mxu0 %vm116_vm0, %v7019_v43 }
  0xc4   :  { %5918 = vmatmul.mubr.msk.f32.gmra.mrb[26].mxu0 %vm116_vm0, %v6828_v16 }
  0xc5   :  { %5920 = vmatprep.mubr.msk.f32.mxu0 %vm116_vm0, %v6840_v18 }
  0xc8   :  { %5921 = vmatmul.mubr.msk.f32.gmra.mrb[28].mxu0 %vm116_vm0, %v6852_v20 }
  0xc9   :  { %5923 = vmatprep.mubr.msk.f32.mxu0 %vm116_vm0, %v5078_v54 }
  0xcc   :  { %5924 = vmatmul.mubr.msk.f32.gmra.mrb[30].mxu0 %vm116_vm0, %v5079_v55 }
  0xcd   :  { %5926 = vmatprep.mubr.msk.f32.mxu0 %vm116_vm0, %v5080_v56 }
  0xd0   :  { %5927 = vmatmul.mubr.msk.f32.gmra.mrb[32].mxu0 %vm116_vm0, %v5081_v57 }
  0xd1   :  { %5929 = vmatprep.mubr.msk.f32.mxu0 %vm116_vm0, %v5082_v58 }
  0xd4   :  { %5930 = vmatmul.mubr.msk.f32.gmra.mrb[34].mxu0 %vm116_vm0, %v5083_v59 }
  0xd5   :  { %5936 = vmatprep.mubr.msk.f32.mxu0 %vm116_vm0, %v6819_v14  ;;  %v5199_v14 = vld [vmem:[%s8509_s3 + $0x28] sm:$0xff] }
  0xd6   :  { %5994 = vmatprep.subr.mxu1 %v5199_v14 }
  0xd7   :  { %5995 = vmatpush3.msra.mxu1 %v5199_v14 }
  0xd8   :  { %5937 = vmatmul.mubr.msk.f32.vlgmr.msra.gmra.mrb[0].mxu0 %vm116_vm0, %v6835_v17  ;;  %6339 = vmatprep.subr.bf16.mxu1 %v7444_v47 }
  0xd9   :  { %5939 = vmatprep.mubr.msk.f32.mxu0 %vm116_vm0, %v6847_v19 }
  0xdb   :  { %v7269_v61 = vpop.f32.mrb[0].mxu1 }
  0xdc   :  { %5940 = vmatmul.mubr.msk.f32.gmra.mrb[2].mxu0 %vm116_vm0, %v6865_v21  ;;  %v7271_v62 = vpop.f32.mrb[1].mxu1 }
  0xdd   :  { %5942 = vmatprep.mubr.msk.f32.mxu0 %vm116_vm0, %v6870_v22 }
  0xe0   :  { %5943 = vmatmul.mubr.msk.f32.gmra.mrb[4].mxu0 %vm116_vm0, %v6879_v23 }
  0xe1   :  { %5945 = vmatprep.mubr.msk.f32.mxu0 %vm116_vm0, %v6884_v24 }
  0xe4   :  { %5946 = vmatmul.mubr.msk.f32.gmra.mrb[6].mxu0 %vm116_vm0, %v6893_v25 }
  0xe5   :  { %5948 = vmatprep.mubr.msk.f32.mxu0 %vm116_vm0, %v6898_v26  ;;  %v7273_v63 = vpop.f32.mrb[2].mxu1 }
  0xe6   :  { %v7275_v0 = vpop.f32.mrb[3].mxu1 }
  0xe8   :  { %5949 = vmatmul.mubr.msk.f32.gmra.mrb[8].mxu0 %vm116_vm0, %v6907_v27 }
  0xe9   :  { %5951 = vmatprep.mubr.msk.f32.mxu0 %vm116_vm0, %v6912_v28 }
  0xec   :  { %5952 = vmatmul.mubr.msk.f32.gmra.mrb[10].mxu0 %vm116_vm0, %v6921_v29 }
  0xed   :  { %5954 = vmatprep.mubr.msk.f32.mxu0 %vm116_vm0, %v6926_v30 }
  0xf0   :  { %5955 = vmatmul.mubr.msk.f32.gmra.mrb[12].mxu0 %vm116_vm0, %v6935_v31 }
  0xf1   :  { %5957 = vmatprep.mubr.msk.f32.mxu0 %vm116_vm0, %v6940_v32 }
  0xf4   :  { %5958 = vmatmul.mubr.msk.f32.gmra.mrb[14].mxu0 %vm116_vm0, %v6949_v33 }
  0xf5   :  { %5960 = vmatprep.mubr.msk.f32.mxu0 %vm116_vm0, %v6954_v34 }
  0xf8   :  { %5961 = vmatmul.mubr.msk.f32.gmra.mrb[16].mxu0 %vm116_vm0, %v6963_v35 }
  0xf9   :  { %5963 = vmatprep.mubr.msk.f32.mxu0 %vm116_vm0, %v6968_v36 }
  0xfc   :  { %5964 = vmatmul.mubr.msk.f32.gmra.mrb[18].mxu0 %vm116_vm0, %v6977_v37 }
  0xfd   :  { %5966 = vmatprep.mubr.msk.f32.mxu0 %vm116_vm0, %v6982_v38 }
 0x100   :  { %5967 = vmatmul.mubr.msk.f32.gmra.mrb[20].mxu0 %vm116_vm0, %v6991_v39 }
 0x101   :  { %5969 = vmatprep.mubr.msk.f32.mxu0 %vm116_vm0, %v6996_v40 }
 0x104   :  { %5970 = vmatmul.mubr.msk.f32.gmra.mrb[22].mxu0 %vm116_vm0, %v7005_v41 }
 0x105   :  { %5972 = vmatprep.mubr.msk.f32.mxu0 %vm116_vm0, %v7010_v42 }
 0x108   :  { %5973 = vmatmul.mubr.msk.f32.gmra.mrb[24].mxu0 %vm116_vm0, %v7019_v43 }
 0x109   :  { %5975 = vmatprep.mubr.msk.f32.mxu0 %vm116_vm0, %v6828_v16 }
 0x10c   :  { %5976 = vmatmul.mubr.msk.f32.gmra.mrb[26].mxu0 %vm116_vm0, %v6840_v18 }
 0x10d   :  { %5978 = vmatprep.mubr.msk.f32.mxu0 %vm116_vm0, %v6852_v20 }
 0x110   :  { %5979 = vmatmul.mubr.msk.f32.gmra.mrb[28].mxu0 %vm116_vm0, %v7118_v53 }
 0x111   :  { %5981 = vmatprep.mubr.msk.f32.mxu0 %vm116_vm0, %v5079_v55 }
 0x114   :  { %5982 = vmatmul.mubr.msk.f32.gmra.mrb[30].mxu0 %vm116_vm0, %v5080_v56 }
 0x115   :  { %5984 = vmatprep.mubr.msk.f32.mxu0 %vm116_vm0, %v5081_v57 }
 0x118   :  { %5985 = vmatmul.mubr.msk.f32.gmra.mrb[32].mxu0 %vm116_vm0, %v5082_v58 }
 0x119   :  { %5987 = vmatprep.mubr.msk.f32.mxu0 %vm116_vm0, %v5083_v59 }
 0x11c   :  { %5988 = vmatmul.mubr.msk.f32.gmra.mrb[34].mxu0 %vm116_vm0, %v5157_v60 }
 0x1ab   :  { %v7277_v1 = vpop.f32.mrb[0].mxu0 }
 0x1ac   :  { %1863 = vrot.lane.b32.xlu1 %v7277_v1, %s6688_s15  ;;  %1719 = vrot.lane.b32.xlu0 %v7277_v1, %s6689_s16  ;;  %v7283_v2 = vpop.f32.mrb[1].mxu0 }
 0x1af   :  { %v7285_v3 = vpop.f32.mrb[2].mxu0 }
 0x1b0   :  { %2007 = vrot.lane.b32.xlu1 %v7277_v1, %s6690_s0  ;;  %1717 = vrot.lane.b32.xlu0 %v7283_v2, %s6689_s16  ;;  %v7291_v4 = vpop.f32.mrb[3].mxu0 }
 0x1b3   :  { %v7293_v5 = vpop.f32.mrb[4].mxu0 }
 0x1b4   :  { %2011 = vrot.lane.b32.xlu1 %v7285_v3, %s6690_s0  ;;  %1723 = vrot.lane.b32.xlu0 %v7285_v3, %s6689_s16  ;;  %v7299_v6 = vpop.f32.mrb[5].mxu0 }
 0x1b7   :  { %v7301_v7 = vpop.f32.mrb[6].mxu0 }
 0x1b8   :  { %1867 = vrot.lane.b32.xlu0 %v7285_v3, %s6688_s15  ;;  %1865 = vrot.lane.b32.xlu1 %v7291_v4, %s6688_s15  ;;  %v7307_v8 = vpop.f32.mrb[7].mxu0 }
 0x1bb   :  { %v7315_v12 = vpop.f32.mrb[8].mxu0 }
 0x1bc   :  { %2009 = vrot.lane.b32.xlu1 %v7291_v4, %s6690_s0  ;;  %1721 = vrot.lane.b32.xlu0 %v7291_v4, %s6689_s16  ;;  %v7321_v13 = vpop.f32.mrb[9].mxu0 }
 0x1bf   :  { %v7326_v15 = vpop.f32.mrb[10].mxu0 }
 0x1c0   :  { %1869 = vrot.lane.b32.xlu1 %v7299_v6, %s6688_s15  ;;  %1725 = vrot.lane.b32.xlu0 %v7299_v6, %s6689_s16  ;;  %v7332_v16 = vpop.f32.mrb[11].mxu0 }
 0x1c3   :  { %v7334_v17 = vpop.f32.mrb[12].mxu0 }
 0x1c4   :  { %2013 = vrot.lane.b32.xlu1 %v7299_v6, %s6690_s0  ;;  %1731 = vrot.lane.b32.xlu0 %v7301_v7, %s6689_s16  ;;  %v7340_v18 = vpop.f32.mrb[13].mxu0 }
 0x1c7   :  { %v7342_v19 = vpop.f32.mrb[14].mxu0 }
 0x1c8   :  { %2019 = vrot.lane.b32.xlu1 %v7301_v7, %s6690_s0  ;;  %1875 = vrot.lane.b32.xlu0 %v7301_v7, %s6688_s15  ;;  %v7348_v20 = vpop.f32.mrb[15].mxu0 }
 0x1cb   :  { %v7350_v21 = vpop.f32.mrb[16].mxu0 }
 0x1cc   :  { %2023 = vrot.lane.b32.xlu1 %v7315_v12, %s6690_s0  ;;  %1735 = vrot.lane.b32.xlu0 %v7315_v12, %s6689_s16  ;;  %v7356_v22 = vpop.f32.mrb[17].mxu0 }
 0x1cf   :  { %v7358_v23 = vpop.f32.mrb[18].mxu0 }
 0x1d0   :  { %1879 = vrot.lane.b32.xlu0 %v7315_v12, %s6688_s15  ;;  %1877 = vrot.lane.b32.xlu1 %v7321_v13, %s6688_s15  ;;  %v7364_v24 = vpop.f32.mrb[19].mxu0 }
 0x1d3   :  { %v7366_v25 = vpop.f32.mrb[20].mxu0 }
 0x1d4   :  { %2021 = vrot.lane.b32.xlu1 %v7321_v13, %s6690_s0  ;;  %1733 = vrot.lane.b32.xlu0 %v7321_v13, %s6689_s16  ;;  %v7372_v26 = vpop.f32.mrb[21].mxu0 }
 0x1d7   :  { %v7374_v27 = vpop.f32.mrb[22].mxu0 }
 0x1d8   :  { %1881 = vrot.lane.b32.xlu1 %v7332_v16, %s6688_s15  ;;  %1737 = vrot.lane.b32.xlu0 %v7332_v16, %s6689_s16  ;;  %v7380_v28 = vpop.f32.mrb[23].mxu0 }
 0x1db   :  { %v7382_v29 = vpop.f32.mrb[24].mxu0 }
 0x1dc   :  { %2025 = vrot.lane.b32.xlu1 %v7332_v16, %s6690_s0  ;;  %1743 = vrot.lane.b32.xlu0 %v7334_v17, %s6689_s16  ;;  %v7388_v30 = vpop.f32.mrb[25].mxu0 }
 0x1df   :  { %v7390_v31 = vpop.f32.mrb[26].mxu0 }
 0x1e0   :  { %2031 = vrot.lane.b32.xlu1 %v7334_v17, %s6690_s0  ;;  %1887 = vrot.lane.b32.xlu0 %v7334_v17, %s6688_s15  ;;  %v7396_v32 = vpop.f32.mrb[27].mxu0 }
 0x1e3   :  { %v7398_v33 = vpop.f32.mrb[28].mxu0 }
 0x1e4   :  { %2035 = vrot.lane.b32.xlu1 %v7342_v19, %s6690_s0  ;;  %1747 = vrot.lane.b32.xlu0 %v7342_v19, %s6689_s16  ;;  %v7404_v34 = vpop.f32.mrb[29].mxu0 }
 0x1e7   :  { %v7406_v35 = vpop.f32.mrb[30].mxu0 }
 0x1e8   :  { %1891 = vrot.lane.b32.xlu0 %v7342_v19, %s6688_s15  ;;  %1889 = vrot.lane.b32.xlu1 %v7348_v20, %s6688_s15  ;;  %v7412_v36 = vpop.f32.mrb[31].mxu0 }
 0x1eb   :  { %v5986_v37 = vpop.f32.mrb[32].mxu0 }
 0x1ec   :  { %v7415_v38 = vadd.f32 %v5986_v37, %v7269_v61  ;;  %2033 = vrot.lane.b32.xlu1 %v7348_v20, %s6690_s0  ;;  %1745 = vrot.lane.b32.xlu0 %v7348_v20, %s6689_s16  ;;  %v1626_v39 = vpop.f32.mrb[33].mxu0 }
 0x1ed   :  { %v7422_v40 = vadd.f32 %v1626_v39, %v7271_v62 }
 0x1ef   :  { %v5989_v41 = vpop.f32.mrb[34].mxu0 }
 0x1f0   :  { %v7425_v42 = vadd.f32 %v5989_v41, %v7273_v63  ;;  %1893 = vrot.lane.b32.xlu1 %v7356_v22, %s6688_s15  ;;  %1749 = vrot.lane.b32.xlu0 %v7356_v22, %s6689_s16  ;;  %v1636_v43 = vpop.f32.mrb[35].mxu0 }
 0x1f1   :  { %v7432_v44 = vadd.f32 %v1636_v43, %v7275_v0 }
 0x1f4   :  { %2037 = vrot.lane.b32.xlu1 %v7356_v22, %s6690_s0  ;;  %1755 = vrot.lane.b32.xlu0 %v7358_v23, %s6689_s16 }
 0x1f8   :  { %2043 = vrot.lane.b32.xlu1 %v7358_v23, %s6690_s0  ;;  %1899 = vrot.lane.b32.xlu0 %v7358_v23, %s6688_s15 }
 0x1fc   :  { %2047 = vrot.lane.b32.xlu1 %v7366_v25, %s6690_s0  ;;  %1759 = vrot.lane.b32.xlu0 %v7366_v25, %s6689_s16 }
 0x200   :  { %1903 = vrot.lane.b32.xlu0 %v7366_v25, %s6688_s15  ;;  %1901 = vrot.lane.b32.xlu1 %v7372_v26, %s6688_s15 }
 0x204   :  { %2045 = vrot.lane.b32.xlu1 %v7372_v26, %s6690_s0  ;;  %1757 = vrot.lane.b32.xlu0 %v7372_v26, %s6689_s16 }
 0x208   :  { %1905 = vrot.lane.b32.xlu1 %v7380_v28, %s6688_s15  ;;  %1761 = vrot.lane.b32.xlu0 %v7380_v28, %s6689_s16 }
 0x20c   :  { %1861 = vrot.lane.b32.xlu1 %v7283_v2, %s6688_s15  ;;  %2049 = vrot.lane.b32.xlu0 %v7380_v28, %s6690_s0 }
 0x210   :  { %1729 = vrot.lane.b32.xlu1 %v7307_v8, %s6689_s16  ;;  %2005 = vrot.lane.b32.xlu0 %v7283_v2, %s6690_s0 }
 0x214   :  { %2017 = vrot.lane.b32.xlu1 %v7307_v8, %s6690_s0  ;;  %1873 = vrot.lane.b32.xlu0 %v7307_v8, %s6688_s15 }
 0x218   :  { %1885 = vrot.lane.b32.xlu1 %v7340_v18, %s6688_s15  ;;  %1741 = vrot.lane.b32.xlu0 %v7340_v18, %s6689_s16 }
 0x21c   :  { %1753 = vrot.lane.b32.xlu1 %v7364_v24, %s6689_s16  ;;  %2029 = vrot.lane.b32.xlu0 %v7340_v18, %s6690_s0 }
 0x21e   :  { %v1864_v48 = vpop.permute.xlu1 %1863  ;;  %v1720_v49 = vpop.permute.xlu0 %1719 }
 0x21f   :  { %v1826_v50 = vmax.f32 %v7277_v1, %v1720_v49 }
 0x220   :  { %2041 = vrot.lane.b32.xlu1 %v7364_v24, %s6690_s0  ;;  %1897 = vrot.lane.b32.xlu0 %v7364_v24, %s6688_s15 }
 0x221   :  { %v1970_v51 = vmax.f32 %v1826_v50, %v1864_v48 }
 0x222   :  { %v2008_v53 = vpop.permute.xlu1 %2007  ;;  %v7497_v54 = vpop.permute.xlu0 %1717 }
 0x223   :  { %v2114_v55 = vmax.f32 %v1970_v51, %v2008_v53 }
 0x224   :  { %1871 = vrot.lane.b32.xlu1 %v7293_v5, %s6688_s15  ;;  %1727 = vrot.lane.b32.xlu0 %v7293_v5, %s6689_s16 }
 0x225   :  { %v2157_v56 = vadd.f32 %v7495_v52, %v2114_v55 }
 0x226   :  { %v2012_v57 = vpop.permute.xlu1 %2011  ;;  %v1724_v58 = vpop.permute.xlu0 %1723 }
 0x227   :  { %v2193_v59 = vmax.f32 %v2157_v56, 0.0  ;;  %v1828_v60 = vmax.f32 %v7285_v3, %v1724_v58 }
 0x228   :  { %1739 = vrot.lane.b32.xlu1 %v7326_v15, %s6689_s16  ;;  %2015 = vrot.lane.b32.xlu0 %v7293_v5, %s6690_s0 }
 0x229   :  { %2230 = vst.msk [vmem:[#allocation2 + $0x8] sm:$0xff] %vm2228_vm1, %v2193_v59 }
 0x22a   :  { %v1868_v61 = vpop.permute.xlu0 %1867  ;;  %v1866_v62 = vpop.permute.xlu1 %1865 }
 0x22b   :  { %v1972_v63 = vmax.f32 %v1828_v60, %v1868_v61 }
 0x22c   :  { %2027 = vrot.lane.b32.xlu1 %v7326_v15, %s6690_s0  ;;  %1883 = vrot.lane.b32.xlu0 %v7326_v15, %s6688_s15 }
 0x22d   :  { %v2116_v0 = vmax.f32 %v1972_v63, %v2012_v57 }
 0x22e   :  { %v2010_v1 = vpop.permute.xlu1 %2009  ;;  %v1722_v9 = vpop.permute.xlu0 %1721 }
 0x22f   :  { %v2159_v10 = vadd.f32 %v7495_v52, %v2116_v0  ;;  %v1827_v11 = vmax.f32 %v7291_v4, %v1722_v9  ;;  %v5232_v0 = vld [vmem:[%s8509_s3 + $0x30] sm:$0xff] }
 0x230   :  { %1895 = vrot.lane.b32.xlu1 %v7350_v21, %s6688_s15  ;;  %1751 = vrot.lane.b32.xlu0 %v7350_v21, %s6689_s16  ;;  %v7520_v3 = vld [vmem:[#allocation2 + $0x8] sm:$0xff] }
 0x231   :  { %v2195_v14 = vmax.f32 %v2159_v10, 0.0  ;;  %v1971_v37 = vmax.f32 %v1827_v11, %v1866_v62  ;;  %5996 = vmatprep.mubr.msk.f32.mxu1 %vm2228_vm1, %v7520_v3 }
 0x232   :  { %v1870_v39 = vpop.permute.xlu1 %1869  ;;  %v1726_v41 = vpop.permute.xlu0 %1725 }
 0x233   :  { %2232 = vst.msk [vmem:[#allocation2 + $0x18] sm:$0xff] %vm2228_vm1, %v2195_v14  ;;  %v2115_v43 = vmax.f32 %v1971_v37, %v2010_v1  ;;  %v1829_v4 = vmax.f32 %v7299_v6, %v1726_v41  ;;  %v5233_v1 = vld [vmem:[%s8509_s3 + $0x38] sm:$0xff] }
 0x234   :  { %1763 = vrot.lane.b32.xlu1 %v7374_v27, %s6689_s16  ;;  %2039 = vrot.lane.b32.xlu0 %v7350_v21, %s6690_s0  ;;  %v7568_v41 = vpack.c.bf16 %v5233_v1, %v5232_v0 }
 0x235   :  { %v2158_v45 = vadd.f32 %v7495_v52, %v2115_v43  ;;  %v1973_v46 = vmax.f32 %v1829_v4, %v1870_v39 }
 0x236   :  { %v2014_v48 = vpop.permute.xlu1 %2013  ;;  %v1732_v49 = vpop.permute.xlu0 %1731 }
 0x237   :  { %v2194_v50 = vmax.f32 %v2158_v45, 0.0  ;;  %v2117_v51 = vmax.f32 %v1973_v46, %v2014_v48  ;;  %v1832_v53 = vmax.f32 %v7301_v7, %v1732_v49  ;;  %v2283_v7 = vld [vmem:[%s8509_s3 + $0x10] sm:$0xff] }
 0x238   :  { %2051 = vrot.lane.b32.xlu1 %v7374_v27, %s6690_s0  ;;  %1907 = vrot.lane.b32.xlu0 %v7374_v27, %s6688_s15 }
 0x239   :  { %2231 = vst.msk [vmem:[#allocation2 + $0x10] sm:$0xff] %vm2228_vm1, %v2194_v50  ;;  %v2160_v6 = vadd.f32 %v7495_v52, %v2117_v51 }
 0x23a   :  { %v2020_v55 = vpop.permute.xlu1 %2019  ;;  %v1876_v56 = vpop.permute.xlu0 %1875  ;;  %v7562_v11 = vld [vmem:[#allocation2 + $0x18] sm:$0xff] }
 0x23b   :  { %v2196_v57 = vmax.f32 %v2160_v6, 0.0  ;;  %v1976_v58 = vmax.f32 %v1832_v53, %v1876_v56 }
 0x23c   :  { %1767 = vrot.lane.b32.xlu1 %v7382_v29, %s6689_s16  ;;  %1765 = vrot.lane.b32.xlu0 %v7388_v30, %s6689_s16 }
 0x23d   :  { %2233 = vst.msk [vmem:[#allocation2 + $0x20] sm:$0xff] %vm2228_vm1, %v2196_v57  ;;  %v2120_v59 = vmax.f32 %v1976_v58, %v2020_v55 }
 0x23e   :  { %v2024_v60 = vpop.permute.xlu1 %2023  ;;  %v1736_v61 = vpop.permute.xlu0 %1735 }
 0x23f   :  { %v2163_v62 = vadd.f32 %v7495_v52, %v2120_v59  ;;  %v1834_v10 = vmax.f32 %v7315_v12, %v1736_v61 }
 0x240   :  { %1911 = vrot.lane.b32.xlu1 %v7382_v29, %s6688_s15  ;;  %1909 = vrot.lane.b32.xlu0 %v7388_v30, %s6688_s15  ;;  %v7551_v63 = vld [vmem:[#allocation2 + $0x10] sm:$0xff] }
 0x241   :  { %v2199_v9 = vmax.f32 %v2163_v62, 0.0  ;;  %5997 = vmatmul.mubr.msk.f32.vlgmr.msra.gmra.mrb[4].mxu1 %vm2228_vm1, %v7551_v63 }
 0x242   :  { %5999 = vmatprep.mubr.msk.f32.mxu1 %vm2228_vm1, %v7562_v11  ;;  %v1880_v14 = vpop.permute.xlu0 %1879  ;;  %v1878_v37 = vpop.permute.xlu1 %1877  ;;  %6341 = vmatpush3.bf16.msra.mxu1 %v7444_v47 }
 0x243   :  { %2236 = vst.msk [vmem:[#allocation2 + $0x38] sm:$0xff] %vm2228_vm1, %v2199_v9  ;;  %v1978_v39 = vmax.f32 %v1834_v10, %v1880_v14  ;;  %6024 = vmatprep.subr.mxu1 %v2283_v7 }
 0x244   :  { %2055 = vrot.lane.b32.xlu1 %v7382_v29, %s6690_s0  ;;  %1771 = vrot.lane.b32.xlu0 %v7390_v31, %s6689_s16  ;;  %v7574_v12 = vld [vmem:[#allocation2 + $0x20] sm:$0xff] }
 0x245   :  { %v2122_v43 = vmax.f32 %v1978_v39, %v2024_v60  ;;  %6000 = vmatmul.mubr.msk.f32.gmra.mrb[6].mxu1 %vm2228_vm1, %v7574_v12 }
 0x246   :  { %v2022_v4 = vpop.permute.xlu1 %2021  ;;  %v1734_v47 = vpop.permute.xlu0 %1733  ;;  %6025 = vmatpush3.msra.mxu1 %v2283_v7 }
 0x247   :  { %v2165_v45 = vadd.f32 %v7495_v52, %v2122_v43  ;;  %v1833_v46 = vmax.f32 %v7321_v13, %v1734_v47  ;;  %6343 = vmatprep.subr.bf16.mxu1 %v7568_v41 }
 0x248   :  { %2053 = vrot.lane.b32.xlu1 %v7388_v30, %s6690_s0  ;;  %1769 = vrot.lane.b32.xlu0 %v7396_v32, %s6689_s16 }
 0x249   :  { %v2201_v48 = vmax.f32 %v2165_v45, 0.0  ;;  %v1977_v49 = vmax.f32 %v1833_v46, %v1878_v37 }
 0x24a   :  { %v1882_v50 = vpop.permute.xlu1 %1881  ;;  %v1738_v51 = vpop.permute.xlu0 %1737  ;;  %v7585_v6 = vld [vmem:[#allocation2 + $0x38] sm:$0xff] }
 0x24b   :  { %2238 = vst.msk [vmem:[#allocation2 + $0x48] sm:$0xff] %vm2228_vm1, %v2201_v48  ;;  %v2121_v53 = vmax.f32 %v1977_v49, %v2022_v4  ;;  %v1835_v55 = vmax.f32 %v7332_v16, %v1738_v51  ;;  %6002 = vmatprep.mubr.msk.f32.mxu1 %vm2228_vm1, %v7585_v6 }
 0x24c   :  { %1915 = vrot.lane.b32.xlu1 %v7390_v31, %s6688_s15  ;;  %1913 = vrot.lane.b32.xlu0 %v7396_v32, %s6688_s15 }
 0x24d   :  { %v2164_v13 = vadd.f32 %v7495_v52, %v2121_v53  ;;  %v1979_v56 = vmax.f32 %v1835_v55, %v1882_v50 }
 0x24e   :  { %v2026_v57 = vpop.permute.xlu1 %2025  ;;  %v1744_v58 = vpop.permute.xlu0 %1743 }
 0x24f   :  { %v2200_v59 = vmax.f32 %v2164_v13, 0.0  ;;  %v2123_v60 = vmax.f32 %v1979_v56, %v2026_v57  ;;  %v1838_v61 = vmax.f32 %v7334_v17, %v1744_v58 }
 0x250   :  { %2059 = vrot.lane.b32.xlu1 %v7390_v31, %s6690_s0  ;;  %2057 = vrot.lane.b32.xlu0 %v7396_v32, %s6690_s0 }
 0x251   :  { %2237 = vst.msk [vmem:[#allocation2 + $0x40] sm:$0xff] %vm2228_vm1, %v2200_v59  ;;  %v2166_v16 = vadd.f32 %v7495_v52, %v2123_v60 }
 0x252   :  { %v2032_v62 = vpop.permute.xlu1 %2031  ;;  %v1888_v7 = vpop.permute.xlu0 %1887  ;;  %v7618_v4 = vld [vmem:[#allocation2 + $0x48] sm:$0xff] }
 0x253   :  { %v2202_v0 = vmax.f32 %v2166_v16, 0.0  ;;  %v1982_v1 = vmax.f32 %v1838_v61, %v1888_v7 }
 0x254   :  { %1917 = vrot.lane.b32.xlu1 %v7404_v34, %s6688_s15  ;;  %1773 = vrot.lane.b32.xlu0 %v7404_v34, %s6689_s16 }
 0x255   :  { %2239 = vst.msk [vmem:[#allocation2 + $0x50] sm:$0xff] %vm2228_vm1, %v2202_v0  ;;  %v2126_v9 = vmax.f32 %v1982_v1, %v2032_v62 }
 0x256   :  { %v2036_v10 = vpop.permute.xlu1 %2035  ;;  %v1748_v14 = vpop.permute.xlu0 %1747 }
 0x257   :  { %v2169_v37 = vadd.f32 %v7495_v52, %v2126_v9  ;;  %v1840_v43 = vmax.f32 %v7342_v19, %v1748_v14 }
 0x258   :  { %1775 = vrot.lane.b32.xlu1 %v7398_v33, %s6689_s16  ;;  %2061 = vrot.lane.b32.xlu0 %v7404_v34, %s6690_s0  ;;  %v7613_v17 = vld [vmem:[#allocation2 + $0x40] sm:$0xff] }
 0x259   :  { %v2205_v39 = vmax.f32 %v2169_v37, 0.0  ;;  %6003 = vmatmul.mubr.msk.f32.gmra.mrb[8].mxu1 %vm2228_vm1, %v7613_v17 }
 0x25a   :  { %6005 = vmatprep.mubr.msk.f32.mxu1 %vm2228_vm1, %v7618_v4  ;;  %v1892_v47 = vpop.permute.xlu0 %1891  ;;  %v1890_v45 = vpop.permute.xlu1 %1889 }
 0x25b   :  { %2242 = vst.msk [vmem:[#allocation2 + $0x68] sm:$0xff] %vm2228_vm1, %v2205_v39  ;;  %v1984_v46 = vmax.f32 %v1840_v43, %v1892_v47 }
 0x25c   :  { %2063 = vrot.lane.b32.xlu1 %v7398_v33, %s6690_s0  ;;  %1919 = vrot.lane.b32.xlu0 %v7398_v33, %s6688_s15  ;;  %v7627_v19 = vld [vmem:[#allocation2 + $0x50] sm:$0xff] }
 0x25d   :  { %v2128_v48 = vmax.f32 %v1984_v46, %v2036_v10  ;;  %6006 = vmatmul.mubr.msk.f32.gmra.mrb[10].mxu1 %vm2228_vm1, %v7627_v19 }
 0x25e   :  { %v2034_v49 = vpop.permute.xlu1 %2033  ;;  %v1746_v50 = vpop.permute.xlu0 %1745 }
 0x25f   :  { %v2171_v51 = vadd.f32 %v7495_v52, %v2128_v48  ;;  %v1839_v53 = vmax.f32 %v7348_v20, %v1746_v50 }
 0x260   :  { %1779 = vrot.lane.b32.xlu1 %v7406_v35, %s6689_s16  ;;  %1777 = vrot.lane.b32.xlu0 %v7412_v36, %s6689_s16 }
 0x261   :  { %v2207_v55 = vmax.f32 %v2171_v51, 0.0  ;;  %v1983_v13 = vmax.f32 %v1839_v53, %v1890_v45 }
 0x262   :  { %v1894_v56 = vpop.permute.xlu1 %1893  ;;  %v1750_v57 = vpop.permute.xlu0 %1749  ;;  %v7637_v58 = vld [vmem:[#allocation2 + $0x68] sm:$0xff] }
 0x263   :  { %2244 = vst.msk [vmem:[#allocation2 + $0x78] sm:$0xff] %vm2228_vm1, %v2207_v55  ;;  %v2127_v59 = vmax.f32 %v1983_v13, %v2034_v49  ;;  %v1841_v60 = vmax.f32 %v7356_v22, %v1750_v57  ;;  %6008 = vmatprep.mubr.msk.f32.mxu1 %vm2228_vm1, %v7637_v58 }
 0x264   :  { %1923 = vrot.lane.b32.xlu1 %v7406_v35, %s6688_s15  ;;  %1921 = vrot.lane.b32.xlu0 %v7412_v36, %s6688_s15 }
 0x265   :  { %v2170_v20 = vadd.f32 %v7495_v52, %v2127_v59  ;;  %v1985_v16 = vmax.f32 %v1841_v60, %v1894_v56 }
 0x266   :  { %v2038_v61 = vpop.permute.xlu1 %2037  ;;  %v1756_v62 = vpop.permute.xlu0 %1755 }
 0x267   :  { %v2206_v7 = vmax.f32 %v2170_v20, 0.0  ;;  %v2129_v0 = vmax.f32 %v1985_v16, %v2038_v61  ;;  %v1844_v1 = vmax.f32 %v7358_v23, %v1756_v62 }
 0x268   :  { %2067 = vrot.lane.b32.xlu1 %v7406_v35, %s6690_s0  ;;  %1783 = vrot.lane.b32.xlu0 %v7415_v38, %s6689_s16 }
 0x269   :  { %2243 = vst.msk [vmem:[#allocation2 + $0x70] sm:$0xff] %vm2228_vm1, %v2206_v7  ;;  %v2172_v22 = vadd.f32 %v7495_v52, %v2129_v0 }
 0x26a   :  { %v2044_v9 = vpop.permute.xlu1 %2043  ;;  %v1900_v10 = vpop.permute.xlu0 %1899  ;;  %v7670_v49 = vld [vmem:[#allocation2 + $0x78] sm:$0xff] }
 0x26b   :  { %v2208_v14 = vmax.f32 %v2172_v22, 0.0  ;;  %v1988_v37 = vmax.f32 %v1844_v1, %v1900_v10  ;;  %v1825_v10 = vmax.f32 %v7283_v2, %v7497_v54 }
 0x26c   :  { %2065 = vrot.lane.b32.xlu1 %v7412_v36, %s6690_s0  ;;  %1781 = vrot.lane.b32.xlu0 %v7422_v40, %s6689_s16 }
 0x26d   :  { %2245 = vst.msk [vmem:[#allocation2 + $0x80] sm:$0xff] %vm2228_vm1, %v2208_v14  ;;  %v2132_v39 = vmax.f32 %v1988_v37, %v2044_v9 }
 0x26e   :  { %v2048_v43 = vpop.permute.xlu1 %2047  ;;  %v1760_v47 = vpop.permute.xlu0 %1759 }
 0x26f   :  { %v2175_v45 = vadd.f32 %v7495_v52, %v2132_v39  ;;  %v1846_v48 = vmax.f32 %v7366_v25, %v1760_v47 }
 0x270   :  { %1927 = vrot.lane.b32.xlu1 %v7415_v38, %s6688_s15  ;;  %1925 = vrot.lane.b32.xlu0 %v7422_v40, %s6688_s15  ;;  %v7665_v23 = vld [vmem:[#allocation2 + $0x70] sm:$0xff] }
 0x271   :  { %v2211_v46 = vmax.f32 %v2175_v45, 0.0  ;;  %6009 = vmatmul.mubr.msk.f32.gmra.mrb[12].mxu1 %vm2228_vm1, %v7665_v23 }
 0x272   :  { %6011 = vmatprep.mubr.msk.f32.mxu1 %vm2228_vm1, %v7670_v49  ;;  %v1904_v50 = vpop.permute.xlu0 %1903  ;;  %v1902_v51 = vpop.permute.xlu1 %1901 }
 0x273   :  { %2248 = vst.msk [vmem:[#allocation2 + $0x98] sm:$0xff] %vm2228_vm1, %v2211_v46  ;;  %v1990_v53 = vmax.f32 %v1846_v48, %v1904_v50 }
 0x274   :  { %2071 = vrot.lane.b32.xlu1 %v7415_v38, %s6690_s0  ;;  %2069 = vrot.lane.b32.xlu0 %v7422_v40, %s6690_s0  ;;  %v7679_v25 = vld [vmem:[#allocation2 + $0x80] sm:$0xff] }
 0x275   :  { %v2134_v55 = vmax.f32 %v1990_v53, %v2048_v43  ;;  %6012 = vmatmul.mubr.msk.f32.gmra.mrb[14].mxu1 %vm2228_vm1, %v7679_v25 }
 0x276   :  { %v2046_v13 = vpop.permute.xlu1 %2045  ;;  %v1758_v56 = vpop.permute.xlu0 %1757 }
 0x277   :  { %v2177_v57 = vadd.f32 %v7495_v52, %v2134_v55  ;;  %v1845_v59 = vmax.f32 %v7372_v26, %v1758_v56 }
 0x278   :  { %1929 = vrot.lane.b32.xlu1 %v7432_v44, %s6688_s15  ;;  %1785 = vrot.lane.b32.xlu0 %v7432_v44, %s6689_s16 }
 0x279   :  { %v2213_v60 = vmax.f32 %v2177_v57, 0.0  ;;  %v1989_v20 = vmax.f32 %v1845_v59, %v1902_v51 }
 0x27a   :  { %v1906_v16 = vpop.permute.xlu1 %1905  ;;  %v1762_v61 = vpop.permute.xlu0 %1761  ;;  %v7689_v62 = vld [vmem:[#allocation2 + $0x98] sm:$0xff] }
 0x27b   :  { %2250 = vst.msk [vmem:[#allocation2 + $0xa8] sm:$0xff] %vm2228_vm1, %v2213_v60  ;;  %v2133_v7 = vmax.f32 %v1989_v20, %v2046_v13  ;;  %v1847_v0 = vmax.f32 %v7380_v28, %v1762_v61  ;;  %6014 = vmatprep.mubr.msk.f32.mxu1 %vm2228_vm1, %v7689_v62 }
 0x27c   :  { %1787 = vrot.lane.b32.xlu1 %v7425_v42, %s6689_s16  ;;  %2073 = vrot.lane.b32.xlu0 %v7432_v44, %s6690_s0 }
 0x27d   :  { %v2176_v26 = vadd.f32 %v7495_v52, %v2133_v7  ;;  %v1991_v22 = vmax.f32 %v1847_v0, %v1906_v16 }
 0x27e   :  { %v1862_v1 = vpop.permute.xlu1 %1861  ;;  %v2050_v9 = vpop.permute.xlu0 %2049 }
 0x27f   :  { %v2212_v14 = vmax.f32 %v2176_v26, 0.0  ;;  %v2135_v37 = vmax.f32 %v1991_v22, %v2050_v9  ;;  %v1969_v28 = vmax.f32 %v1825_v10, %v1862_v1  ;;  %v5251_v10 = vld [vmem:[%s8509_s3 + $0x48] sm:$0xff] }
 0x280   :  { %2075 = vrot.lane.b32.xlu1 %v7425_v42, %s6690_s0  ;;  %1931 = vrot.lane.b32.xlu0 %v7425_v42, %s6688_s15 }
 0x281   :  { %2249 = vst.msk [vmem:[#allocation2 + $0xa0] sm:$0xff] %vm2228_vm1, %v2212_v14  ;;  %v2178_v39 = vadd.f32 %v7495_v52, %v2135_v37  ;;  %v5252_v14 = vld [vmem:[%s8509_s3 + $0x50] sm:$0xff] }
 0x282   :  { %v1730_v43 = vpop.permute.xlu1 %1729  ;;  %v2006_v47 = vpop.permute.xlu0 %2005  ;;  %v7716_v56 = vld [vmem:[#allocation2 + $0xa8] sm:$0xff] }
 0x283   :  { %v2214_v45 = vmax.f32 %v2178_v39, 0.0  ;;  %v2113_v46 = vmax.f32 %v1969_v28, %v2006_v47  ;;  %v1831_v2 = vmax.f32 %v7307_v8, %v1730_v43  ;;  %v7744_v43 = vpack.c.bf16 %v5252_v14, %v5251_v10 }
 0x285   :  { %2251 = vst.msk [vmem:[#allocation2 + $0xb0] sm:$0xff] %vm2228_vm1, %v2214_v45  ;;  %v2156_v54 = vadd.f32 %v7495_v52, %v2113_v46 }
 0x286   :  { %v2018_v48 = vpop.permute.xlu1 %2017  ;;  %v1874_v50 = vpop.permute.xlu0 %1873 }
 0x287   :  { %v2192_v51 = vmax.f32 %v2156_v54, 0.0  ;;  %v1975_v53 = vmax.f32 %v1831_v2, %v1874_v50 }
 0x288   :  { %v7711_v55 = vld [vmem:[#allocation2 + $0xa0] sm:$0xff] }
 0x289   :  { %2229 = vst.msk [vmem:[#allocation2] sm:$0xff] %vm2228_vm1, %v2192_v51  ;;  %v2119_v13 = vmax.f32 %v1975_v53, %v2018_v48  ;;  %6015 = vmatmul.mubr.msk.f32.gmra.mrb[16].mxu1 %vm2228_vm1, %v7711_v55 }
 0x28a   :  { %6017 = vmatprep.mubr.msk.f32.mxu1 %vm2228_vm1, %v7716_v56  ;;  %v1886_v8 = vpop.permute.xlu1 %1885  ;;  %v1742_v57 = vpop.permute.xlu0 %1741 }
 0x28b   :  { %v2162_v59 = vadd.f32 %v7495_v52, %v2119_v13  ;;  %v1837_v60 = vmax.f32 %v7340_v18, %v1742_v57  ;;  %v5234_v18 = vld [vmem:[%s8509_s3 + $0x40] sm:$0xff] }
 0x28c   :  { %v7722_v20 = vld [vmem:[#allocation2 + $0xb0] sm:$0xff] }
 0x28d   :  { %v2198_v16 = vmax.f32 %v2162_v59, 0.0  ;;  %6018 = vmatmul.mubr.msk.f32.gmra.mrb[18].mxu1 %vm2228_vm1, %v7722_v20  ;;  %v1981_v61 = vmax.f32 %v1837_v60, %v1886_v8 }
 0x28e   :  { %v1754_v7 = vpop.permute.xlu1 %1753  ;;  %v2030_v0 = vpop.permute.xlu0 %2029 }
 0x28f   :  { %2235 = vst.msk [vmem:[#allocation2 + $0x30] sm:$0xff] %vm2228_vm1, %v2198_v16  ;;  %v2125_v26 = vmax.f32 %v1981_v61, %v2030_v0  ;;  %v1843_v1 = vmax.f32 %v7364_v24, %v1754_v7 }
 0x290   :  { %v2265_v22 = vld [vmem:[#allocation2] sm:$0xff] }
 0x291   :  { %v2168_v9 = vadd.f32 %v7495_v52, %v2125_v26  ;;  %6026 = vmatprep.mubr.msk.f32.mxu1 %vm2228_vm1, %v2265_v22 }
 0x292   :  { %v2042_v37 = vpop.permute.xlu1 %2041  ;;  %6027 = vmatmul.mubr.msk.f32.vlgmr.msra.gmra.mrb[4].mxu1 %vm2228_vm1, %v7520_v3  ;;  %v1898_v24 = vpop.permute.xlu0 %1897 }
 0x293   :  { %v2204_v28 = vmax.f32 %v2168_v9, 0.0  ;;  %v1987_v39 = vmax.f32 %v1843_v1, %v1898_v24  ;;  %6029 = vmatprep.mubr.msk.f32.mxu1 %vm2228_vm1, %v7551_v63  ;;  %6345 = vmatpush3.bf16.msra.mxu1 %v7568_v41 }
 0x294   :  { %6054 = vmatprep.subr.mxu1 %v5234_v18 }
 0x295   :  { %2241 = vst.msk [vmem:[#allocation2 + $0x60] sm:$0xff] %vm2228_vm1, %v2204_v28  ;;  %v2131_v47 = vmax.f32 %v1987_v39, %v2042_v37 }
 0x296   :  { %v1872_v45 = vpop.permute.xlu1 %1871  ;;  %6030 = vmatmul.mubr.msk.f32.gmra.mrb[6].mxu1 %vm2228_vm1, %v7562_v11  ;;  %v1728_v46 = vpop.permute.xlu0 %1727  ;;  %v7749_v3 = vld [vmem:[#allocation2 + $0x30] sm:$0xff] }
 0x297   :  { %v2174_v2 = vadd.f32 %v7495_v52, %v2131_v47  ;;  %v1830_v54 = vmax.f32 %v7293_v5, %v1728_v46  ;;  %6032 = vmatprep.mubr.msk.f32.mxu1 %vm2228_vm1, %v7749_v3  ;;  %6055 = vmatpush3.msra.mxu1 %v5234_v18 }
 0x298   :  { %6347 = vmatprep.subr.bf16.mxu1 %v7744_v43 }
 0x299   :  { %v2210_v41 = vmax.f32 %v2174_v2, 0.0  ;;  %v1974_v48 = vmax.f32 %v1830_v54, %v1872_v45 }
 0x29a   :  { %v1740_v50 = vpop.permute.xlu1 %1739  ;;  %6033 = vmatmul.mubr.msk.f32.gmra.mrb[8].mxu1 %vm2228_vm1, %v7585_v6  ;;  %v2016_v51 = vpop.permute.xlu0 %2015 }
 0x29b   :  { %2247 = vst.msk [vmem:[#allocation2 + $0x90] sm:$0xff] %vm2228_vm1, %v2210_v41  ;;  %v2118_v53 = vmax.f32 %v1974_v48, %v2016_v51  ;;  %6035 = vmatprep.mubr.msk.f32.mxu1 %vm2228_vm1, %v7613_v17  ;;  %v1836_v5 = vmax.f32 %v7326_v15, %v1740_v50  ;;  %v5253_v41 = vld [vmem:[%s8509_s3 + $0x58] sm:$0xff]  ;;  %v5270_v48 = vld [vmem:[%s8509_s3 + $0x60] sm:$0xff]  ;;  %v5271_v50 = vld [vmem:[%s8509_s3 + $0x68] sm:$0xff] }
 0x29c   :  { %v7765_v59 = vld [vmem:[#allocation2 + $0x60] sm:$0xff] }
 0x29d   :  { %v2161_v13 = vadd.f32 %v7495_v52, %v2118_v53 }
 0x29e   :  { %v2028_v8 = vpop.permute.xlu1 %2027  ;;  %6036 = vmatmul.mubr.msk.f32.gmra.mrb[10].mxu1 %vm2228_vm1, %v7618_v4  ;;  %v1884_v57 = vpop.permute.xlu0 %1883 }
 0x29f   :  { %v2197_v60 = vmax.f32 %v2161_v13, 0.0  ;;  %v1980_v16 = vmax.f32 %v1836_v5, %v1884_v57  ;;  %6038 = vmatprep.mubr.msk.f32.mxu1 %vm2228_vm1, %v7765_v59  ;;  %v7811_v5 = vpack.c.bf16 %v5271_v50, %v5270_v48 }
 0x2a1   :  { %2234 = vst.msk [vmem:[#allocation2 + $0x28] sm:$0xff] %vm2228_vm1, %v2197_v60  ;;  %v2124_v61 = vmax.f32 %v1980_v16, %v2028_v8 }
 0x2a2   :  { %v1896_v7 = vpop.permute.xlu1 %1895  ;;  %6039 = vmatmul.mubr.msk.f32.gmra.mrb[12].mxu1 %vm2228_vm1, %v7637_v58  ;;  %v1752_v15 = vpop.permute.xlu0 %1751  ;;  %v7778_v10 = vld [vmem:[#allocation2 + $0x90] sm:$0xff] }
 0x2a3   :  { %v2167_v0 = vadd.f32 %v7495_v52, %v2124_v61  ;;  %v1842_v26 = vmax.f32 %v7350_v21, %v1752_v15  ;;  %6041 = vmatprep.mubr.msk.f32.mxu1 %vm2228_vm1, %v7665_v23 }
 0x2a5   :  { %v2203_v22 = vmax.f32 %v2167_v0, 0.0  ;;  %v1986_v1 = vmax.f32 %v1842_v26, %v1896_v7 }
 0x2a6   :  { %v1764_v9 = vpop.permute.xlu1 %1763  ;;  %6042 = vmatmul.mubr.msk.f32.gmra.mrb[14].mxu1 %vm2228_vm1, %v7670_v49  ;;  %v2040_v18 = vpop.permute.xlu0 %2039 }
 0x2a7   :  { %2240 = vst.msk [vmem:[#allocation2 + $0x58] sm:$0xff] %vm2228_vm1, %v2203_v22  ;;  %v2130_v14 = vmax.f32 %v1986_v1, %v2040_v18  ;;  %6044 = vmatprep.mubr.msk.f32.mxu1 %vm2228_vm1, %v7778_v10  ;;  %v1848_v21 = vmax.f32 %v7374_v27, %v1764_v9 }
 0x2a8   :  { %v2695_v8 = vld [vmem:[#allocation2 + $0x28] sm:$0xff] }
 0x2a9   :  { %v2173_v37 = vadd.f32 %v7495_v52, %v2130_v14 }
 0x2aa   :  { %v2052_v24 = vpop.permute.xlu1 %2051  ;;  %6045 = vmatmul.mubr.msk.f32.gmra.mrb[16].mxu1 %vm2228_vm1, %v7689_v62  ;;  %v1908_v28 = vpop.permute.xlu0 %1907 }
 0x2ab   :  { %v2209_v39 = vmax.f32 %v2173_v37, 0.0  ;;  %v1992_v47 = vmax.f32 %v1848_v21, %v1908_v28  ;;  %6047 = vmatprep.mubr.msk.f32.mxu1 %vm2228_vm1, %v7711_v55 }
 0x2ad   :  { %2246 = vst.msk [vmem:[#allocation2 + $0x88] sm:$0xff] %vm2228_vm1, %v2209_v39  ;;  %v2136_v45 = vmax.f32 %v1992_v47, %v2052_v24 }
 0x2ae   :  { %6048 = vmatmul.mubr.msk.f32.gmra.mrb[18].mxu1 %vm2228_vm1, %v7716_v56  ;;  %v1768_v46 = vpop.permute.xlu1 %1767  ;;  %v1766_v27 = vpop.permute.xlu0 %1765  ;;  %v7825_v0 = vld [vmem:[#allocation2 + $0x58] sm:$0xff] }
 0x2af   :  { %v2179_v2 = vadd.f32 %v7495_v52, %v2136_v45  ;;  %6056 = vmatprep.mubr.msk.f32.mxu1 %vm2228_vm1, %v7551_v63  ;;  %v1850_v63 = vmax.f32 %v7382_v29, %v1768_v46  ;;  %v1849_v60 = vmax.f32 %v7388_v30, %v1766_v27 }
 0x2b1   :  { %v2215_v54 = vmax.f32 %v2179_v2, 0.0 }
 0x2b2   :  { %6057 = vmatmul.mubr.msk.f32.vlgmr.msra.gmra.mrb[4].mxu1 %vm2228_vm1, %v7562_v11  ;;  %v1912_v51 = vpop.permute.xlu1 %1911  ;;  %v1910_v53 = vpop.permute.xlu0 %1909 }
 0x2b3   :  { %2252 = vst.msk [vmem:[#allocation2 + $0xb8] sm:$0xff] %vm2228_vm1, %v2215_v54  ;;  %6059 = vmatprep.mubr.msk.f32.mxu1 %vm2228_vm1, %v7574_v12  ;;  %6349 = vmatpush3.bf16.msra.mxu1 %v7744_v43  ;;  %v1994_v13 = vmax.f32 %v1850_v63, %v1912_v51  ;;  %v1993_v29 = vmax.f32 %v1849_v60, %v1910_v53 }
 0x2b4   :  { %6084 = vmatprep.subr.mxu1 %v5253_v41  ;;  %v7840_v47 = vld [vmem:[#allocation2 + $0x88] sm:$0xff] }
 0x2b6   :  { %6060 = vmatmul.mubr.msk.f32.gmra.mrb[6].mxu1 %vm2228_vm1, %v2695_v8  ;;  %v2056_v57 = vpop.permute.xlu1 %2055  ;;  %v1772_v11 = vpop.permute.xlu0 %1771 }
 0x2b7   :  { %v2138_v16 = vmax.f32 %v1994_v13, %v2056_v57  ;;  %6062 = vmatprep.mubr.msk.f32.mxu1 %vm2228_vm1, %v7613_v17  ;;  %6085 = vmatpush3.msra.mxu1 %v5253_v41  ;;  %v1852_v1 = vmax.f32 %v7390_v31, %v1772_v11 }
 0x2b8   :  { %6351 = vmatprep.subr.bf16.mxu1 %v7811_v5 }
 0x2b9   :  { %v2181_v12 = vadd.f32 %v7495_v52, %v2138_v16  ;;  %v5289_v16 = vld [vmem:[%s8509_s3 + $0x78] sm:$0xff] }
 0x2ba   :  { %6063 = vmatmul.mubr.msk.f32.gmra.mrb[8].mxu1 %vm2228_vm1, %v7618_v4  ;;  %v2054_v43 = vpop.permute.xlu1 %2053  ;;  %v1770_v61 = vpop.permute.xlu0 %1769  ;;  %v7855_v63 = vld [vmem:[#allocation2 + $0xb8] sm:$0xff] }
 0x2bb   :  { %v2217_v7 = vmax.f32 %v2181_v12, 0.0  ;;  %v2137_v15 = vmax.f32 %v1993_v29, %v2054_v43  ;;  %6065 = vmatprep.mubr.msk.f32.mxu1 %vm2228_vm1, %v7627_v19  ;;  %v1851_v18 = vmax.f32 %v7396_v32, %v1770_v61  ;;  %v5290_v29 = vld [vmem:[%s8509_s3 + $0x80] sm:$0xff] }
 0x2bc   :  { %v7877_v61 = vpack.c.bf16 %v5290_v29, %v5289_v16 }
 0x2bd   :  { %2254 = vst.msk [vmem:[#allocation2 + $0xc8] sm:$0xff] %vm2228_vm1, %v2217_v7  ;;  %v2180_v30 = vadd.f32 %v7495_v52, %v2137_v15 }
 0x2be   :  { %6066 = vmatmul.mubr.msk.f32.gmra.mrb[10].mxu1 %vm2228_vm1, %v7825_v0  ;;  %v1916_v26 = vpop.permute.xlu1 %1915  ;;  %v1914_v22 = vpop.permute.xlu0 %1913 }
 0x2bf   :  { %v2216_v9 = vmax.f32 %v2180_v30, 0.0  ;;  %6068 = vmatprep.mubr.msk.f32.mxu1 %vm2228_vm1, %v7665_v23  ;;  %v1996_v14 = vmax.f32 %v1852_v1, %v1916_v26  ;;  %v1995_v21 = vmax.f32 %v1851_v18, %v1914_v22 }
 0x2c1   :  { %2253 = vst.msk [vmem:[#allocation2 + $0xc0] sm:$0xff] %vm2228_vm1, %v2216_v9 }
 0x2c2   :  { %6069 = vmatmul.mubr.msk.f32.gmra.mrb[12].mxu1 %vm2228_vm1, %v7670_v49  ;;  %v2060_v37 = vpop.permute.xlu1 %2059  ;;  %v2058_v24 = vpop.permute.xlu0 %2057 }
 0x2c3   :  { %v2140_v28 = vmax.f32 %v1996_v14, %v2060_v37  ;;  %v2139_v39 = vmax.f32 %v1995_v21, %v2058_v24  ;;  %6071 = vmatprep.mubr.msk.f32.mxu1 %vm2228_vm1, %v7679_v25 }
 0x2c5   :  { %v2183_v31 = vadd.f32 %v7495_v52, %v2140_v28  ;;  %v2182_v32 = vadd.f32 %v7495_v52, %v2139_v39 }
 0x2c6   :  { %6072 = vmatmul.mubr.msk.f32.gmra.mrb[14].mxu1 %vm2228_vm1, %v7840_v47  ;;  %v1918_v45 = vpop.permute.xlu1 %1917  ;;  %v1774_v46 = vpop.permute.xlu0 %1773 }
 0x2c7   :  { %v2219_v27 = vmax.f32 %v2183_v31, 0.0  ;;  %v2218_v2 = vmax.f32 %v2182_v32, 0.0  ;;  %v1853_v54 = vmax.f32 %v7404_v34, %v1774_v46  ;;  %6074 = vmatprep.mubr.msk.f32.mxu1 %vm2228_vm1, %v7711_v55 }
 0x2c9   :  { %2256 = vst.msk [vmem:[#allocation2 + $0xd8] sm:$0xff] %vm2228_vm1, %v2219_v27  ;;  %2255 = vst.msk [vmem:[#allocation2 + $0xd0] sm:$0xff] %vm2228_vm1, %v2218_v2  ;;  %v1997_v41 = vmax.f32 %v1853_v54, %v1918_v45 }
 0x2ca   :  { %6075 = vmatmul.mubr.msk.f32.gmra.mrb[16].mxu1 %vm2228_vm1, %v7716_v56  ;;  %v1776_v48 = vpop.permute.xlu1 %1775  ;;  %v2062_v50 = vpop.permute.xlu0 %2061 }
 0x2cb   :  { %v2141_v51 = vmax.f32 %v1997_v41, %v2062_v50  ;;  %6077 = vmatprep.mubr.msk.f32.mxu1 %vm2228_vm1, %v7722_v20  ;;  %v1854_v53 = vmax.f32 %v7398_v33, %v1776_v48  ;;  %v5272_v33 = vld [vmem:[%s8509_s3 + $0x70] sm:$0xff]  ;;  %v7907_v48 = vld [vmem:[#allocation2 + $0xc0] sm:$0xff] }
 0x2cd   :  { %v2184_v34 = vadd.f32 %v7495_v52, %v2141_v51 }
 0x2ce   :  { %6078 = vmatmul.mubr.msk.f32.gmra.mrb[18].mxu1 %vm2228_vm1, %v7855_v63  ;;  %v2064_v13 = vpop.permute.xlu1 %2063  ;;  %v1920_v8 = vpop.permute.xlu0 %1919 }
 0x2cf   :  { %v2220_v57 = vmax.f32 %v2184_v34, 0.0  ;;  %v1998_v11 = vmax.f32 %v1854_v53, %v1920_v8  ;;  %6086 = vmatprep.mubr.msk.f32.mxu1 %vm2228_vm1, %v7749_v3  ;;  %v7913_v53 = vld [vmem:[#allocation2 + $0xc8] sm:$0xff] }
 0x2d0   :  { %v7917_v8 = vld [vmem:[#allocation2 + $0xd0] sm:$0xff] }
 0x2d1   :  { %2257 = vst.msk [vmem:[#allocation2 + $0xe0] sm:$0xff] %vm2228_vm1, %v2220_v57  ;;  %v2142_v60 = vmax.f32 %v1998_v11, %v2064_v13 }
 0x2d2   :  { %6087 = vmatmul.mubr.msk.f32.vlgmr.msra.gmra.mrb[4].mxu1 %vm2228_vm1, %v7585_v6  ;;  %v1780_v12 = vpop.permute.xlu1 %1779  ;;  %v1778_v3 = vpop.permute.xlu0 %1777 }
 0x2d3   :  { %v2185_v43 = vadd.f32 %v7495_v52, %v2142_v60  ;;  %6089 = vmatprep.mubr.msk.f32.mxu1 %vm2228_vm1, %v7613_v17  ;;  %6353 = vmatpush3.bf16.msra.mxu1 %v7811_v5  ;;  %v1856_v26 = vmax.f32 %v7406_v35, %v1780_v12  ;;  %v1855_v9 = vmax.f32 %v7412_v36, %v1778_v3 }
 0x2d4   :  { %6114 = vmatprep.subr.mxu1 %v5272_v33 }
 0x2d5   :  { %v2221_v7 = vmax.f32 %v2185_v43, 0.0 }
 0x2d6   :  { %6090 = vmatmul.mubr.msk.f32.gmra.mrb[6].mxu1 %vm2228_vm1, %v7618_v4  ;;  %v1924_v15 = vpop.permute.xlu1 %1923  ;;  %v1922_v30 = vpop.permute.xlu0 %1921 }
 0x2d7   :  { %2258 = vst.msk [vmem:[#allocation2 + $0xe8] sm:$0xff] %vm2228_vm1, %v2221_v7  ;;  %6092 = vmatprep.mubr.msk.f32.mxu1 %vm2228_vm1, %v7765_v59  ;;  %6115 = vmatpush3.msra.mxu1 %v5272_v33  ;;  %v2000_v5 = vmax.f32 %v1856_v26, %v1924_v15  ;;  %v1999_v14 = vmax.f32 %v1855_v9, %v1922_v30  ;;  %v7924_v33 = vld [vmem:[#allocation2 + $0xd8] sm:$0xff]  ;;  %v5291_v7 = vld [vmem:[%s8509_s3 + $0x88] sm:$0xff]  ;;  %v5308_v15 = vld [vmem:[%s8509_s3 + $0x90] sm:$0xff] }
 0x2d8   :  { %6355 = vmatprep.subr.bf16.mxu1 %v7877_v61  ;;  %v5309_v30 = vld [vmem:[%s8509_s3 + $0x98] sm:$0xff] }
 0x2da   :  { %6093 = vmatmul.mubr.msk.f32.gmra.mrb[8].mxu1 %vm2228_vm1, %v7637_v58  ;;  %v2068_v22 = vpop.permute.xlu1 %2067  ;;  %v1784_v1 = vpop.permute.xlu0 %1783 }
 0x2db   :  { %v2144_v18 = vmax.f32 %v2000_v5, %v2068_v22  ;;  %6095 = vmatprep.mubr.msk.f32.mxu1 %vm2228_vm1, %v7665_v23  ;;  %v1858_v32 = vmax.f32 %v7415_v38, %v1784_v1  ;;  %v6358_v22 = vpack.c.bf16 %v5309_v30, %v5308_v15  ;;  %v4630_v15 = vld [vmem:[%s8512_s5 + $0x8] sm:$0xff] }
 0x2dd   :  { %v2187_v35 = vadd.f32 %v7495_v52, %v2144_v18 }
 0x2de   :  { %6096 = vmatmul.mubr.msk.f32.gmra.mrb[10].mxu1 %vm2228_vm1, %v7670_v49  ;;  %v2066_v21 = vpop.permute.xlu1 %2065  ;;  %v1782_v37 = vpop.permute.xlu0 %1781 }
 0x2df   :  { %v2223_v24 = vmax.f32 %v2187_v35, 0.0  ;;  %v2143_v28 = vmax.f32 %v1999_v14, %v2066_v21  ;;  %6098 = vmatprep.mubr.msk.f32.mxu1 %vm2228_vm1, %v7778_v10  ;;  %v1857_v46 = vmax.f32 %v7422_v40, %v1782_v37  ;;  %v5327_v14 = vld [vmem:[%s8509_s3 + $0xa8] sm:$0xff]  ;;  %v5328_v35 = vld [vmem:[%s8509_s3 + $0xb0] sm:$0xff] }
 0x2e0   :  { %v5347_v21 = vld [vmem:[%s8509_s3 + $0xc8] sm:$0xff] }
 0x2e1   :  { %2260 = vst.msk [vmem:[#allocation2 + $0xf8] sm:$0xff] %vm2228_vm1, %v2223_v24  ;;  %v2186_v36 = vadd.f32 %v7495_v52, %v2143_v28 }
 0x2e2   :  { %6099 = vmatmul.mubr.msk.f32.gmra.mrb[12].mxu1 %vm2228_vm1, %v7689_v62  ;;  %v1928_v39 = vpop.permute.xlu1 %1927  ;;  %v1926_v31 = vpop.permute.xlu0 %1925 }
 0x2e3   :  { %v2222_v45 = vmax.f32 %v2186_v36, 0.0  ;;  %6101 = vmatprep.mubr.msk.f32.mxu1 %vm2228_vm1, %v7711_v55  ;;  %v2002_v27 = vmax.f32 %v1858_v32, %v1928_v39  ;;  %v2001_v2 = vmax.f32 %v1857_v46, %v1926_v31  ;;  %v5348_v36 = vld [vmem:[%s8509_s3 + $0xd0] sm:$0xff] }
 0x2e5   :  { %2259 = vst.msk [vmem:[#allocation2 + $0xf0] sm:$0xff] %vm2228_vm1, %v2222_v45 }
 0x2e6   :  { %6102 = vmatmul.mubr.msk.f32.gmra.mrb[14].mxu1 %vm2228_vm1, %v7716_v56  ;;  %v2072_v54 = vpop.permute.xlu1 %2071  ;;  %v2070_v41 = vpop.permute.xlu0 %2069 }
 0x2e7   :  { %v2146_v50 = vmax.f32 %v2002_v27, %v2072_v54  ;;  %v2145_v51 = vmax.f32 %v2001_v2, %v2070_v41  ;;  %6104 = vmatprep.mubr.msk.f32.mxu1 %vm2228_vm1, %v7907_v48 }
 0x2e8   :  { %v3625_v37 = vld [vmem:[#allocation2 + $0xf8] sm:$0xff] }
 0x2e9   :  { %v2189_v38 = vadd.f32 %v7495_v52, %v2146_v50  ;;  %v2188_v40 = vadd.f32 %v7495_v52, %v2145_v51 }
 0x2ea   :  { %6105 = vmatmul.mubr.msk.f32.gmra.mrb[16].mxu1 %vm2228_vm1, %v7913_v53  ;;  %v1930_v34 = vpop.permute.xlu1 %1929  ;;  %v1786_v13 = vpop.permute.xlu0 %1785 }
 0x2eb   :  { %v2225_v57 = vmax.f32 %v2189_v38, 0.0  ;;  %v2224_v11 = vmax.f32 %v2188_v40, 0.0  ;;  %v1859_v60 = vmax.f32 %v7432_v44, %v1786_v13  ;;  %6107 = vmatprep.mubr.msk.f32.mxu1 %vm2228_vm1, %v7917_v8  ;;  %v8244_v38 = vld [vmem:[%s8511_s4] ss:$0 sm:$0xff] }
 0x2ed   :  { %2262 = vst.msk [vmem:[#allocation2 + $0x108] sm:$0xff] %vm2228_vm1, %v2225_v57  ;;  %2261 = vst.msk [vmem:[#allocation2 + $0x100] sm:$0xff] %vm2228_vm1, %v2224_v11  ;;  %v2003_v16 = vmax.f32 %v1859_v60, %v1930_v34 }
 0x2ee   :  { %6108 = vmatmul.mubr.msk.f32.gmra.mrb[18].mxu1 %vm2228_vm1, %v7924_v33  ;;  %v1788_v29 = vpop.permute.xlu1 %1787  ;;  %v2074_v12 = vpop.permute.xlu0 %2073 }
 0x2ef   :  { %v2147_v3 = vmax.f32 %v2003_v16, %v2074_v12  ;;  %6116 = vmatprep.mubr.msk.f32.mxu1 %vm2228_vm1, %v7585_v6  ;;  %v1860_v44 = vmax.f32 %v7425_v42, %v1788_v29  ;;  %v4645_v29 = vld [vmem:[%s8512_s5 + $0x80] sm:$0xff]  ;;  %v4646_v12 = vld [vmem:[%s8512_s5 + $0x88] sm:$0xff] }
 0x2f1   :  { %v2190_v43 = vadd.f32 %v7495_v52, %v2147_v3  ;;  %v4629_v3 = vld [vmem:[%s8512_s5] sm:$0xff] }
 0x2f2   :  { %6117 = vmatmul.mubr.msk.f32.vlgmr.msra.gmra.mrb[4].mxu1 %vm2228_vm1, %v7613_v17  ;;  %v1932_v6 = vpop.permute.xlu0 %1931  ;;  %v2076_v5 = vpop.permute.xlu1 %2075 }
 0x2f3   :  { %v2226_v26 = vmax.f32 %v2190_v43, 0.0  ;;  %v2004_v42 = vmax.f32 %v1860_v44, %v1932_v6  ;;  %6119 = vmatprep.mubr.msk.f32.mxu1 %vm2228_vm1, %v7618_v4  ;;  %6357 = vmatpush3.bf16.msra.mxu1 %v7877_v61  ;;  %v5310_v61 = vld [vmem:[%s8509_s3 + $0xa0] sm:$0xff] }
 0x2f4   :  { %6144 = vmatprep.subr.mxu1 %v5291_v7  ;;  %v3626_v24 = vld [vmem:[#allocation2 + $0x100] sm:$0xff]  ;;  %v3627_v28 = vld [vmem:[#allocation2 + $0x108] sm:$0xff] }
 0x2f5   :  { %2263 = vst.msk [vmem:[#allocation2 + $0x110] sm:$0xff] %vm2228_vm1, %v2226_v26  ;;  %v2148_v1 = vmax.f32 %v2004_v42, %v2076_v5  ;;  %v6372_v26 = vpack.c.bf16 %v4630_v15, %v4629_v3  ;;  %v4652_v3 = vld [vmem:[%s8512_s5 + $0xb8] sm:$0xff] }
 0x2f6   :  { %6120 = vmatmul.mubr.msk.f32.gmra.mrb[6].mxu1 %vm2228_vm1, %v7627_v19 }
 0x2f7   :  { %v2191_v9 = vadd.f32 %v7495_v52, %v2148_v1  ;;  %6122 = vmatprep.mubr.msk.f32.mxu1 %vm2228_vm1, %v7637_v58  ;;  %6145 = vmatpush3.msra.mxu1 %v5291_v7  ;;  %v7973_v52 = vld [vmem:[#allocation2 + $0xe0] sm:$0xff]  ;;  %v6370_v7 = vpack.c.bf16 %v4646_v12, %v4645_v29  ;;  %v4651_v12 = vld [vmem:[%s8512_s5 + $0xb0] sm:$0xff] }
 0x2f8   :  { %6359 = vmatprep.subr.bf16.mxu1 %v6358_v22 }
 0x2f9   :  { %v2227_v18 = vmax.f32 %v2191_v9, 0.0  ;;  %6371 = vmatprep.subr.bf16.mxu0 %v6370_v7  ;;  %v4636_v7 = vld [vmem:[%s8512_s5 + $0x38] sm:$0xff] }
 0x2fa   :  { %6123 = vmatmul.mubr.msk.f32.gmra.mrb[8].mxu1 %vm2228_vm1, %v7665_v23  ;;  %6373 = vmatpush3.bf16.msra.mxu0 %v6372_v26  ;;  %v4653_v26 = vld [vmem:[%s8512_s5 + $0xc0] sm:$0xff] }
 0x2fb   :  { %2264 = vst.msk [vmem:[#allocation2 + $0x118] sm:$0xff] %vm2228_vm1, %v2227_v18  ;;  %6125 = vmatprep.mubr.msk.f32.mxu1 %vm2228_vm1, %v7670_v49  ;;  %v4647_v18 = vld [vmem:[%s8512_s5 + $0x90] sm:$0xff] }
 0x2fe   :  { %6126 = vmatmul.mubr.msk.f32.gmra.mrb[10].mxu1 %vm2228_vm1, %v7679_v25 }
 0x2ff   :  { %6128 = vmatprep.mubr.msk.f32.mxu1 %vm2228_vm1, %v7689_v62 }
 0x302   :  { %6129 = vmatmul.mubr.msk.f32.gmra.mrb[12].mxu1 %vm2228_vm1, %v7711_v55 }
 0x303   :  { %6131 = vmatprep.mubr.msk.f32.mxu1 %vm2228_vm1, %v7716_v56 }
 0x306   :  { %6132 = vmatmul.mubr.msk.f32.gmra.mrb[14].mxu1 %vm2228_vm1, %v7722_v20 }
 0x307   :  { %6134 = vmatprep.mubr.msk.f32.mxu1 %vm2228_vm1, %v7913_v53 }
 0x30a   :  { %6135 = vmatmul.mubr.msk.f32.gmra.mrb[16].mxu1 %vm2228_vm1, %v7917_v8 }
 0x30b   :  { %6137 = vmatprep.mubr.msk.f32.mxu1 %vm2228_vm1, %v7924_v33 }
 0x30e   :  { %6138 = vmatmul.mubr.msk.f32.gmra.mrb[18].mxu1 %vm2228_vm1, %v7973_v52 }
 0x30f   :  { %6146 = vmatprep.mubr.msk.f32.mxu1 %vm2228_vm1, %v7613_v17  ;;  %v6362_v17 = vpack.c.bf16 %v5328_v35, %v5327_v14  ;;  %v4632_v35 = vld [vmem:[%s8512_s5 + $0x18] sm:$0xff] }
 0x312   :  { %6147 = vmatmul.mubr.msk.f32.vlgmr.msra.gmra.mrb[4].mxu1 %vm2228_vm1, %v7618_v4  ;;  %v3397_v4 = vld [vmem:[#allocation2 + $0xe8] sm:$0xff] }
 0x313   :  { %6149 = vmatprep.mubr.msk.f32.mxu1 %vm2228_vm1, %v7627_v19  ;;  %6361 = vmatpush3.bf16.msra.mxu1 %v6358_v22  ;;  %v5329_v19 = vld [vmem:[%s8509_s3 + $0xb8] sm:$0xff] }
 0x314   :  { %6174 = vmatprep.subr.mxu1 %v5310_v61 }
 0x316   :  { %6150 = vmatmul.mubr.msk.f32.gmra.mrb[6].mxu1 %vm2228_vm1, %v7825_v0  ;;  %v5346_v0 = vld [vmem:[%s8509_s3 + $0xc0] sm:$0xff]  ;;  %s6691_s3 = smov 96  }
 0x317   :  { %6152 = vmatprep.mubr.msk.f32.mxu1 %vm2228_vm1, %v7665_v23  ;;  %6175 = vmatpush3.msra.mxu1 %v5310_v61  ;;  %v4631_v61 = vld [vmem:[%s8512_s5 + $0x10] sm:$0xff] }
 0x318   :  { %6363 = vmatprep.subr.bf16.mxu1 %v6362_v17 }
 0x31a   :  { %6153 = vmatmul.mubr.msk.f32.gmra.mrb[8].mxu1 %vm2228_vm1, %v7670_v49 }
 0x31b   :  { %6155 = vmatprep.mubr.msk.f32.mxu1 %vm2228_vm1, %v7679_v25 }
 0x31e   :  { %6156 = vmatmul.mubr.msk.f32.gmra.mrb[10].mxu1 %vm2228_vm1, %v7840_v47 }
 0x31f   :  { %6158 = vmatprep.mubr.msk.f32.mxu1 %vm2228_vm1, %v7711_v55 }
 0x322   :  { %6159 = vmatmul.mubr.msk.f32.gmra.mrb[12].mxu1 %vm2228_vm1, %v7716_v56 }
 0x323   :  { %6161 = vmatprep.mubr.msk.f32.mxu1 %vm2228_vm1, %v7722_v20 }
 0x326   :  { %6162 = vmatmul.mubr.msk.f32.gmra.mrb[14].mxu1 %vm2228_vm1, %v7855_v63 }
 0x327   :  { %6164 = vmatprep.mubr.msk.f32.mxu1 %vm2228_vm1, %v7917_v8 }
 0x32a   :  { %6165 = vmatmul.mubr.msk.f32.gmra.mrb[16].mxu1 %vm2228_vm1, %v7924_v33 }
 0x32b   :  { %6167 = vmatprep.mubr.msk.f32.mxu1 %vm2228_vm1, %v7973_v52 }
 0x32e   :  { %6168 = vmatmul.mubr.msk.f32.gmra.mrb[18].mxu1 %vm2228_vm1, %v3397_v4 }
 0x32f   :  { %6176 = vmatprep.mubr.msk.f32.mxu1 %vm2228_vm1, %v7765_v59  ;;  %v6366_v59 = vpack.c.bf16 %v5347_v21, %v5346_v0 }
 0x332   :  { %6177 = vmatmul.mubr.msk.f32.vlgmr.msra.gmra.mrb[4].mxu1 %vm2228_vm1, %v7637_v58 }
 0x333   :  { %6179 = vmatprep.mubr.msk.f32.mxu1 %vm2228_vm1, %v7665_v23  ;;  %6365 = vmatpush3.bf16.msra.mxu1 %v6362_v17 }
 0x334   :  { %6204 = vmatprep.subr.mxu1 %v5329_v19 }
 0x336   :  { %6180 = vmatmul.mubr.msk.f32.gmra.mrb[6].mxu1 %vm2228_vm1, %v7670_v49 }
 0x337   :  { %6182 = vmatprep.mubr.msk.f32.mxu1 %vm2228_vm1, %v7778_v10  ;;  %6205 = vmatpush3.msra.mxu1 %v5329_v19  ;;  %v3624_v10 = vld [vmem:[#allocation2 + $0xf0] sm:$0xff] }
 0x338   :  { %6367 = vmatprep.subr.bf16.mxu1 %v6366_v59 }
 0x33a   :  { %6183 = vmatmul.mubr.msk.f32.gmra.mrb[8].mxu1 %vm2228_vm1, %v7689_v62 }
 0x33b   :  { %6185 = vmatprep.mubr.msk.f32.mxu1 %vm2228_vm1, %v7711_v55 }
 0x33e   :  { %6186 = vmatmul.mubr.msk.f32.gmra.mrb[10].mxu1 %vm2228_vm1, %v7716_v56 }
 0x33f   :  { %6188 = vmatprep.mubr.msk.f32.mxu1 %vm2228_vm1, %v7907_v48 }
 0x342   :  { %6189 = vmatmul.mubr.msk.f32.gmra.mrb[12].mxu1 %vm2228_vm1, %v7913_v53 }
 0x343   :  { %6191 = vmatprep.mubr.msk.f32.mxu1 %vm2228_vm1, %v7917_v8 }
 0x346   :  { %6192 = vmatmul.mubr.msk.f32.gmra.mrb[14].mxu1 %vm2228_vm1, %v7924_v33 }
 0x347   :  { %6194 = vmatprep.mubr.msk.f32.mxu1 %vm2228_vm1, %v3624_v10 }
 0x34a   :  { %6195 = vmatmul.mubr.msk.f32.gmra.mrb[16].mxu1 %vm2228_vm1, %v3625_v37 }
 0x34b   :  { %6197 = vmatprep.mubr.msk.f32.mxu1 %vm2228_vm1, %v3626_v24 }
 0x34e   :  { %6198 = vmatmul.mubr.msk.f32.gmra.mrb[18].mxu1 %vm2228_vm1, %v3627_v28 }
 0x34f   :  { %6206 = vmatprep.mubr.msk.f32.mxu1 %vm2228_vm1, %v7637_v58  ;;  %v3857_v58 = vld [vmem:[#allocation2 + $0x110] sm:$0xff] }
 0x352   :  { %6207 = vmatmul.mubr.msk.f32.vlgmr.msra.gmra.mrb[4].mxu1 %vm2228_vm1, %v7665_v23 }
 0x353   :  { %6209 = vmatprep.mubr.msk.f32.mxu1 %vm2228_vm1, %v7670_v49  ;;  %6369 = vmatpush3.bf16.msra.mxu1 %v6366_v59 }
 0x354   :  { %6234 = vmatprep.subr.mxu1 %v5348_v36 }
 0x356   :  { %6210 = vmatmul.mubr.msk.f32.gmra.mrb[6].mxu1 %vm2228_vm1, %v7679_v25 }
 0x357   :  { %6212 = vmatprep.mubr.msk.f32.mxu1 %vm2228_vm1, %v7689_v62  ;;  %6235 = vmatpush3.msra.mxu1 %v5348_v36  ;;  %v4650_v36 = vld [vmem:[%s8512_s5 + $0xa8] sm:$0xff] }
 0x35a   :  { %6213 = vmatmul.mubr.msk.f32.gmra.mrb[8].mxu1 %vm2228_vm1, %v7711_v55 }
 0x35b   :  { %6215 = vmatprep.mubr.msk.f32.mxu1 %vm2228_vm1, %v7716_v56 }
 0x35e   :  { %6216 = vmatmul.mubr.msk.f32.gmra.mrb[10].mxu1 %vm2228_vm1, %v7722_v20 }
 0x35f   :  { %6218 = vmatprep.mubr.msk.f32.mxu1 %vm2228_vm1, %v7913_v53 }
 0x362   :  { %6219 = vmatmul.mubr.msk.f32.gmra.mrb[12].mxu1 %vm2228_vm1, %v7917_v8 }
 0x363   :  { %6221 = vmatprep.mubr.msk.f32.mxu1 %vm2228_vm1, %v7924_v33 }
 0x366   :  { %6222 = vmatmul.mubr.msk.f32.gmra.mrb[14].mxu1 %vm2228_vm1, %v7973_v52 }
 0x367   :  { %6224 = vmatprep.mubr.msk.f32.mxu1 %vm2228_vm1, %v3625_v37 }
 0x36a   :  { %6225 = vmatmul.mubr.msk.f32.gmra.mrb[16].mxu1 %vm2228_vm1, %v3626_v24 }
 0x36b   :  { %6227 = vmatprep.mubr.msk.f32.mxu1 %vm2228_vm1, %v3627_v28 }
 0x36e   :  { %6228 = vmatmul.mubr.msk.f32.gmra.mrb[18].mxu1 %vm2228_vm1, %v3857_v58 }
 0x36f   :  { %6236 = vmatprep.mubr.msk.f32.mxu1 %vm2228_vm1, %v7665_v23  ;;  %v4087_v23 = vld [vmem:[#allocation2 + $0x118] sm:$0xff] }
 0x372   :  { %6237 = vmatmul.mubr.msk.f32.vlgmr.msra.gmra.mrb[4].mxu1 %vm2228_vm1, %v7670_v49 }
 0x373   :  { %6239 = vmatprep.mubr.msk.f32.mxu1 %vm2228_vm1, %v7679_v25 }
 0x376   :  { %6240 = vmatmul.mubr.msk.f32.gmra.mrb[6].mxu1 %vm2228_vm1, %v7840_v47 }
 0x377   :  { %6242 = vmatprep.mubr.msk.f32.mxu1 %vm2228_vm1, %v7711_v55 }
 0x37a   :  { %6243 = vmatmul.mubr.msk.f32.gmra.mrb[8].mxu1 %vm2228_vm1, %v7716_v56 }
 0x37b   :  { %6245 = vmatprep.mubr.msk.f32.mxu1 %vm2228_vm1, %v7722_v20 }
 0x37e   :  { %6246 = vmatmul.mubr.msk.f32.gmra.mrb[10].mxu1 %vm2228_vm1, %v7855_v63 }
 0x37f   :  { %6248 = vmatprep.mubr.msk.f32.mxu1 %vm2228_vm1, %v7917_v8 }
 0x382   :  { %6249 = vmatmul.mubr.msk.f32.gmra.mrb[12].mxu1 %vm2228_vm1, %v7924_v33 }
 0x383   :  { %6251 = vmatprep.mubr.msk.f32.mxu1 %vm2228_vm1, %v7973_v52  ;;  %v4648_v52 = vld [vmem:[%s8512_s5 + $0x98] sm:$0xff] }
 0x384   :  { %v6374_v14 = vpack.c.bf16 %v4648_v52, %v4647_v18 }
 0x386   :  { %6252 = vmatmul.mubr.msk.f32.gmra.mrb[14].mxu1 %vm2228_vm1, %v3397_v4  ;;  %v6376_v4 = vpack.c.bf16 %v4632_v35, %v4631_v61  ;;  %6375 = vmatprep.subr.bf16.mxu0 %v6374_v14 }
 0x387   :  { %6254 = vmatprep.mubr.msk.f32.mxu1 %vm2228_vm1, %v3626_v24 }
 0x388   :  { %6377 = vmatpush3.bf16.msra.mxu0 %v6376_v4 }
 0x38a   :  { %6255 = vmatmul.mubr.msk.f32.gmra.mrb[16].mxu1 %vm2228_vm1, %v3627_v28  ;;  %v4649_v28 = vld [vmem:[%s8512_s5 + $0xa0] sm:$0xff] }
 0x38b   :  { %6257 = vmatprep.mubr.msk.f32.mxu1 %vm2228_vm1, %v3857_v58  ;;  %v4633_v58 = vld [vmem:[%s8512_s5 + $0x20] sm:$0xff] }
 0x38e   :  { %6258 = vmatmul.mubr.msk.f32.gmra.mrb[18].mxu1 %vm2228_vm1, %v4087_v23 }
 0x445   :  { %v8112_v49 = vpop.f32.mrb[4].mxu1 }
 0x446   :  { %4383 = vrot.lane.b32.xlu0 %v8112_v49, %s6691_s3  ;;  %4319 = vrot.lane.b32.xlu1 %v8112_v49, %s6692_s29  ;;  %v8118_v25 = vpop.f32.mrb[5].mxu1 }
 0x449   :  { %v8120_v62 = vpop.f32.mrb[6].mxu1 }
 0x44a   :  { %4447 = vrot.lane.b32.xlu1 %v8112_v49, %s6688_s15  ;;  %4323 = vrot.lane.b32.xlu0 %v8120_v62, %s6692_s29  ;;  %v8126_v55 = vpop.f32.mrb[7].mxu1 }
 0x44d   :  { %v8128_v56 = vpop.f32.mrb[8].mxu1 }
 0x44e   :  { %4387 = vrot.lane.b32.xlu1 %v8120_v62, %s6691_s3  ;;  %4451 = vrot.lane.b32.xlu0 %v8120_v62, %s6688_s15  ;;  %v8134_v20 = vpop.f32.mrb[9].mxu1 }
 0x451   :  { %v8136_v47 = vpop.f32.mrb[10].mxu1 }
 0x452   :  { %4385 = vrot.lane.b32.xlu0 %v8126_v55, %s6691_s3  ;;  %4321 = vrot.lane.b32.xlu1 %v8126_v55, %s6692_s29  ;;  %v8142_v63 = vpop.f32.mrb[11].mxu1 }
 0x455   :  { %v8144_v39 = vpop.f32.mrb[12].mxu1 }
 0x456   :  { %4449 = vrot.lane.b32.xlu1 %v8126_v55, %s6688_s15  ;;  %4391 = vrot.lane.b32.xlu0 %v8128_v56, %s6691_s3  ;;  %v8150_v31 = vpop.f32.mrb[13].mxu1 }
 0x459   :  { %v8152_v32 = vpop.f32.mrb[14].mxu1 }
 0x45a   :  { %4327 = vrot.lane.b32.xlu1 %v8128_v56, %s6692_s29  ;;  %4325 = vrot.lane.b32.xlu0 %v8134_v20, %s6692_s29  ;;  %v8158_v45 = vpop.f32.mrb[15].mxu1 }
 0x45d   :  { %v8160_v46 = vpop.f32.mrb[16].mxu1 }
 0x45e   :  { %4455 = vrot.lane.b32.xlu1 %v8128_v56, %s6688_s15  ;;  %4453 = vrot.lane.b32.xlu0 %v8134_v20, %s6688_s15  ;;  %v8166_v27 = vpop.f32.mrb[17].mxu1 }
 0x461   :  { %v8168_v2 = vpop.f32.mrb[18].mxu1 }
 0x462   :  { %4389 = vrot.lane.b32.xlu1 %v8134_v20, %s6691_s3  ;;  %4395 = vrot.lane.b32.xlu0 %v8136_v47, %s6691_s3  ;;  %v8174_v54 = vpop.f32.mrb[19].mxu1 }
 0x466   :  { %4331 = vrot.lane.b32.xlu1 %v8136_v47, %s6692_s29  ;;  %4393 = vrot.lane.b32.xlu0 %v8142_v63, %s6691_s3 }
 0x46a   :  { %4329 = vrot.lane.b32.xlu1 %v8142_v63, %s6692_s29  ;;  %4335 = vrot.lane.b32.xlu0 %v8144_v39, %s6692_s29 }
 0x46e   :  { %4457 = vrot.lane.b32.xlu1 %v8142_v63, %s6688_s15  ;;  %4463 = vrot.lane.b32.xlu0 %v8144_v39, %s6688_s15 }
 0x472   :  { %4399 = vrot.lane.b32.xlu1 %v8144_v39, %s6691_s3  ;;  %4339 = vrot.lane.b32.xlu0 %v8152_v32, %s6692_s29 }
 0x476   :  { %4403 = vrot.lane.b32.xlu1 %v8152_v32, %s6691_s3  ;;  %4467 = vrot.lane.b32.xlu0 %v8152_v32, %s6688_s15 }
 0x47a   :  { %4401 = vrot.lane.b32.xlu1 %v8158_v45, %s6691_s3  ;;  %4337 = vrot.lane.b32.xlu0 %v8158_v45, %s6692_s29 }
 0x47e   :  { %4465 = vrot.lane.b32.xlu0 %v8158_v45, %s6688_s15  ;;  %4343 = vrot.lane.b32.xlu1 %v8160_v46, %s6692_s29 }
 0x482   :  { %4407 = vrot.lane.b32.xlu0 %v8160_v46, %s6691_s3  ;;  %4471 = vrot.lane.b32.xlu1 %v8160_v46, %s6688_s15 }
 0x486   :  { %4405 = vrot.lane.b32.xlu0 %v8166_v27, %s6691_s3  ;;  %4341 = vrot.lane.b32.xlu1 %v8166_v27, %s6692_s29 }
 0x48a   :  { %4469 = vrot.lane.b32.xlu1 %v8166_v27, %s6688_s15  ;;  %4347 = vrot.lane.b32.xlu0 %v8168_v2, %s6692_s29 }
 0x48e   :  { %4411 = vrot.lane.b32.xlu1 %v8168_v2, %s6691_s3  ;;  %4345 = vrot.lane.b32.xlu0 %v8174_v54, %s6692_s29 }
 0x492   :  { %4409 = vrot.lane.b32.xlu1 %v8174_v54, %s6691_s3  ;;  %4473 = vrot.lane.b32.xlu0 %v8174_v54, %s6688_s15 }
 0x496   :  { %4459 = vrot.lane.b32.xlu1 %v8136_v47, %s6688_s15  ;;  %4475 = vrot.lane.b32.xlu0 %v8168_v2, %s6688_s15 }
 0x49a   :  { %4317 = vrot.lane.b32.xlu1 %v8118_v25, %s6692_s29  ;;  %4333 = vrot.lane.b32.xlu0 %v8150_v31, %s6692_s29 }
 0x49e   :  { %4381 = vrot.lane.b32.xlu1 %v8118_v25, %s6691_s3  ;;  %4397 = vrot.lane.b32.xlu0 %v8150_v31, %s6691_s3 }
 0x4a2   :  { %4445 = vrot.lane.b32.xlu1 %v8118_v25, %s6688_s15  ;;  %4461 = vrot.lane.b32.xlu0 %v8150_v31, %s6688_s15 }
 0x4b8   :  { %v4320_v41 = vpop.permute.xlu1 %4319  ;;  %v4384_v48 = vpop.permute.xlu0 %4383 }
 0x4b9   :  { %v4366_v50 = vmax.f32 %v8112_v49, %v4320_v41  ;;  %v6378_v49 = vpack.c.bf16 %v4650_v36, %v4649_v28 }
 0x4bb   :  { %v4430_v51 = vmax.f32 %v4366_v50, %v4384_v48  ;;  %6379 = vmatprep.subr.bf16.mxu0 %v6378_v49  ;;  %v4639_v49 = vld [vmem:[%s8512_s5 + $0x50] sm:$0xff] }
 0x4bc   :  { %v4448_v40 = vpop.permute.xlu1 %4447  ;;  %v4324_v53 = vpop.permute.xlu0 %4323 }
 0x4bd   :  { %v4494_v34 = vmax.f32 %v4430_v51, %v4448_v40  ;;  %v4368_v8 = vmax.f32 %v8120_v62, %v4324_v53  ;;  %v4634_v62 = vld [vmem:[%s8512_s5 + $0x28] sm:$0xff] }
 0x4bf   :  { %v4517_v13 = vadd.f32 %v8244_v38, %v4494_v34 }
 0x4c0   :  { %v4388_v57 = vpop.permute.xlu1 %4387  ;;  %v4452_v11 = vpop.permute.xlu0 %4451 }
 0x4c1   :  { %v4533_v60 = vmax.f32 %v4517_v13, 0.0  ;;  %v4432_v33 = vmax.f32 %v4368_v8, %v4388_v57 }
 0x4c3   :  { %v4496_v16 = vmax.f32 %v4432_v33, %v4452_v11  ;;  %4550 = vrot.lane.b32.xlu1 %v4533_v60, %s6693_s13 }
 0x4c4   :  { %v4322_v44 = vpop.permute.xlu1 %4321  ;;  %v4386_v43 = vpop.permute.xlu0 %4385 }
 0x4c5   :  { %v4519_v30 = vadd.f32 %v8244_v38, %v4496_v16  ;;  %v4367_v6 = vmax.f32 %v8126_v55, %v4322_v44  ;;  %v6380_v55 = vpack.c.bf16 %v4634_v62, %v4633_v58  ;;  %v4635_v44 = vld [vmem:[%s8512_s5 + $0x30] sm:$0xff] }
 0x4c6   :  { %v6384_v15 = vpack.c.bf16 %v4636_v7, %v4635_v44  ;;  %v4655_v58 = vld [vmem:[%s8512_s5 + $0xd0] sm:$0xff] }
 0x4c7   :  { %v4535_v42 = vmax.f32 %v4519_v30, 0.0  ;;  %v4431_v5 = vmax.f32 %v4367_v6, %v4386_v43  ;;  %6381 = vmatpush3.bf16.msra.mxu0 %v6380_v55 }
 0x4c8   :  { %v4450_v22 = vpop.permute.xlu1 %4449  ;;  %v4392_v1 = vpop.permute.xlu0 %4391 }
 0x4c9   :  { %v4495_v9 = vmax.f32 %v4431_v5, %v4450_v22  ;;  %4562 = vrot.lane.b32.xlu1 %v4535_v42, %s6694_s21  ;;  %v4654_v42 = vld [vmem:[%s8512_s5 + $0xc8] sm:$0xff] }
 0x4cb   :  { %v4518_v17 = vadd.f32 %v8244_v38, %v4495_v9 }
 0x4cc   :  { %v4328_v19 = vpop.permute.xlu1 %4327  ;;  %v4326_v0 = vpop.permute.xlu0 %4325 }
 0x4cd   :  { %v4534_v21 = vmax.f32 %v4518_v17, 0.0  ;;  %v4370_v59 = vmax.f32 %v8128_v56, %v4328_v19  ;;  %v4369_v56 = vmax.f32 %v8134_v20, %v4326_v0  ;;  %v4637_v0 = vld [vmem:[%s8512_s5 + $0x40] sm:$0xff] }
 0x4cf   :  { %4556 = vrot.lane.b32.xlu1 %v4534_v21, %s6695_s1  ;;  %v4434_v10 = vmax.f32 %v4370_v59, %v4392_v1  ;;  %v6386_v1 = vpack.c.bf16 %v4654_v42, %v4653_v26  ;;  %v4638_v21 = vld [vmem:[%s8512_s5 + $0x48] sm:$0xff] }
 0x4d0   :  { %v4456_v37 = vpop.permute.xlu1 %4455  ;;  %v4454_v24 = vpop.permute.xlu0 %4453 }
 0x4d1   :  { %v4498_v23 = vmax.f32 %v4434_v10, %v4456_v37 }
 0x4d3   :  { %v4521_v41 = vadd.f32 %v8244_v38, %v4498_v23  ;;  %v4656_v23 = vld [vmem:[%s8512_s5 + $0xd8] sm:$0xff] }
 0x4d4   :  { %v4390_v48 = vpop.permute.xlu1 %4389  ;;  %v8293_v50 = vpop.permute.xlu0 %4395 }
 0x4d5   :  { %v4537_v51 = vmax.f32 %v4521_v41, 0.0  ;;  %v4433_v40 = vmax.f32 %v4369_v56, %v4390_v48  ;;  %v4640_v56 = vld [vmem:[%s8512_s5 + $0x58] sm:$0xff] }
 0x4d6   :  { %v6392_v48 = vpack.c.bf16 %v4640_v56, %v4639_v49  ;;  %v4741_v49 = vld [vmem:[%s8513_s7 + $0x10] sm:$0xff]  ;;  %v4742_v56 = vld [vmem:[%s8513_s7 + $0x18] sm:$0xff] }
 0x4d7   :  { %v4497_v53 = vmax.f32 %v4433_v40, %v4454_v24  ;;  %4574 = vrot.lane.b32.xlu1 %v4537_v51, %s6688_s15 }
 0x4d8   :  { %v8296_v34 = vpop.permute.xlu1 %4331  ;;  %v4394_v13 = vpop.permute.xlu0 %4393 }
 0x4d9   :  { %v4520_v8 = vadd.f32 %v8244_v38, %v4497_v53 }
 0x4db   :  { %v4536_v57 = vmax.f32 %v4520_v8, 0.0 }
 0x4dc   :  { %v4330_v11 = vpop.permute.xlu1 %4329  ;;  %v4336_v20 = vpop.permute.xlu0 %4335 }
 0x4dd   :  { %v4371_v60 = vmax.f32 %v8142_v63, %v4330_v11  ;;  %4568 = vrot.lane.b32.xlu1 %v4536_v57, %s6696_s19  ;;  %v6382_v63 = vpack.c.bf16 %v4652_v3, %v4651_v12  ;;  %v4374_v30 = vmax.f32 %v8144_v39, %v4336_v20  ;;  %v4657_v20 = vld [vmem:[%s8512_s5 + $0xe0] sm:$0xff]  ;;  %v4642_v12 = vld [vmem:[%s8512_s5 + $0x68] sm:$0xff] }
 0x4df   :  { %v4435_v33 = vmax.f32 %v4371_v60, %v4394_v13  ;;  %6383 = vmatprep.subr.bf16.mxu0 %v6382_v63  ;;  %v4658_v60 = vld [vmem:[%s8512_s5 + $0xe8] sm:$0xff] }
 0x4e0   :  { %v4458_v16 = vpop.permute.xlu1 %4457  ;;  %v4464_v29 = vpop.permute.xlu0 %4463  ;;  %6385 = vmatpush3.bf16.msra.mxu0 %v6384_v15 }
 0x4e1   :  { %v4499_v43 = vmax.f32 %v4435_v33, %v4458_v16  ;;  %6387 = vmatprep.subr.bf16.mxu0 %v6386_v1  ;;  %v4372_v1 = vmax.f32 %v8136_v47, %v8296_v34 }
 0x4e3   :  { %v4522_v6 = vadd.f32 %v8244_v38, %v4499_v43 }
 0x4e4   :  { %v4400_v5 = vpop.permute.xlu1 %4399  ;;  %v4340_v22 = vpop.permute.xlu0 %4339 }
 0x4e5   :  { %v4538_v9 = vmax.f32 %v4522_v6, 0.0  ;;  %v4438_v18 = vmax.f32 %v4374_v30, %v4400_v5  ;;  %v4376_v39 = vmax.f32 %v8152_v32, %v4340_v22  ;;  %v6388_v32 = vpack.c.bf16 %v4638_v21, %v4637_v0 }
 0x4e7   :  { %v4502_v52 = vmax.f32 %v4438_v18, %v4464_v29  ;;  %4580 = vrot.lane.b32.xlu1 %v4538_v9, %s6691_s3  ;;  %6389 = vmatpush3.bf16.msra.mxu0 %v6388_v32  ;;  %v6394_v29 = vpack.c.bf16 %v4658_v60, %v4657_v20 }
 0x4e8   :  { %v4404_v61 = vpop.permute.xlu1 %4403  ;;  %v4468_v14 = vpop.permute.xlu0 %4467 }
 0x4e9   :  { %v4525_v35 = vadd.f32 %v8244_v38, %v4502_v52  ;;  %v4440_v17 = vmax.f32 %v4376_v39, %v4404_v61  ;;  %v4659_v52 = vld [vmem:[%s8512_s5 + $0xf0] sm:$0xff]  ;;  %v4660_v39 = vld [vmem:[%s8512_s5 + $0xf8] sm:$0xff] }
 0x4ea   :  { %v4643_v61 = vld [vmem:[%s8512_s5 + $0x70] sm:$0xff] }
 0x4eb   :  { %v4541_v4 = vmax.f32 %v4525_v35, 0.0  ;;  %v4504_v19 = vmax.f32 %v4440_v17, %v4468_v14  ;;  %v4644_v14 = vld [vmem:[%s8512_s5 + $0x78] sm:$0xff] }
 0x4ec   :  { %v4402_v59 = vpop.permute.xlu1 %4401  ;;  %v4338_v10 = vpop.permute.xlu0 %4337  ;;  %v6400_v35 = vpack.c.bf16 %v4644_v14, %v4643_v61 }
 0x4ed   :  { %v4527_v37 = vadd.f32 %v8244_v38, %v4504_v19  ;;  %v4375_v24 = vmax.f32 %v8158_v45, %v4338_v10  ;;  %4593 = vrot.lane.b32.xlu0 %v4541_v4, %s6693_s13  ;;  %v6390_v45 = vpack.c.bf16 %v4656_v23, %v4655_v58  ;;  %v4436_v19 = vmax.f32 %v4372_v1, %v8293_v50  ;;  %v4739_v50 = vld [vmem:[%s8513_s7] sm:$0xff]  ;;  %v4740_v23 = vld [vmem:[%s8513_s7 + $0x8] sm:$0xff] }
 0x4ef   :  { %v4543_v28 = vmax.f32 %v4527_v37, 0.0  ;;  %v4439_v36 = vmax.f32 %v4375_v24, %v4402_v59  ;;  %6391 = vmatprep.subr.bf16.mxu0 %v6390_v45  ;;  %v6403_v45 = vpack.c.bf16 %v4740_v23, %v4739_v50  ;;  %v4842_v50 = vld [vmem:[%s8514_s9 + $0x30] sm:$0xff]  ;;  %v4843_v23 = vld [vmem:[%s8514_s9 + $0x38] sm:$0xff] }
 0x4f0   :  { %v4344_v62 = vpop.permute.xlu1 %4343  ;;  %v4466_v55 = vpop.permute.xlu0 %4465  ;;  %6393 = vmatpush3.bf16.msra.mxu0 %v6392_v48 }
 0x4f1   :  { %v4503_v41 = vmax.f32 %v4439_v36, %v4466_v55  ;;  %4603 = vrot.lane.b32.xlu0 %v4543_v28, %s6694_s21  ;;  %v4378_v51 = vmax.f32 %v8160_v46, %v4344_v62  ;;  %v4641_v46 = vld [vmem:[%s8512_s5 + $0x60] sm:$0xff]  ;;  %6395 = vmatprep.subr.bf16.mxu0 %v6394_v29  ;;  %v6697_v55 = vmov 0.0|0.0  }
 0x4f2   :  { %v6396_v43 = vpack.c.bf16 %v4642_v12, %v4641_v46  ;;  %6402 = vmatprep.subr.bf16.mxu1 %v6697_v55 }
 0x4f3   :  { %v4526_v40 = vadd.f32 %v8244_v38, %v4503_v41  ;;  %6404 = vmatpush3.bf16.msra.mxu1 %v6403_v45  ;;  %v5366_v45 = vld [vmem:[%s8515_s6] ss:$0 sm:$0xff] }
 0x4f4   :  { %v4472_v53 = vpop.permute.xlu1 %4471  ;;  %v4408_v13 = vpop.permute.xlu0 %4407  ;;  %6397 = vmatpush3.bf16.msra.mxu0 %v6396_v43  ;;  %6405 = vmatprep.subr.bf16.mxu1 %v6697_v55 }
 0x4f5   :  { %v4542_v8 = vmax.f32 %v4526_v40, 0.0  ;;  %v4442_v57 = vmax.f32 %v4378_v51, %v4408_v13  ;;  %v4743_v13 = vld [vmem:[%s8513_s7 + $0x20] sm:$0xff] }
 0x4f7   :  { %v4506_v11 = vmax.f32 %v4442_v57, %v4472_v53  ;;  %4598 = vrot.lane.b32.xlu0 %v4542_v8, %s6695_s1  ;;  %v6406_v53 = vpack.c.bf16 %v4742_v56, %v4741_v49  ;;  %v4744_v8 = vld [vmem:[%s8513_s7 + $0x28] sm:$0xff]  ;;  %v6433_v49 = vpack.c.bf16 %v4843_v23, %v4842_v50 }
 0x4f8   :  { %v4342_v33 = vpop.permute.xlu1 %4341  ;;  %v4406_v16 = vpop.permute.xlu0 %4405  ;;  %v6409_v46 = vpack.c.bf16 %v4744_v8, %v4743_v13  ;;  %v4846_v13 = vld [vmem:[%s8514_s9 + $0x50] sm:$0xf]  ;;  %v5367_v8 = vld [vmem:[%s8516_s8] ss:$0 sm:$0xff] }
 0x4f9   :  { %v4529_v3 = vadd.f32 %v8244_v38, %v4506_v11  ;;  %v4377_v44 = vmax.f32 %v8166_v27, %v4342_v33  ;;  %6407 = vmatpush3.bf16.msra.mxu1 %v6406_v53  ;;  %v4745_v33 = vld [vmem:[%s8513_s7 + $0x30] sm:$0xff]  ;;  %v4845_v53 = vld [vmem:[%s8514_s9 + $0x48] sm:$0xff] }
 0x4fa   :  { %6408 = vmatprep.subr.bf16.mxu1 %v6697_v55 }
 0x4fb   :  { %v4545_v63 = vmax.f32 %v4529_v3, 0.0  ;;  %v4441_v7 = vmax.f32 %v4377_v44, %v4406_v16  ;;  %v4746_v16 = vld [vmem:[%s8513_s7 + $0x38] sm:$0xff] }
 0x4fc   :  { %v4470_v15 = vpop.permute.xlu1 %4469  ;;  %v4348_v30 = vpop.permute.xlu0 %4347  ;;  %v6412_v43 = vpack.c.bf16 %v4746_v16, %v4745_v33 }
 0x4fd   :  { %v4505_v6 = vmax.f32 %v4441_v7, %v4470_v15  ;;  %4613 = vrot.lane.b32.xlu0 %v4545_v63, %s6688_s15  ;;  %v4380_v47 = vmax.f32 %v8168_v2, %v4348_v30  ;;  %6410 = vmatpush3.bf16.msra.mxu1 %v6409_v46  ;;  %v4747_v63 = vld [vmem:[%s8513_s7 + $0x40] sm:$0xff]  ;;  %v4748_v7 = vld [vmem:[%s8513_s7 + $0x48] sm:$0xff]  ;;  %v4749_v15 = vld [vmem:[%s8513_s7 + $0x50] sm:$0xff] }
 0x4fe   :  { %6411 = vmatprep.subr.bf16.mxu1 %v6697_v55  ;;  %v4750_v30 = vld [vmem:[%s8513_s7 + $0x58] sm:$0xff] }
 0x4ff   :  { %v4528_v26 = vadd.f32 %v8244_v38, %v4505_v6  ;;  %v6418_v6 = vpack.c.bf16 %v4750_v30, %v4749_v15 }
 0x500   :  { %v4412_v42 = vpop.permute.xlu1 %4411  ;;  %v4346_v5 = vpop.permute.xlu0 %4345 }
 0x501   :  { %v4544_v22 = vmax.f32 %v4528_v26, 0.0  ;;  %v4379_v27 = vmax.f32 %v8174_v54, %v4346_v5  ;;  %v6398_v54 = vpack.c.bf16 %v4660_v39, %v4659_v52  ;;  %v4444_v17 = vmax.f32 %v4380_v47, %v4412_v42  ;;  %6413 = vmatpush3.bf16.msra.mxu1 %v6412_v43 }
 0x502   :  { %6414 = vmatprep.subr.bf16.mxu1 %v6697_v55 }
 0x503   :  { %4608 = vrot.lane.b32.xlu0 %v4544_v22, %s6696_s19  ;;  %6399 = vmatprep.subr.bf16.mxu0 %v6398_v54 }
 0x504   :  { %v4410_v9 = vpop.permute.xlu1 %4409  ;;  %v4474_v18 = vpop.permute.xlu0 %4473  ;;  %6401 = vmatpush3.bf16.msra.mxu0 %v6400_v35 }
 0x505   :  { %v4443_v34 = vmax.f32 %v4379_v27, %v4410_v9  ;;  %6423 = vmatprep.subr.bf16.mxu0 %v6697_v55 }
 0x507   :  { %v4507_v4 = vmax.f32 %v4443_v34, %v4474_v18 }
 0x508   :  { %v4460_v0 = vpop.permute.xlu1 %4459  ;;  %v4476_v21 = vpop.permute.xlu0 %4475 }
 0x509   :  { %v4530_v59 = vadd.f32 %v8244_v38, %v4507_v4  ;;  %v4500_v10 = vmax.f32 %v4436_v19, %v4460_v0  ;;  %v4508_v32 = vmax.f32 %v4444_v17, %v4476_v21  ;;  %v4751_v17 = vld [vmem:[%s8513_s7 + $0x60] sm:$0xff]  ;;  %v4752_v4 = vld [vmem:[%s8513_s7 + $0x68] sm:$0xff]  ;;  %v6698_v0 = vmov 0.0   ;;  %v4753_v21 = vld [vmem:[%s8513_s7 + $0x70] sm:$0xff] }
 0x50a   :  { %v6421_v19 = vpack.c.bf16 %v4752_v4, %v4751_v17  ;;  %6290 = vmatprep.mubr.msk.f32.mxu1 %vm6699_vm9, %v6698_v0 }
 0x50b   :  { %v4546_v2 = vmax.f32 %v4530_v59, 0.0  ;;  %v4523_v37 = vadd.f32 %v8244_v38, %v4500_v10  ;;  %v4531_v24 = vadd.f32 %v8244_v38, %v4508_v32  ;;  %v4836_v59 = vld [vmem:[%s8514_s9] sm:$0xff]  ;;  %v4837_v10 = vld [vmem:[%s8514_s9 + $0x8] sm:$0xff]  ;;  %v4838_v32 = vld [vmem:[%s8514_s9 + $0x10] sm:$0xff] }
 0x50c   :  { %v4318_v28 = vpop.permute.xlu1 %4317  ;;  %v4334_v36 = vpop.permute.xlu0 %4333 }
 0x50d   :  { %v4539_v58 = vmax.f32 %v4523_v37, 0.0  ;;  %4618 = vrot.lane.b32.xlu0 %v4546_v2, %s6691_s3  ;;  %v4547_v62 = vmax.f32 %v4531_v24, 0.0  ;;  %v4365_v51 = vmax.f32 %v8118_v25, %v4318_v28  ;;  %v4373_v40 = vmax.f32 %v8150_v31, %v4334_v36  ;;  %v4839_v37 = vld [vmem:[%s8514_s9 + $0x18] sm:$0xff]  ;;  %v4840_v28 = vld [vmem:[%s8514_s9 + $0x20] sm:$0xff]  ;;  %v4841_v36 = vld [vmem:[%s8514_s9 + $0x28] sm:$0xff] }
 0x50e   :  { %v6424_v2 = vpack.c.bf16 %v4837_v10, %v4836_v59  ;;  %v6427_v24 = vpack.c.bf16 %v4839_v37, %v4838_v32 }
 0x50f   :  { %4586 = vrot.lane.b32.xlu1 %v4539_v58, %s6692_s29  ;;  %v6430_v58 = vpack.c.bf16 %v4841_v36, %v4840_v28 }
 0x510   :  { %v4382_v41 = vpop.permute.xlu1 %4381  ;;  %v4398_v48 = vpop.permute.xlu0 %4397 }
 0x511   :  { %4623 = vrot.lane.b32.xlu0 %v4547_v62, %s6692_s29  ;;  %v4429_v57 = vmax.f32 %v4365_v51, %v4382_v41  ;;  %v4437_v11 = vmax.f32 %v4373_v40, %v4398_v48  ;;  %v4844_v40 = vld [vmem:[%s8514_s9 + $0x40] sm:$0xff] }
 0x514   :  { %v4446_v20 = vpop.permute.xlu1 %4445  ;;  %v4462_v25 = vpop.permute.xlu0 %4461 }
 0x515   :  { %v4493_v60 = vmax.f32 %v4429_v57, %v4446_v20  ;;  %v4501_v31 = vmax.f32 %v4437_v11, %v4462_v25 }
 0x517   :  { %v4516_v29 = vadd.f32 %v8244_v38, %v4493_v60  ;;  %v4524_v12 = vadd.f32 %v8244_v38, %v4501_v31  ;;  %v6415_v38 = vpack.c.bf16 %v4748_v7, %v4747_v63  ;;  %v5369_v60 = vld [vmem:[%s8517_s10] ss:$0 sm:$0xff] }
 0x519   :  { %v4532_v3 = vmax.f32 %v4516_v29, 0.0  ;;  %v4540_v44 = vmax.f32 %v4524_v12, 0.0  ;;  %6416 = vmatpush3.bf16.msra.mxu1 %v6415_v38 }
 0x51a   :  { %6417 = vmatprep.subr.bf16.mxu1 %v6697_v55 }
 0x51b   :  { %4548 = vst.msk [vmem:[#allocation3] sm:$0xff] %vm116_vm0, %v4532_v3  ;;  %4591 = vst.msk [vmem:[#allocation3 + $0x8] sm:$0xff] %vm116_vm0, %v4540_v44 }
 0x51d   :  { %6419 = vmatpush3.bf16.msra.mxu1 %v6418_v6 }
 0x51e   :  { %6420 = vmatprep.subr.bf16.mxu1 %v6697_v55 }
 0x521   :  { %6422 = vmatpush3.bf16.msra.mxu1 %v6421_v19 }
 0x522   :  { %6288 = vmatprep.subr.mxu1 %v6698_v0 }
 0x525   :  { %6289 = vmatpush3.msra.mxu1 %v4753_v21 }
 0x535   :  { %v4551_v26 = vpop.permute.xlu1 %4550 }
 0x536   :  { %4554 = vst.msk [vmem:[#allocation3] sm:$0xff] %vm4553_vm2, %v4551_v26 }
 0x53b   :  { %v4563_v42 = vpop.permute.xlu1 %4562 }
 0x541   :  { %v4557_v5 = vpop.permute.xlu1 %4556 }
 0x542   :  { %4560 = vst.msk [vmem:[#allocation3] sm:$0xff] %vm4559_vm3, %v4557_v5 }
 0x543   :  { %4566 = vst.msk [vmem:[#allocation3] sm:$0xff] %vm4565_vm4, %v4563_v42 }
 0x549   :  { %v4575_v22 = vpop.permute.xlu1 %4574 }
 0x54f   :  { %v4569_v1 = vpop.permute.xlu1 %4568 }
 0x550   :  { %4572 = vst.msk [vmem:[#allocation3] sm:$0xff] %vm4571_vm5, %v4569_v1 }
 0x551   :  { %4578 = vst.msk [vmem:[#allocation3] sm:$0xff] %vm4577_vm6, %v4575_v22 }
 0x559   :  { %v4581_v27 = vpop.permute.xlu1 %4580 }
 0x55a   :  { %4584 = vst.msk [vmem:[#allocation3] sm:$0xff] %vm4583_vm7, %v4581_v27 }
 0x55f   :  { %v4594_v9 = vpop.permute.xlu0 %4593 }
 0x560   :  { %4596 = vst.msk [vmem:[#allocation3 + $0x8] sm:$0xff] %vm4553_vm2, %v4594_v9 }
 0x563   :  { %v4604_v18 = vpop.permute.xlu0 %4603 }
 0x569   :  { %v4599_v52 = vpop.permute.xlu0 %4598 }
 0x56a   :  { %4601 = vst.msk [vmem:[#allocation3 + $0x8] sm:$0xff] %vm4559_vm3, %v4599_v52 }
 0x56b   :  { %4606 = vst.msk [vmem:[#allocation3 + $0x8] sm:$0xff] %vm4565_vm4, %v4604_v18 }
 0x56f   :  { %v4614_v39 = vpop.permute.xlu0 %4613 }
 0x575   :  { %v4609_v61 = vpop.permute.xlu0 %4608 }
 0x576   :  { %4611 = vst.msk [vmem:[#allocation3 + $0x8] sm:$0xff] %vm4571_vm5, %v4609_v61 }
 0x577   :  { %4616 = vst.msk [vmem:[#allocation3 + $0x8] sm:$0xff] %vm4577_vm6, %v4614_v39 }
 0x57f   :  { %v4619_v47 = vpop.permute.xlu0 %4618 }
 0x580   :  { %4621 = vst.msk [vmem:[#allocation3 + $0x8] sm:$0xff] %vm4583_vm7, %v4619_v47 }
 0x581   :  { %v4587_v34 = vpop.permute.xlu1 %4586 }
 0x582   :  { %4590 = vst.msk [vmem:[#allocation3] sm:$0xff] %vm4589_vm8, %v4587_v34 }
 0x583   :  { %v4624_v54 = vpop.permute.xlu0 %4623 }
 0x584   :  { %4626 = vst.msk [vmem:[#allocation3 + $0x8] sm:$0xff] %vm4589_vm8, %v4624_v54 }
 0x589   :  { %v4627_v35 = vld [vmem:[#allocation3] sm:$0xff] }
 0x58b   :  { %v4628_v14 = vld [vmem:[#allocation3 + $0x8] sm:$0xff] }
 0x58c   :  { %4732 = vmatprep.mubr.f32.mxu0 %v4628_v14 }
 0x58d   :  { %4733 = vmatmul.mubr.f32.vlgmr.msra.gmra.mrb[36].mxu0 %v4627_v35 }
 0x58e   :  { %6315 = vmatprep.mubr.msk.f32.mxu0 %vm6699_vm9, %v6698_v0  ;;  %6425 = vmatpush3.bf16.msra.mxu0 %v6424_v2 }
 0x58f   :  { %6426 = vmatprep.subr.bf16.mxu0 %v6697_v55 }
 0x592   :  { %6428 = vmatpush3.bf16.msra.mxu0 %v6427_v24 }
 0x593   :  { %6429 = vmatprep.subr.bf16.mxu0 %v6697_v55 }
 0x596   :  { %6431 = vmatpush3.bf16.msra.mxu0 %v6430_v58 }
 0x597   :  { %6432 = vmatprep.subr.bf16.mxu0 %v6697_v55 }
 0x59a   :  { %6434 = vmatpush3.bf16.msra.mxu0 %v6433_v49 }
 0x59b   :  { %6435 = vmatprep.subr.bf16.mxu0 %v6697_v55  ;;  %v6436_v55 = vpack.c.bf16 %v4845_v53, %v4844_v40 }
 0x59e   :  { %6437 = vmatpush3.bf16.msra.mxu0 %v6436_v55 }
 0x59f   :  { %6313 = vmatprep.subr.mxu0 %v6698_v0 }
 0x5a2   :  { %6314 = vmatpush3.msk.msra.mxu0 %vm4858_vm11, %v4846_v13 }
 0x660   :  { %v5727_v62 = vpop.f32.mrb[36].mxu0 }
 0x661   :  { %v5728_v56 = vpop.f32.mrb[37].mxu0 }
 0x662   :  { %v5729_v41 = vadd.f32 %v5728_v56, %v5727_v62 }
 0x664   :  { %v4735_v48 = vadd.f32 %v5729_v41, %v5366_v45 }
 0x666   :  { %v4738_v51 = vmax.f32 %v4735_v48, 0.0 }
 0x668   :  { %6291 = vmatmul.mubr.msk.f32.vlgmr.msra.gmra.mrb[20].mxu1 %vm4761_vm10, %v4738_v51 }
 0x73b   :  { %v4831_v57 = vpop.f32.mrb[20].mxu1 }
 0x73c   :  { %v4832_v11 = vadd.f32 %v5367_v8, %v4831_v57  ;;  %v6292_v20 = vpop.f32.mrb[21].mxu1 }
 0x73e   :  { %v4835_v25 = vmax.f32 %v4832_v11, 0.0 }
 0x740   :  { %6316 = vmatmul.mubr.msk.f32.vlgmr.msra.gmra.mrb[38].mxu0 %vm4854_vm12, %v4835_v25 }
 0x813   :  { %v4928_v31 = vpop.f32.mrb[38].mxu0 }
 0x814   :  { %v4929_v46 = vadd.f32 %v5369_v60, %v4928_v31  ;;  %v6317_v33 = vpop.f32.mrb[39].mxu0 }
 0x816   :  { %4933 = vst.msk [vmem:[%s8518_s11] sm:$0xff] %vm4932_vm13, %v4929_v46 }

</bundles_post_ra>
